<compile_context>
chip_gen: v6e
topology: v6e:2x2x1
jax: 0.10.0
libtpu: 0.0.40
codegen_flags: <defaults>
</compile_context>

<pallas_src>
import functools
import numpy as np
import jax
import jax.numpy as jnp
from jax.experimental import pallas as pl
from jax.experimental.pallas import tpu as pltpu


# ---------------------------------------------------------------------------
# Pallas kernel: depthwise KxK conv + bias + exact GELU, BB images per step
# ---------------------------------------------------------------------------
def _dwconv_gelu_kernel(x_ref, w_ref, b_ref, o_ref, xpad_ref, *, K, H, W, C, BB):
    """x_ref:    (BB, H, W*C)   unpadded input, W and C fused into lanes
       w_ref:    (K*K, W*C)     per-tap weights, tiled W times along lanes (resident)
       b_ref:    (1, W*C)       bias, tiled W times along lanes (resident)
       o_ref:    (BB, H, W*C)   output (lane-dense store, W*C % 128 == 0)
       xpad_ref: (Hp, Wp*C)     VMEM scratch holding the zero-padded image."""
    P = (K - 1) // 2
    WC = W * C

    # Zero the padded scratch once per grid step. The interior is overwritten
    # for every image below, so the halo stays zero across the BB loop.
    xpad_ref[...] = jnp.zeros_like(xpad_ref)

    w_all = w_ref[...]                                    # (K*K, W*C), VMEM resident
    bias_b = jnp.broadcast_to(b_ref[...], (H, WC))        # hoisted bias broadcast

    for bb in range(BB):
        # Place the unpadded image into the interior of the zero-filled scratch
        # (single in-VMEM copy; lane start P*C is intentionally unaligned).
        xpad_ref[P:P + H, P * C:P * C + WC] = x_ref[bb]

        acc = bias_b                                      # bias-initialized accumulator
        # Depthwise KxK conv: dx outer so the (unaligned) lane shift is paid
        # once per dx; dy offsets are cheap sublane slices of the same slab.
        for dx in range(K):
            xs = xpad_ref[:, dx * C:dx * C + WC]          # (Hp, W*C), one realignment
            for dy in range(K):
                wt = w_all[dy * K + dx:dy * K + dx + 1, :]  # (1, W*C)
                acc = acc + xs[dy:dy + H, :] * wt

        # Exact GELU: 0.5*x*(1 + erf(x/sqrt(2))). erf via the Abramowitz-Stegun
        # 7.1.26 rational approximation (|err| < 1.5e-7), only exp/mul/add/select.
        z = acc * 0.7071067811865476
        a = jnp.abs(z)
        t = 1.0 / (1.0 + 0.3275911 * a)
        poly = t * (0.254829592 + t * (-0.284496736 + t * (1.421413741
                + t * (-1.453152027 + t * 1.061405429))))
        erf_abs = 1.0 - poly * jnp.exp(-a * a)
        erf_z = jnp.where(z >= 0.0, erf_abs, -erf_abs)
        o_ref[bb] = (0.5 * acc * (1.0 + erf_z)).astype(o_ref.dtype)


# ---------------------------------------------------------------------------
# One-time parameter prep (hoisted out of the per-call jit path)
# ---------------------------------------------------------------------------
def _padded_channels(W, C):
    """Smallest Cp >= C such that W*Cp is a multiple of 128 (lane-dense stores)."""
    Cp = C
    while (W * Cp) % 128:
        Cp += 1
    return Cp


def prepare_dwconv_params(weight, bias, x_size):
    """torch layout (C,1,K,K), (C,) -> lane-tiled (K*K, W*Cp), (1, W*Cp)."""
    H, W = x_size
    C = weight.shape[0]
    K = weight.shape[-1]
    Cp = _padded_channels(W, C)
    w_taps = jnp.asarray(weight).reshape(C, K * K).T.astype(jnp.float32)   # (K*K, C)
    b_row = jnp.asarray(bias).reshape(1, C).astype(jnp.float32)            # (1, C)
    if Cp != C:
        w_taps = jnp.pad(w_taps, ((0, 0), (0, Cp - C)))
        b_row = jnp.pad(b_row, ((0, 0), (0, Cp - C)))
    w_tiled = jnp.tile(w_taps, (1, W))       # [tap, w*Cp + c] = weight[c, 0, dy, dx]
    b_tiled = jnp.tile(b_row, (1, W))        # [0,   w*Cp + c] = bias[c]
    return w_tiled, b_tiled


# ---------------------------------------------------------------------------
# Wrapper: only free reshapes around a single pallas_call (no wrapper-side pad)
# ---------------------------------------------------------------------------
@functools.partial(jax.jit, static_argnames=("x_size",))
def dwconv_pallas(x, w_tiled, b_tiled, x_size):
    """x: (B, H*W, C) float32; w_tiled/b_tiled from prepare_dwconv_params."""
    B, N, C = x.shape
    H, W = x_size
    KK, WCp = w_tiled.shape
    K = int(round(KK ** 0.5))
    P = (K - 1) // 2
    Cp = WCp // W
    Hp, WpCp = H + 2 * P, (W + 2 * P) * Cp

    x4 = x.reshape(B, H, W, C)                            # free view
    if Cp != C:                                           # lane-density guard
        x4 = jnp.pad(x4, ((0, 0), (0, 0), (0, 0), (0, Cp - C)))
    x3 = x4.reshape(B, H, W * Cp)                         # fuse W and C into lanes

    # Batch blocking: aim for a 2-long 'parallel' grid (both v7x TCs busy) with
    # per-step blocks capped near ~1 MiB to amortize per-step overhead.
    bytes_per_img = H * W * Cp * 4
    BB = min(max(1, (1 << 20) // bytes_per_img), max(1, B // 2))
    while B % BB:
        BB -= 1

    kernel = functools.partial(_dwconv_gelu_kernel, K=K, H=H, W=W, C=Cp, BB=BB)

    out = pl.pallas_call(
        kernel,
        out_shape=jax.ShapeDtypeStruct((B, H, W * Cp), jnp.float32),
        grid=(B // BB,),
        in_specs=[
            pl.BlockSpec((BB, H, W * Cp), lambda b: (b, 0, 0)),   # unpadded images
            pl.BlockSpec((KK, W * Cp), lambda b: (0, 0)),         # weights (resident)
            pl.BlockSpec((1, W * Cp), lambda b: (0, 0)),          # bias (resident)
        ],
        out_specs=pl.BlockSpec((BB, H, W * Cp), lambda b: (b, 0, 0)),
        scratch_shapes=[pltpu.VMEM((Hp, WpCp), jnp.float32)],     # padded-image slab
        compiler_params=pltpu.CompilerParams(
            dimension_semantics=("parallel",)),
    )(x3, w_tiled, b_tiled)

    out = out.reshape(B, H, W, Cp)
    if Cp != C:
        out = out[..., :C]
    return out.reshape(B, N, C)                           # free view back to tokens


# ---------------------------------------------------------------------------
# Pure-JAX reference (mirrors the PyTorch forward exactly)
# ---------------------------------------------------------------------------
def dwconv_ref(x, weight, bias, x_size):
    B, N, C = x.shape
    H, W = x_size
    x4 = x.reshape(B, H, W, C)
    w_hwio = jnp.transpose(weight, (2, 3, 1, 0))          # (K, K, 1, C)
    y = jax.lax.conv_general_dilated(
        x4, w_hwio, window_strides=(1, 1), padding="SAME",
        dimension_numbers=("NHWC", "HWIO", "NHWC"),
        feature_group_count=C)
    y = y + bias
    y = jax.nn.gelu(y, approximate=False)                 # nn.GELU() default = exact
    return y.reshape(B, N, C)


if __name__ == "__main__":
    B = 2
    hidden_features = 32
    H = W = 16
    K = 5
    N = H * W

    key = jax.random.PRNGKey(0)
    kx, kw, kb = jax.random.split(key, 3)
    x = jax.random.normal(kx, (B, N, hidden_features), jnp.float32)
    weight = 0.1 * jax.random.normal(kw, (hidden_features, 1, K, K), jnp.float32)
    bias = 0.1 * jax.random.normal(kb, (hidden_features,), jnp.float32)

    # One-time parameter prep (kept out of the per-call jit path).
    w_tiled, b_tiled = prepare_dwconv_params(weight, bias, (H, W))
    w_tiled, b_tiled = jax.block_until_ready((w_tiled, b_tiled))

    out = dwconv_pallas(x, w_tiled, b_tiled, (H, W))
    out = jax.block_until_ready(out)

    ref = dwconv_ref(x, weight, bias, (H, W))
    np.testing.assert_allclose(np.asarray(out), np.asarray(ref),
                               rtol=1e-4, atol=1e-4)

    print("KERNEL_OK")
</pallas_src>

<mosaic_0001>
module attributes {stable_mosaic.version = 11 : i64} {
  func.func @_dwconv_gelu_kernel(%arg0: i32, %arg1: memref<1x16x512xf32, #tpu.memory_space<vmem>>, %arg2: memref<25x512xf32, #tpu.memory_space<vmem>>, %arg3: memref<1x512xf32, #tpu.memory_space<vmem>>, %arg4: memref<1x16x512xf32, #tpu.memory_space<vmem>>, %arg5: memref<20x640xf32, #tpu.memory_space<vmem>>) attributes {dimension_semantics = [#tpu.dimension_semantics<parallel>], iteration_bounds = array<i64: 2>, scalar_prefetch = 0 : i64, scratch_operands = 1 : i64, tpu.core_type = #tpu.core_type<tc>, window_params = [{transform_indices = @transform_0, window_bounds = array<i64: 1, 16, 512>}, {pipeline_mode = #tpu.pipeline_mode<synchronous>, transform_indices = @transform_1, window_bounds = array<i64: 25, 512>}, {pipeline_mode = #tpu.pipeline_mode<synchronous>, transform_indices = @transform_2, window_bounds = array<i64: 1, 512>}, {transform_indices = @transform_3, window_bounds = array<i64: 1, 16, 512>}]} {
    %cst = arith.constant 0.000000e+00 : f32
    %0 = vector.broadcast %cst : f32 to vector<20x640xf32>
    %c0 = arith.constant 0 : index
    %c0_0 = arith.constant 0 : index
    %1 = vector.load %arg5[%c0, %c0_0] : memref<20x640xf32, #tpu.memory_space<vmem>>, vector<20x640xf32>
    tpu.vector_store %arg5[%c0, %c0_0], %0 {strides = array<i32>} : memref<20x640xf32, #tpu.memory_space<vmem>>, vector<20x640xf32>,
    %c0_1 = arith.constant 0 : index
    %c0_2 = arith.constant 0 : index
    %2 = vector.load %arg2[%c0_1, %c0_2] : memref<25x512xf32, #tpu.memory_space<vmem>>, vector<25x512xf32>
    %c0_3 = arith.constant 0 : index
    %c0_4 = arith.constant 0 : index
    %3 = vector.load %arg3[%c0_3, %c0_4] : memref<1x512xf32, #tpu.memory_space<vmem>>, vector<1x512xf32>
    %4 = vector.shape_cast %3 : vector<1x512xf32> to vector<1x512xf32>
    %5 = vector.broadcast %4 : vector<1x512xf32> to vector<16x512xf32>
    %c0_5 = arith.constant 0 : index
    %c0_6 = arith.constant 0 : index
    %c0_7 = arith.constant 0 : index
    %6 = vector.load %arg1[%c0_5, %c0_6, %c0_7] : memref<1x16x512xf32, #tpu.memory_space<vmem>>, vector<1x16x512xf32>
    %7 = vector.shape_cast %6 : vector<1x16x512xf32> to vector<16x512xf32>
    %c2 = arith.constant 2 : index
    %c64 = arith.constant 64 : index
    %8 = vector.load %arg5[%c2, %c64] : memref<20x640xf32, #tpu.memory_space<vmem>>, vector<16x512xf32>
    tpu.vector_store %arg5[%c2, %c64], %7 {strides = array<i32>} : memref<20x640xf32, #tpu.memory_space<vmem>>, vector<16x512xf32>,
    %c0_8 = arith.constant 0 : index
    %c0_9 = arith.constant 0 : index
    %9 = vector.load %arg5[%c0_8, %c0_9] : memref<20x640xf32, #tpu.memory_space<vmem>>, vector<20x512xf32>
    %10 = vector.extract_strided_slice %2 {offsets = [0, 0], sizes = [1, 512], strides = [1, 1]} : vector<25x512xf32> to vector<1x512xf32>
    %11 = vector.extract_strided_slice %9 {offsets = [0, 0], sizes = [16, 512], strides = [1, 1]} : vector<20x512xf32> to vector<16x512xf32>
    %12 = vector.broadcast %10 : vector<1x512xf32> to vector<16x512xf32>
    %13 = arith.mulf %11, %12 : vector<16x512xf32>
    %14 = arith.addf %5, %13 : vector<16x512xf32>
    %15 = vector.extract_strided_slice %2 {offsets = [5, 0], sizes = [1, 512], strides = [1, 1]} : vector<25x512xf32> to vector<1x512xf32>
    %16 = vector.extract_strided_slice %9 {offsets = [1, 0], sizes = [16, 512], strides = [1, 1]} : vector<20x512xf32> to vector<16x512xf32>
    %17 = vector.broadcast %15 : vector<1x512xf32> to vector<16x512xf32>
    %18 = arith.mulf %16, %17 : vector<16x512xf32>
    %19 = arith.addf %14, %18 : vector<16x512xf32>
    %20 = vector.extract_strided_slice %2 {offsets = [10, 0], sizes = [1, 512], strides = [1, 1]} : vector<25x512xf32> to vector<1x512xf32>
    %21 = vector.extract_strided_slice %9 {offsets = [2, 0], sizes = [16, 512], strides = [1, 1]} : vector<20x512xf32> to vector<16x512xf32>
    %22 = vector.broadcast %20 : vector<1x512xf32> to vector<16x512xf32>
    %23 = arith.mulf %21, %22 : vector<16x512xf32>
    %24 = arith.addf %19, %23 : vector<16x512xf32>
    %25 = vector.extract_strided_slice %2 {offsets = [15, 0], sizes = [1, 512], strides = [1, 1]} : vector<25x512xf32> to vector<1x512xf32>
    %26 = vector.extract_strided_slice %9 {offsets = [3, 0], sizes = [16, 512], strides = [1, 1]} : vector<20x512xf32> to vector<16x512xf32>
    %27 = vector.broadcast %25 : vector<1x512xf32> to vector<16x512xf32>
    %28 = arith.mulf %26, %27 : vector<16x512xf32>
    %29 = arith.addf %24, %28 : vector<16x512xf32>
    %30 = vector.extract_strided_slice %2 {offsets = [20, 0], sizes = [1, 512], strides = [1, 1]} : vector<25x512xf32> to vector<1x512xf32>
    %31 = vector.extract_strided_slice %9 {offsets = [4, 0], sizes = [16, 512], strides = [1, 1]} : vector<20x512xf32> to vector<16x512xf32>
    %32 = vector.broadcast %30 : vector<1x512xf32> to vector<16x512xf32>
    %33 = arith.mulf %31, %32 : vector<16x512xf32>
    %34 = arith.addf %29, %33 : vector<16x512xf32>
    %c0_10 = arith.constant 0 : index
    %c32 = arith.constant 32 : index
    %35 = vector.load %arg5[%c0_10, %c32] : memref<20x640xf32, #tpu.memory_space<vmem>>, vector<20x512xf32>
    %36 = vector.extract_strided_slice %2 {offsets = [1, 0], sizes = [1, 512], strides = [1, 1]} : vector<25x512xf32> to vector<1x512xf32>
    %37 = vector.extract_strided_slice %35 {offsets = [0, 0], sizes = [16, 512], strides = [1, 1]} : vector<20x512xf32> to vector<16x512xf32>
    %38 = vector.broadcast %36 : vector<1x512xf32> to vector<16x512xf32>
    %39 = arith.mulf %37, %38 : vector<16x512xf32>
    %40 = arith.addf %34, %39 : vector<16x512xf32>
    %41 = vector.extract_strided_slice %2 {offsets = [6, 0], sizes = [1, 512], strides = [1, 1]} : vector<25x512xf32> to vector<1x512xf32>
    %42 = vector.extract_strided_slice %35 {offsets = [1, 0], sizes = [16, 512], strides = [1, 1]} : vector<20x512xf32> to vector<16x512xf32>
    %43 = vector.broadcast %41 : vector<1x512xf32> to vector<16x512xf32>
    %44 = arith.mulf %42, %43 : vector<16x512xf32>
    %45 = arith.addf %40, %44 : vector<16x512xf32>
    %46 = vector.extract_strided_slice %2 {offsets = [11, 0], sizes = [1, 512], strides = [1, 1]} : vector<25x512xf32> to vector<1x512xf32>
    %47 = vector.extract_strided_slice %35 {offsets = [2, 0], sizes = [16, 512], strides = [1, 1]} : vector<20x512xf32> to vector<16x512xf32>
    %48 = vector.broadcast %46 : vector<1x512xf32> to vector<16x512xf32>
    %49 = arith.mulf %47, %48 : vector<16x512xf32>
    %50 = arith.addf %45, %49 : vector<16x512xf32>
    %51 = vector.extract_strided_slice %2 {offsets = [16, 0], sizes = [1, 512], strides = [1, 1]} : vector<25x512xf32> to vector<1x512xf32>
    %52 = vector.extract_strided_slice %35 {offsets = [3, 0], sizes = [16, 512], strides = [1, 1]} : vector<20x512xf32> to vector<16x512xf32>
    %53 = vector.broadcast %51 : vector<1x512xf32> to vector<16x512xf32>
    %54 = arith.mulf %52, %53 : vector<16x512xf32>
    %55 = arith.addf %50, %54 : vector<16x512xf32>
    %56 = vector.extract_strided_slice %2 {offsets = [21, 0], sizes = [1, 512], strides = [1, 1]} : vector<25x512xf32> to vector<1x512xf32>
    %57 = vector.extract_strided_slice %35 {offsets = [4, 0], sizes = [16, 512], strides = [1, 1]} : vector<20x512xf32> to vector<16x512xf32>
    %58 = vector.broadcast %56 : vector<1x512xf32> to vector<16x512xf32>
    %59 = arith.mulf %57, %58 : vector<16x512xf32>
    %60 = arith.addf %55, %59 : vector<16x512xf32>
    %c0_11 = arith.constant 0 : index
    %c64_12 = arith.constant 64 : index
    %61 = vector.load %arg5[%c0_11, %c64_12] : memref<20x640xf32, #tpu.memory_space<vmem>>, vector<20x512xf32>
    %62 = vector.extract_strided_slice %2 {offsets = [2, 0], sizes = [1, 512], strides = [1, 1]} : vector<25x512xf32> to vector<1x512xf32>
    %63 = vector.extract_strided_slice %61 {offsets = [0, 0], sizes = [16, 512], strides = [1, 1]} : vector<20x512xf32> to vector<16x512xf32>
    %64 = vector.broadcast %62 : vector<1x512xf32> to vector<16x512xf32>
    %65 = arith.mulf %63, %64 : vector<16x512xf32>
    %66 = arith.addf %60, %65 : vector<16x512xf32>
    %67 = vector.extract_strided_slice %2 {offsets = [7, 0], sizes = [1, 512], strides = [1, 1]} : vector<25x512xf32> to vector<1x512xf32>
    %68 = vector.extract_strided_slice %61 {offsets = [1, 0], sizes = [16, 512], strides = [1, 1]} : vector<20x512xf32> to vector<16x512xf32>
    %69 = vector.broadcast %67 : vector<1x512xf32> to vector<16x512xf32>
    %70 = arith.mulf %68, %69 : vector<16x512xf32>
    %71 = arith.addf %66, %70 : vector<16x512xf32>
    %72 = vector.extract_strided_slice %2 {offsets = [12, 0], sizes = [1, 512], strides = [1, 1]} : vector<25x512xf32> to vector<1x512xf32>
    %73 = vector.extract_strided_slice %61 {offsets = [2, 0], sizes = [16, 512], strides = [1, 1]} : vector<20x512xf32> to vector<16x512xf32>
    %74 = vector.broadcast %72 : vector<1x512xf32> to vector<16x512xf32>
    %75 = arith.mulf %73, %74 : vector<16x512xf32>
    %76 = arith.addf %71, %75 : vector<16x512xf32>
    %77 = vector.extract_strided_slice %2 {offsets = [17, 0], sizes = [1, 512], strides = [1, 1]} : vector<25x512xf32> to vector<1x512xf32>
    %78 = vector.extract_strided_slice %61 {offsets = [3, 0], sizes = [16, 512], strides = [1, 1]} : vector<20x512xf32> to vector<16x512xf32>
    %79 = vector.broadcast %77 : vector<1x512xf32> to vector<16x512xf32>
    %80 = arith.mulf %78, %79 : vector<16x512xf32>
    %81 = arith.addf %76, %80 : vector<16x512xf32>
    %82 = vector.extract_strided_slice %2 {offsets = [22, 0], sizes = [1, 512], strides = [1, 1]} : vector<25x512xf32> to vector<1x512xf32>
    %83 = vector.extract_strided_slice %61 {offsets = [4, 0], sizes = [16, 512], strides = [1, 1]} : vector<20x512xf32> to vector<16x512xf32>
    %84 = vector.broadcast %82 : vector<1x512xf32> to vector<16x512xf32>
    %85 = arith.mulf %83, %84 : vector<16x512xf32>
    %86 = arith.addf %81, %85 : vector<16x512xf32>
    %c0_13 = arith.constant 0 : index
    %c96 = arith.constant 96 : index
    %87 = vector.load %arg5[%c0_13, %c96] : memref<20x640xf32, #tpu.memory_space<vmem>>, vector<20x512xf32>
    %88 = vector.extract_strided_slice %2 {offsets = [3, 0], sizes = [1, 512], strides = [1, 1]} : vector<25x512xf32> to vector<1x512xf32>
    %89 = vector.extract_strided_slice %87 {offsets = [0, 0], sizes = [16, 512], strides = [1, 1]} : vector<20x512xf32> to vector<16x512xf32>
    %90 = vector.broadcast %88 : vector<1x512xf32> to vector<16x512xf32>
    %91 = arith.mulf %89, %90 : vector<16x512xf32>
    %92 = arith.addf %86, %91 : vector<16x512xf32>
    %93 = vector.extract_strided_slice %2 {offsets = [8, 0], sizes = [1, 512], strides = [1, 1]} : vector<25x512xf32> to vector<1x512xf32>
    %94 = vector.extract_strided_slice %87 {offsets = [1, 0], sizes = [16, 512], strides = [1, 1]} : vector<20x512xf32> to vector<16x512xf32>
    %95 = vector.broadcast %93 : vector<1x512xf32> to vector<16x512xf32>
    %96 = arith.mulf %94, %95 : vector<16x512xf32>
    %97 = arith.addf %92, %96 : vector<16x512xf32>
    %98 = vector.extract_strided_slice %2 {offsets = [13, 0], sizes = [1, 512], strides = [1, 1]} : vector<25x512xf32> to vector<1x512xf32>
    %99 = vector.extract_strided_slice %87 {offsets = [2, 0], sizes = [16, 512], strides = [1, 1]} : vector<20x512xf32> to vector<16x512xf32>
    %100 = vector.broadcast %98 : vector<1x512xf32> to vector<16x512xf32>
    %101 = arith.mulf %99, %100 : vector<16x512xf32>
    %102 = arith.addf %97, %101 : vector<16x512xf32>
    %103 = vector.extract_strided_slice %2 {offsets = [18, 0], sizes = [1, 512], strides = [1, 1]} : vector<25x512xf32> to vector<1x512xf32>
    %104 = vector.extract_strided_slice %87 {offsets = [3, 0], sizes = [16, 512], strides = [1, 1]} : vector<20x512xf32> to vector<16x512xf32>
    %105 = vector.broadcast %103 : vector<1x512xf32> to vector<16x512xf32>
    %106 = arith.mulf %104, %105 : vector<16x512xf32>
    %107 = arith.addf %102, %106 : vector<16x512xf32>
    %108 = vector.extract_strided_slice %2 {offsets = [23, 0], sizes = [1, 512], strides = [1, 1]} : vector<25x512xf32> to vector<1x512xf32>
    %109 = vector.extract_strided_slice %87 {offsets = [4, 0], sizes = [16, 512], strides = [1, 1]} : vector<20x512xf32> to vector<16x512xf32>
    %110 = vector.broadcast %108 : vector<1x512xf32> to vector<16x512xf32>
    %111 = arith.mulf %109, %110 : vector<16x512xf32>
    %112 = arith.addf %107, %111 : vector<16x512xf32>
    %c0_14 = arith.constant 0 : index
    %c128 = arith.constant 128 : index
    %113 = vector.load %arg5[%c0_14, %c128] : memref<20x640xf32, #tpu.memory_space<vmem>>, vector<20x512xf32>
    %114 = vector.extract_strided_slice %2 {offsets = [4, 0], sizes = [1, 512], strides = [1, 1]} : vector<25x512xf32> to vector<1x512xf32>
    %115 = vector.extract_strided_slice %113 {offsets = [0, 0], sizes = [16, 512], strides = [1, 1]} : vector<20x512xf32> to vector<16x512xf32>
    %116 = vector.broadcast %114 : vector<1x512xf32> to vector<16x512xf32>
    %117 = arith.mulf %115, %116 : vector<16x512xf32>
    %118 = arith.addf %112, %117 : vector<16x512xf32>
    %119 = vector.extract_strided_slice %2 {offsets = [9, 0], sizes = [1, 512], strides = [1, 1]} : vector<25x512xf32> to vector<1x512xf32>
    %120 = vector.extract_strided_slice %113 {offsets = [1, 0], sizes = [16, 512], strides = [1, 1]} : vector<20x512xf32> to vector<16x512xf32>
    %121 = vector.broadcast %119 : vector<1x512xf32> to vector<16x512xf32>
    %122 = arith.mulf %120, %121 : vector<16x512xf32>
    %123 = arith.addf %118, %122 : vector<16x512xf32>
    %124 = vector.extract_strided_slice %2 {offsets = [14, 0], sizes = [1, 512], strides = [1, 1]} : vector<25x512xf32> to vector<1x512xf32>
    %125 = vector.extract_strided_slice %113 {offsets = [2, 0], sizes = [16, 512], strides = [1, 1]} : vector<20x512xf32> to vector<16x512xf32>
    %126 = vector.broadcast %124 : vector<1x512xf32> to vector<16x512xf32>
    %127 = arith.mulf %125, %126 : vector<16x512xf32>
    %128 = arith.addf %123, %127 : vector<16x512xf32>
    %129 = vector.extract_strided_slice %2 {offsets = [19, 0], sizes = [1, 512], strides = [1, 1]} : vector<25x512xf32> to vector<1x512xf32>
    %130 = vector.extract_strided_slice %113 {offsets = [3, 0], sizes = [16, 512], strides = [1, 1]} : vector<20x512xf32> to vector<16x512xf32>
    %131 = vector.broadcast %129 : vector<1x512xf32> to vector<16x512xf32>
    %132 = arith.mulf %130, %131 : vector<16x512xf32>
    %133 = arith.addf %128, %132 : vector<16x512xf32>
    %134 = vector.extract_strided_slice %2 {offsets = [24, 0], sizes = [1, 512], strides = [1, 1]} : vector<25x512xf32> to vector<1x512xf32>
    %135 = vector.extract_strided_slice %113 {offsets = [4, 0], sizes = [16, 512], strides = [1, 1]} : vector<20x512xf32> to vector<16x512xf32>
    %136 = vector.broadcast %134 : vector<1x512xf32> to vector<16x512xf32>
    %137 = arith.mulf %135, %136 : vector<16x512xf32>
    %138 = arith.addf %133, %137 : vector<16x512xf32>
    %cst_15 = arith.constant 0.707106769 : f32
    %139 = vector.broadcast %cst_15 : f32 to vector<16x512xf32>
    %140 = arith.mulf %138, %139 : vector<16x512xf32>
    %141 = math.absf %140 : vector<16x512xf32>
    %cst_16 = arith.constant 0.327591091 : f32
    %142 = vector.broadcast %cst_16 : f32 to vector<16x512xf32>
    %143 = arith.mulf %142, %141 : vector<16x512xf32>
    %cst_17 = arith.constant 1.000000e+00 : f32
    %144 = vector.broadcast %cst_17 : f32 to vector<16x512xf32>
    %145 = arith.addf %144, %143 : vector<16x512xf32>
    %cst_18 = arith.constant 1.000000e+00 : f32
    %146 = vector.broadcast %cst_18 : f32 to vector<16x512xf32>
    %147 = arith.divf %146, %145 : vector<16x512xf32>
    %cst_19 = arith.constant 1.06140542 : f32
    %148 = vector.broadcast %cst_19 : f32 to vector<16x512xf32>
    %149 = arith.mulf %147, %148 : vector<16x512xf32>
    %cst_20 = arith.constant -1.45315206 : f32
    %150 = vector.broadcast %cst_20 : f32 to vector<16x512xf32>
    %151 = arith.addf %150, %149 : vector<16x512xf32>
    %152 = arith.mulf %147, %151 : vector<16x512xf32>
    %cst_21 = arith.constant 1.42141378 : f32
    %153 = vector.broadcast %cst_21 : f32 to vector<16x512xf32>
    %154 = arith.addf %153, %152 : vector<16x512xf32>
    %155 = arith.mulf %147, %154 : vector<16x512xf32>
    %cst_22 = arith.constant -0.284496725 : f32
    %156 = vector.broadcast %cst_22 : f32 to vector<16x512xf32>
    %157 = arith.addf %156, %155 : vector<16x512xf32>
    %158 = arith.mulf %147, %157 : vector<16x512xf32>
    %cst_23 = arith.constant 0.254829586 : f32
    %159 = vector.broadcast %cst_23 : f32 to vector<16x512xf32>
    %160 = arith.addf %159, %158 : vector<16x512xf32>
    %161 = arith.mulf %147, %160 : vector<16x512xf32>
    %cst_24 = arith.constant 0.000000e+00 : f32
    %162 = vector.broadcast %cst_24 : f32 to vector<16x512xf32>
    %163 = arith.subf %162, %141 : vector<16x512xf32>
    %164 = arith.mulf %163, %141 : vector<16x512xf32>
    %165 = math.exp %164 : vector<16x512xf32>
    %166 = arith.mulf %161, %165 : vector<16x512xf32>
    %cst_25 = arith.constant 1.000000e+00 : f32
    %167 = vector.broadcast %cst_25 : f32 to vector<16x512xf32>
    %168 = arith.subf %167, %166 : vector<16x512xf32>
    %cst_26 = arith.constant 0.000000e+00 : f32
    %169 = vector.broadcast %cst_26 : f32 to vector<16x512xf32>
    %170 = arith.cmpf oge, %140, %169 : vector<16x512xf32>
    %cst_27 = arith.constant 0.000000e+00 : f32
    %171 = vector.broadcast %cst_27 : f32 to vector<16x512xf32>
    %172 = arith.subf %171, %168 : vector<16x512xf32>
    %173 = arith.select %170, %168, %172 : vector<16x512xi1>, vector<16x512xf32>
    %cst_28 = arith.constant 5.000000e-01 : f32
    %174 = vector.broadcast %cst_28 : f32 to vector<16x512xf32>
    %175 = arith.mulf %174, %138 : vector<16x512xf32>
    %cst_29 = arith.constant 1.000000e+00 : f32
    %176 = vector.broadcast %cst_29 : f32 to vector<16x512xf32>
    %177 = arith.addf %176, %173 : vector<16x512xf32>
    %178 = arith.mulf %175, %177 : vector<16x512xf32>
    %c0_30 = arith.constant 0 : index
    %c0_31 = arith.constant 0 : index
    %c0_32 = arith.constant 0 : index
    %179 = vector.load %arg4[%c0_30, %c0_31, %c0_32] : memref<1x16x512xf32, #tpu.memory_space<vmem>>, vector<1x16x512xf32>
    %180 = vector.shape_cast %179 : vector<1x16x512xf32> to vector<16x512xf32>
    %181 = vector.shape_cast %178 : vector<16x512xf32> to vector<1x16x512xf32>
    tpu.vector_store %arg4[%c0_30, %c0_31, %c0_32], %181 {strides = array<i32>} : memref<1x16x512xf32, #tpu.memory_space<vmem>>, vector<1x16x512xf32>,
    return
  }
  func.func @transform_0(%arg0: i32) -> (i32, i32, i32) {
    %c0_i32 = arith.constant 0 : i32
    %c0_i32_0 = arith.constant 0 : i32
    %c0_i32_1 = arith.constant 0 : i32
    return %arg0, %c0_i32, %c0_i32_0 : i32, i32, i32
  }
  func.func @transform_1(%arg0: i32) -> (i32, i32) {
    %c0_i32 = arith.constant 0 : i32
    %c0_i32_0 = arith.constant 0 : i32
    %c0_i32_1 = arith.constant 0 : i32
    return %c0_i32, %c0_i32_0 : i32, i32
  }
  func.func @transform_2(%arg0: i32) -> (i32, i32) {
    %c0_i32 = arith.constant 0 : i32
    %c0_i32_0 = arith.constant 0 : i32
    %c0_i32_1 = arith.constant 0 : i32
    return %c0_i32, %c0_i32_0 : i32, i32
  }
  func.func @transform_3(%arg0: i32) -> (i32, i32, i32) {
    %c0_i32 = arith.constant 0 : i32
    %c0_i32_0 = arith.constant 0 : i32
    %c0_i32_1 = arith.constant 0 : i32
    return %arg0, %c0_i32, %c0_i32_0 : i32, i32, i32
  }
}

</mosaic_0001>

<bundles_post_ra>
// kernel: dwconv_pallas.1
= control target key start
LH: loop header
LB: loop body
LE: loop exit
PB: predicated region body
PF: predicated region fallthrough
CT: control target
= control target key end

     0   :  { %s3362_s12 = smov 0   ;;  %s6340_s0 = inlined_call_operand.vmem [shape: f32[2,16,512], index: 0, kind: input, shape index: {}]   ;;  %s6341_s1 = inlined_call_operand.vmem [shape: f32[25,512], index: 1, kind: input, shape index: {}]   ;;  %s6342_s2 = inlined_call_operand.vmem [shape: f32[1,512], index: 2, kind: input, shape index: {}]   ;;  %s6343_s3 = inlined_call_operand.vmem [shape: f32[2,16,512], index: 3, kind: output, shape index: {}]  }
   0x1 LB: > { %s3214_s13 = sadd.s32 4294967295, %s3336_s12   ;;  %p3218_p0 = scmp.ge.s32.totalorder %s3336_s12, 1  ;;  %s3336_s12 = sphi %s3362_s12, %s13_s12  }
   0x2   : > { %p137_p1 = scmp.lt.s32.totalorder %s3336_s12, 3 }
   0x4   : > { %p138_p2 = pnand %p3218_p0, %p137_p1 }
   0x6   : > { %141 = sbr.rel (%p138_p2) target bundleno = 1259 (0x4eb), region = 32 }
   0xb   : > { %p161_p3 = scmp.lt.s32.totalorder %s3214_s13, 1  ;;  %v3338_v0 = vmov 0.0   ;;  %s3339_s18 = smov 64   ;;  %vm240_vm0 = vcmask 1041408   ;;  %v204_v19 = vlaneseq  ;;  %v3396_v24 = vld [vmem:[%s6341_s1 + $0x8] sm:$0xff]  ;;  %v3401_v25 = vld [vmem:[%s6341_s1] sm:$0xff] }
   0xc   : > { %171 = vst [vmem:[#allocation2] sm:$0xff] %v3338_v0  ;;  %172 = vst [vmem:[#allocation2 + $0x8] sm:$0xff] %v3338_v0  ;;  %v3412_v28 = vld [vmem:[%s6341_s1 + $0x18] sm:$0xff]  ;;  %v3417_v29 = vld [vmem:[%s6341_s1 + $0x10] sm:$0xff]  ;;  %s3340_s27 = smov 32   ;;  %vm302_vm1 = vcmask 1048066  }
   0xd   : > { %s6887_s13 = smov (!%p161_p3, %s3214_s13), 1  ;;  %173 = vst [vmem:[#allocation2 + $0x10] sm:$0xff] %v3338_v0  ;;  %174 = vst [vmem:[#allocation2 + $0x18] sm:$0xff] %v3338_v0  ;;  %v3386_v22 = vshrl.u32 %v204_v19, 7  ;;  %v191_v38 = vld [vmem:[%s6341_s1 + $0x28] sm:$0xff]  ;;  %v190_v39 = vld [vmem:[%s6341_s1 + $0x20] sm:$0xff] }
   0xe   : > { %175 = vst [vmem:[#allocation2 + $0x20] sm:$0xff] %v3338_v0  ;;  %176 = vst [vmem:[#allocation2 + $0x28] sm:$0xff] %v3338_v0  ;;  %s3229_s14 = sshll.u32 %s6887_s13, 6  ;;  %v193_v42 = vld [vmem:[%s6341_s1 + $0x38] sm:$0xff]  ;;  %v3459_v43 = vld [vmem:[%s6341_s1 + $0x30] sm:$0xff]  ;;  %vm277_vm2 = vcmask 523264  }
   0xf   : > { %180 = vst [vmem:[#allocation2 + $0x48] sm:$0xff] %v3338_v0  ;;  %181 = vst [vmem:[#allocation2 + $0x50] sm:$0xf] %v3338_v0  ;;  %s165_s17 = scalar_lea.vmem %s6340_s0, %s3229_s14  ;;  %v3391_v23 = vsub.s32 1, %v3386_v22  ;;  %v3426_v32 = vsub.s32 6, %v3386_v22  ;;  %v3441_v37 = vsub.s32 3, %v3386_v22  ;;  %s6303_s8 = scalar_lea.vmem %s6343_s3, %s3229_s14 }
  0x10   : > { %182 = vst [vmem:[#allocation2 + $0x58] sm:$0xf] %v3338_v0  ;;  %183 = vst [vmem:[#allocation2 + $0x60] sm:$0xf] %v3338_v0  ;;  %v226_v1 = vld [vmem:[%s165_s17 + $0x10] sm:$0xff]  ;;  %v224_v2 = vld [vmem:[%s165_s17] sm:$0xff] }
  0x11   : > { %184 = vst [vmem:[#allocation2 + $0x68] sm:$0xf] %v3338_v0  ;;  %185 = vst [vmem:[#allocation2 + $0x70] sm:$0xf] %v3338_v0  ;;  %v227_v3 = vld [vmem:[%s165_s17 + $0x18] sm:$0xff]  ;;  %v243_v4 = vrot.slane %v226_v1, 6  ;;  %v684_v26 = vrot.slane %v3396_v24, %v3391_v23  ;;  %v680_v27 = vrot.slane %v3401_v25, %v3391_v23  ;;  %v692_v30 = vrot.slane %v3412_v28, %v3391_v23 }
  0x12   : > { %v241_v5 = vrot.slane %v224_v2, 6  ;;  %v225_v6 = vld [vmem:[%s165_s17 + $0x8] sm:$0xff]  ;;  %v228_v8 = vld [vmem:[%s165_s17 + $0x20] sm:$0xff]  ;;  %v244_v9 = vrot.slane %v227_v3, 6  ;;  %v231_v13 = vld [vmem:[%s165_s17 + $0x38] sm:$0xff]  ;;  %6481 = vst [vmem:[#allocation3_spill] sm:$0xff] %v3391_v23  ;;  %v688_v31 = vrot.slane %v3417_v29, %v3391_v23  ;;  %v786_v33 = vrot.slane %v3396_v24, %v3426_v32 }
  0x13   : > { %v229_v7 = vld [vmem:[%s165_s17 + $0x28] sm:$0xff]  ;;  %257 = vrot.lane.b32.xlu1 %v243_v4, %s3339_s18  ;;  %v242_v10 = vrot.slane %v225_v6, 6  ;;  %v245_v12 = vrot.slane %v228_v8, 6  ;;  %v230_v14 = vld [vmem:[%s165_s17 + $0x30] sm:$0xff]  ;;  %v251_v17 = vrot.slane %v231_v13, 6  ;;  %6482 = vst [vmem:[#allocation4_spill] sm:$0xff] %v3426_v32  ;;  %v782_v34 = vrot.slane %v3401_v25, %v3426_v32 }
  0x14   : > { %253 = vrot.lane.b32.xlu0 %v241_v5, %s3339_s18  ;;  %v247_v11 = vrot.slane %v229_v7, 6  ;;  %v249_v18 = vrot.slane %v230_v14, 6  ;;  %v794_v35 = vrot.slane %v3412_v28, %v3426_v32  ;;  %v790_v36 = vrot.slane %v3417_v29, %v3426_v32  ;;  %6483 = vst [vmem:[#allocation5_spill] sm:$0xff] %v3441_v37  ;;  %v195_v47 = vld [vmem:[%s6341_s1 + $0x48] sm:$0xff]  ;;  %v194_v48 = vld [vmem:[%s6341_s1 + $0x40] sm:$0xff]  ;;  %v3482_v51 = vld [vmem:[%s6341_s1 + $0x58] sm:$0xff] }
  0x15   : > { %v246_v16 = vsel %vm240_vm0, %v241_v5, %v245_v12  ;;  %v252_v20 = vsel %vm240_vm0, %v244_v9, %v251_v17  ;;  %v921_v40 = vrot.slane %v191_v38, %v3441_v37  ;;  %v917_v41 = vrot.slane %v190_v39, %v3441_v37  ;;  %v3487_v52 = vld [vmem:[%s6341_s1 + $0x50] sm:$0xff]  ;;  %s3341_s21 = smov 96  }
  0x16   : > { %v248_v15 = vsel %vm240_vm0, %v242_v10, %v247_v11  ;;  %v250_v21 = vsel %vm240_vm0, %v243_v4, %v249_v18  ;;  %v929_v44 = vrot.slane %v193_v42, %v3441_v37  ;;  %v925_v45 = vrot.slane %v3459_v43, %v3441_v37 }
  0x17   : > { %259 = vrot.lane.b32.xlu1 %v244_v9, %s3339_s18  ;;  %v3467_v46 = vsub.s32 0, %v3386_v22  ;;  %v3496_v55 = vsub.s32 5, %v3386_v22  ;;  %vm307_vm3 = vcmask 523266   ;;  %vm309_vm4 = vcmask 1048064  }
  0x18   : > { %255 = vrot.lane.b32.xlu0 %v242_v10, %s3339_s18  ;;  %vm315_vm5 = vcmask 1041920   ;;  %vm320_vm6 = vcmask 517120   ;;  %vm705_vm7 = vcmask 261120   ;;  %vm406_vm8 = vcmask 1046528  }
  0x19   : > { %v1056_v49 = vrot.slane %v195_v47, %v3467_v46  ;;  %v1052_v50 = vrot.slane %v194_v48, %v3467_v46  ;;  %v1064_v53 = vrot.slane %v3482_v51, %v3467_v46  ;;  %v1060_v54 = vrot.slane %v3487_v52, %v3467_v46 }
  0x1a   : > { %v1191_v56 = vrot.slane %v195_v47, %v3496_v55  ;;  %v1187_v57 = vrot.slane %v194_v48, %v3496_v55  ;;  %vm483_vm9 = vcmask 1045504   ;;  %vm560_vm10 = vcmask 1044480  }
  0x1b   : > { %263 = vrot.lane.b32.xlu1 %v248_v15, %s3339_s18  ;;  %vm637_vm11 = vcmask 1043456   ;;  %vm754_vm12 = vcmask 785408  }
  0x1c   : > { %261 = vrot.lane.b32.xlu0 %v246_v16, %s3339_s18 }
  0x1f   : > { %267 = vrot.lane.b32.xlu1 %v252_v20, %s3339_s18 }
  0x20   : > { %265 = vrot.lane.b32.xlu0 %v250_v21, %s3339_s18 }
  0x23   : > { %271 = vrot.lane.b32.xlu1 %v247_v11, %s3339_s18 }
  0x24   : > { %269 = vrot.lane.b32.xlu0 %v245_v12, %s3339_s18 }
  0x27   : > { %275 = vrot.lane.b32.xlu1 %v251_v17, %s3339_s18 }
  0x28   : > { %273 = vrot.lane.b32.xlu0 %v249_v18, %s3339_s18 }
  0x2b   : > { %699 = vrot.lane.b32.xlu1 %v684_v26, %s3340_s27 }
  0x2c   : > { %697 = vrot.lane.b32.xlu0 %v680_v27, %s3340_s27 }
  0x2f   : > { %703 = vrot.lane.b32.xlu1 %v692_v30, %s3340_s27 }
  0x30   : > { %701 = vrot.lane.b32.xlu0 %v688_v31, %s3340_s27 }
  0x33   : > { %801 = vrot.lane.b32.xlu1 %v786_v33, %s3340_s27 }
  0x34   : > { %799 = vrot.lane.b32.xlu0 %v782_v34, %s3340_s27 }
  0x37   : > { %805 = vrot.lane.b32.xlu1 %v794_v35, %s3340_s27 }
  0x38   : > { %803 = vrot.lane.b32.xlu0 %v790_v36, %s3340_s27 }
  0x3b   : > { %936 = vrot.lane.b32.xlu1 %v921_v40, %s3340_s27 }
  0x3c   : > { %934 = vrot.lane.b32.xlu0 %v917_v41, %s3340_s27 }
  0x3f   : > { %940 = vrot.lane.b32.xlu1 %v929_v44, %s3340_s27 }
  0x40   : > { %938 = vrot.lane.b32.xlu0 %v925_v45, %s3340_s27 }
  0x43   : > { %1071 = vrot.lane.b32.xlu1 %v1056_v49, %s3340_s27 }
  0x44   : > { %1069 = vrot.lane.b32.xlu0 %v1052_v50, %s3340_s27 }
  0x47   : > { %1075 = vrot.lane.b32.xlu1 %v1064_v53, %s3340_s27 }
  0x48   : > { %1073 = vrot.lane.b32.xlu0 %v1060_v54, %s3340_s27 }
  0x4b   : > { %1206 = vrot.lane.b32.xlu1 %v1191_v56, %s3340_s27 }
  0x4c   : > { %1204 = vrot.lane.b32.xlu0 %v1187_v57, %s3340_s27 }
  0x85   : > { %v258_v58 = vpop.permute.xlu1 %257 }
  0x86   : > { %v254_v59 = vpop.permute.xlu0 %253 }
  0x87   : > { %303 = vst.msk [vmem:[#allocation2] sm:$0xfc] %vm302_vm1, %v254_v59 }
  0x89   : > { %v260_v60 = vpop.permute.xlu1 %259 }
  0x8a   : > { %v256_v61 = vpop.permute.xlu0 %255  ;;  %v280_v62 = vsel %vm277_vm2, %v258_v58, %v260_v60  ;;  %308 = vst.msk [vmem:[#allocation2 + $0x20] sm:$0xfc] %vm307_vm3, %v260_v60 }
  0x8b   : > { %v278_v63 = vsel %vm277_vm2, %v254_v59, %v256_v61  ;;  %v279_v0 = vsel %vm277_vm2, %v256_v61, %v258_v58  ;;  %306 = vst [vmem:[#allocation2 + $0x18] sm:$0xfc] %v280_v62 }
  0x8c   : > { %304 = vst [vmem:[#allocation2 + $0x8] sm:$0xfc] %v278_v63  ;;  %305 = vst [vmem:[#allocation2 + $0x10] sm:$0xfc] %v279_v0 }
  0x8d   : > { %v264_v1 = vpop.permute.xlu1 %263 }
  0x8e   : > { %v262_v2 = vpop.permute.xlu0 %261  ;;  %v3523_v15 = vld [vmem:[#allocation2] sm:$0xff] }
  0x8f   : > { %v3508_v3 = vsel %vm277_vm2, %v262_v2, %v264_v1  ;;  %310 = vst.msk [vmem:[#allocation2 + $0x28] sm:$0xff] %vm309_vm4, %v262_v2 }
  0x90   : > { %311 = vst [vmem:[#allocation2 + $0x30] sm:$0xff] %v3508_v3 }
  0x91   : > { %v268_v4 = vpop.permute.xlu1 %267  ;;  %v3531_v26 = vld [vmem:[#allocation2 + $0x20] sm:$0xff] }
  0x92   : > { %v266_v5 = vpop.permute.xlu0 %265  ;;  %314 = vst.msk [vmem:[#allocation2 + $0x48] sm:$0xff] %vm277_vm2, %v268_v4  ;;  %v3534_v31 = vld [vmem:[#allocation2 + $0x18] sm:$0xff] }
  0x93   : > { %v3513_v6 = vsel %vm277_vm2, %v264_v1, %v266_v5  ;;  %v3516_v7 = vsel %vm277_vm2, %v266_v5, %v268_v4  ;;  %v3525_v18 = vld [vmem:[#allocation2 + $0x8] sm:$0xff]  ;;  %v3541_v38 = vld [vmem:[#allocation2 + $0x10] sm:$0xff] }
  0x94   : > { %312 = vst [vmem:[#allocation2 + $0x38] sm:$0xff] %v3513_v6  ;;  %313 = vst [vmem:[#allocation2 + $0x40] sm:$0xff] %v3516_v7 }
  0x95   : > { %v272_v8 = vpop.permute.xlu1 %271 }
  0x96   : > { %v270_v9 = vpop.permute.xlu0 %269  ;;  %v3548_v41 = vld [vmem:[#allocation2 + $0x28] sm:$0xff] }
  0x97   : > { %v284_v10 = vsel %vm277_vm2, %v270_v9, %v272_v8  ;;  %316 = vst.msk [vmem:[#allocation2 + $0x50] sm:$0x3] %vm315_vm5, %v270_v9 }
  0x98   : > { %317 = vst [vmem:[#allocation2 + $0x58] sm:$0x3] %v284_v10 }
  0x99   : > { %v276_v11 = vpop.permute.xlu1 %275  ;;  %v3558_v48 = vld [vmem:[#allocation2 + $0x48] sm:$0xff] }
  0x9a   : > { %v274_v12 = vpop.permute.xlu0 %273  ;;  %321 = vst.msk [vmem:[#allocation2 + $0x70] sm:$0x3] %vm320_vm6, %v276_v11 }
  0x9b   : > { %v285_v13 = vsel %vm277_vm2, %v272_v8, %v274_v12  ;;  %v286_v14 = vsel %vm277_vm2, %v274_v12, %v276_v11 }
  0x9c   : > { %318 = vst [vmem:[#allocation2 + $0x60] sm:$0x3] %v285_v13  ;;  %319 = vst [vmem:[#allocation2 + $0x68] sm:$0x3] %v286_v14 }
  0x9d   : > { %v700_v16 = vpop.permute.xlu1 %699 }
  0x9e   : > { %v698_v17 = vpop.permute.xlu0 %697  ;;  %v3565_v54 = vld [vmem:[#allocation2 + $0x50] sm:$0xf] }
  0x9f   : > { %v714_v19 = vmul.f32 %v698_v17, %v3523_v15  ;;  %v706_v20 = vsel %vm705_vm7, %v698_v17, %v700_v16  ;;  %v719_v44 = vmul.f32 %v698_v17, %v3548_v41 }
  0xa0   : > { %v715_v21 = vmul.f32 %v706_v20, %v3525_v18  ;;  %v720_v49 = vmul.f32 %v706_v20, %v3508_v3 }
  0xa1   : > { %734 = vrot.lane.b32.xlu0 %v714_v19, %s3341_s21  ;;  %v704_v27 = vpop.permute.xlu1 %703  ;;  %v3577_v63 = vld [vmem:[#allocation2 + $0x70] sm:$0xf] }
  0xa2   : > { %736 = vrot.lane.b32.xlu1 %v715_v21, %s3341_s21  ;;  %v702_v30 = vpop.permute.xlu0 %701  ;;  %v718_v34 = vmul.f32 %v704_v27, %v3531_v26  ;;  %v723_v56 = vmul.f32 %v704_v27, %v3558_v48 }
  0xa3   : > { %v708_v33 = vsel %vm705_vm7, %v702_v30, %v704_v27  ;;  %v707_v35 = vsel %vm705_vm7, %v700_v16, %v702_v30 }
  0xa4   : > { %v717_v36 = vmul.f32 %v708_v33, %v3534_v31  ;;  %v716_v42 = vmul.f32 %v707_v35, %v3541_v38  ;;  %v722_v60 = vmul.f32 %v708_v33, %v3516_v7  ;;  %v721_v0 = vmul.f32 %v707_v35, %v3513_v6 }
  0xa5   : > { %742 = vrot.lane.b32.xlu0 %v718_v34, %s3341_s21  ;;  %v3543_v39 = vpop.permute.xlu1 %801 }
  0xa6   : > { %740 = vrot.lane.b32.xlu1 %v717_v36, %s3341_s21  ;;  %v3546_v40 = vpop.permute.xlu0 %799 }
  0xa7   : > { %v815_v50 = vmul.f32 %v3546_v40, %v3523_v15  ;;  %v820_v53 = vmul.f32 %v3546_v40, %v3548_v41  ;;  %v825_v57 = vmul.f32 %v3546_v40, %v3565_v54 }
  0xa9   : > { %738 = vrot.lane.b32.xlu0 %v716_v42, %s3341_s21  ;;  %v3553_v45 = vpop.permute.xlu1 %805  ;;  %v845_v61 = vrot.slane %v815_v50, 1  ;;  %v846_v62 = vrot.slane %v820_v53, 1  ;;  %v860_v4 = vrot.slane %v825_v57, 1 }
  0xaa   : > { %744 = vrot.lane.b32.xlu1 %v719_v44, %s3341_s21  ;;  %v3556_v47 = vpop.permute.xlu0 %803  ;;  %v819_v1 = vmul.f32 %v3553_v45, %v3531_v26  ;;  %v824_v2 = vmul.f32 %v3553_v45, %v3558_v48  ;;  %v829_v5 = vmul.f32 %v3553_v45, %v3577_v63 }
  0xab   : > { %v847_v10 = vsel %vm406_vm8, %v845_v61, %v846_v62  ;;  %v861_v16 = vsel %vm406_vm8, %v846_v62, %v860_v4 }
  0xac   : > { %v857_v11 = vrot.slane %v819_v1, 1  ;;  %v858_v12 = vrot.slane %v824_v2, 1  ;;  %v868_v17 = vrot.slane %v829_v5, 1  ;;  %v807_v1 = vsel %vm705_vm7, %v3546_v40, %v3543_v39 }
  0xad   : > { %746 = vrot.lane.b32.xlu0 %v720_v49, %s3341_s21  ;;  %v3571_v58 = vpop.permute.xlu1 %936  ;;  %v808_v2 = vsel %vm705_vm7, %v3543_v39, %v3556_v47 }
  0xae   : > { %752 = vrot.lane.b32.xlu1 %v723_v56, %s3341_s21  ;;  %v3574_v59 = vpop.permute.xlu0 %934  ;;  %v859_v30 = vsel %vm406_vm8, %v857_v11, %v858_v12  ;;  %v869_v36 = vsel %vm406_vm8, %v858_v12, %v868_v17  ;;  %v817_v39 = vmul.f32 %v808_v2, %v3541_v38  ;;  %v822_v17 = vmul.f32 %v808_v2, %v3513_v6 }
  0xaf   : > { %v950_v13 = vmul.f32 %v3574_v59, %v3523_v15  ;;  %v955_v14 = vmul.f32 %v3574_v59, %v3548_v41  ;;  %v960_v19 = vmul.f32 %v3574_v59, %v3565_v54 }
  0xb1   : > { %750 = vrot.lane.b32.xlu0 %v722_v60, %s3341_s21  ;;  %v3587_v8 = vpop.permute.xlu1 %940  ;;  %v980_v33 = vrot.slane %v950_v13, 2  ;;  %v981_v34 = vrot.slane %v955_v14, 2  ;;  %v995_v42 = vrot.slane %v960_v19, 2 }
  0xb2   : > { %748 = vrot.lane.b32.xlu1 %v721_v0, %s3341_s21  ;;  %v3590_v9 = vpop.permute.xlu0 %938  ;;  %v954_v21 = vmul.f32 %v3587_v8, %v3531_v26  ;;  %v959_v27 = vmul.f32 %v3587_v8, %v3558_v48  ;;  %v964_v44 = vmul.f32 %v3587_v8, %v3577_v63 }
  0xb3   : > { %v982_v53 = vsel %vm483_vm9, %v980_v33, %v981_v34  ;;  %v996_v61 = vsel %vm483_vm9, %v981_v34, %v995_v42  ;;  %v821_v34 = vmul.f32 %v807_v1, %v3508_v3  ;;  %v809_v42 = vsel %vm705_vm7, %v3556_v47, %v3553_v45  ;;  %v3664_v45 = vld [vmem:[#allocation2 + $0x60] sm:$0xf]  ;;  %v3666_v47 = vld [vmem:[#allocation2 + $0x68] sm:$0xf] }
  0xb4   : > { %v992_v49 = vrot.slane %v954_v21, 2  ;;  %v993_v50 = vrot.slane %v959_v27, 2  ;;  %v1003_v62 = vrot.slane %v964_v44, 2 }
  0xb5   : > { %870 = vrot.lane.b32.xlu0 %v847_v10, %s3341_s21  ;;  %v3602_v20 = vpop.permute.xlu1 %1071 }
  0xb6   : > { %880 = vrot.lane.b32.xlu1 %v861_v16, %s3341_s21  ;;  %v3609_v35 = vpop.permute.xlu0 %1069  ;;  %v994_v4 = vsel %vm483_vm9, %v992_v49, %v993_v50  ;;  %v1004_v13 = vsel %vm483_vm9, %v993_v50, %v1003_v62  ;;  %v816_v16 = vmul.f32 %v807_v1, %v3525_v18  ;;  %v851_v50 = vrot.slane %v817_v39, 1 }
  0xb7   : > { %v1085_v56 = vmul.f32 %v3609_v35, %v3523_v15  ;;  %v1090_v57 = vmul.f32 %v3609_v35, %v3548_v41  ;;  %v1095_v0 = vmul.f32 %v3609_v35, %v3565_v54  ;;  %v944_v39 = vsel %vm705_vm7, %v3590_v9, %v3587_v8 }
  0xb9   : > { %878 = vrot.lane.b32.xlu0 %v859_v30, %s3341_s21  ;;  %v3621_v60 = vpop.permute.xlu1 %1075  ;;  %v1115_v5 = vrot.slane %v1085_v56, 3  ;;  %v1116_v10 = vrot.slane %v1090_v57, 3  ;;  %v1130_v14 = vrot.slane %v1095_v0, 3  ;;  %v848_v56 = vrot.slane %v816_v16, 1 }
  0xba   : > { %888 = vrot.lane.b32.xlu1 %v869_v36, %s3341_s21  ;;  %v1089_v11 = vmul.f32 %v3621_v60, %v3531_v26  ;;  %v1094_v12 = vmul.f32 %v3621_v60, %v3558_v48  ;;  %v1099_v40 = vmul.f32 %v3621_v60, %v3577_v63  ;;  %v3651_v36 = vld [vmem:[#allocation2 + $0x58] sm:$0xf]  ;;  %v818_v57 = vmul.f32 %v809_v42, %v3534_v31 }
  0xbb   : > { %v1117_v19 = vsel %vm560_vm10, %v1115_v5, %v1116_v10  ;;  %v1131_v30 = vsel %vm560_vm10, %v1116_v10, %v1130_v14  ;;  %v826_v44 = vmul.f32 %v807_v1, %v3651_v36  ;;  %v849_v0 = vrot.slane %v821_v34, 1 }
  0xbc   : > { %v1127_v21 = vrot.slane %v1089_v11, 3  ;;  %v1128_v27 = vrot.slane %v1094_v12, 3  ;;  %v1138_v33 = vrot.slane %v1099_v40, 3  ;;  %v828_v5 = vmul.f32 %v809_v42, %v3666_v47 }
  0xbd   : > { %1005 = vrot.lane.b32.xlu0 %v982_v53, %s3341_s21  ;;  %v852_v53 = vrot.slane %v822_v17, 1  ;;  %v862_v1 = vrot.slane %v826_v44, 1  ;;  %v943_v11 = vsel %vm705_vm7, %v3571_v58, %v3590_v9  ;;  %v850_v12 = vsel %vm406_vm8, %v848_v56, %v849_v0 }
  0xbe   : > { %1015 = vrot.lane.b32.xlu1 %v996_v61, %s3341_s21  ;;  %v1129_v49 = vsel %vm560_vm10, %v1127_v21, %v1128_v27  ;;  %v823_v61 = vmul.f32 %v809_v42, %v3516_v7  ;;  %v1139_v62 = vsel %vm560_vm10, %v1128_v27, %v1138_v33  ;;  %v942_v40 = vsel %vm705_vm7, %v3574_v59, %v3571_v58  ;;  %v1074_v21 = vpop.permute.xlu0 %1073 }
  0xbf   : > { %v853_v10 = vsel %vm406_vm8, %v851_v50, %v852_v53  ;;  %v952_v16 = vmul.f32 %v943_v11, %v3541_v38  ;;  %v957_v17 = vmul.f32 %v943_v11, %v3513_v6  ;;  %v951_v58 = vmul.f32 %v942_v40, %v3525_v18 }
  0xc0   : > { %v855_v14 = vrot.slane %v823_v61, 1  ;;  %v956_v59 = vmul.f32 %v942_v40, %v3508_v3  ;;  %v953_v33 = vmul.f32 %v944_v39, %v3534_v31  ;;  %v961_v42 = vmul.f32 %v942_v40, %v3651_v36  ;;  %v3699_v61 = vpop.permute.xlu1 %1206 }
  0xc1   : > { %1013 = vrot.lane.b32.xlu0 %v994_v4, %s3341_s21  ;;  %v827_v4 = vmul.f32 %v808_v2, %v3664_v45  ;;  %v863_v2 = vsel %vm406_vm8, %v849_v0, %v862_v1  ;;  %v986_v9 = vrot.slane %v952_v16, 2  ;;  %v987_v34 = vrot.slane %v957_v17, 2 }
  0xc2   : > { %1023 = vrot.lane.b32.xlu1 %v1004_v13, %s3341_s21  ;;  %v854_v13 = vrot.slane %v818_v57, 1  ;;  %v958_v44 = vmul.f32 %v944_v39, %v3516_v7  ;;  %v983_v50 = vrot.slane %v951_v58, 2  ;;  %v984_v56 = vrot.slane %v956_v59, 2 }
  0xc3   : > { %v962_v57 = vmul.f32 %v943_v11, %v3664_v45  ;;  %v963_v0 = vmul.f32 %v944_v39, %v3666_v47  ;;  %v1078_v1 = vsel %vm705_vm7, %v3602_v20, %v1074_v21  ;;  %v1077_v11 = vsel %vm705_vm7, %v3609_v35, %v3602_v20 }
  0xc4   : > { %v856_v27 = vsel %vm406_vm8, %v854_v13, %v855_v14  ;;  %v1087_v40 = vmul.f32 %v1078_v1, %v3541_v38  ;;  %v1086_v35 = vmul.f32 %v1077_v11, %v3525_v18 }
  0xc5   : > { %1140 = vrot.lane.b32.xlu0 %v1117_v19, %s3341_s21  ;;  %v866_v19 = vrot.slane %v828_v5, 1  ;;  %v997_v5 = vrot.slane %v961_v42, 2  ;;  %v1001_v16 = vrot.slane %v963_v0, 2  ;;  %v999_v17 = vrot.slane %v962_v57, 2 }
  0xc6   : > { %1150 = vrot.lane.b32.xlu1 %v1131_v30, %s3341_s21  ;;  %v864_v30 = vrot.slane %v827_v4, 1  ;;  %v988_v4 = vsel %vm483_vm9, %v986_v9, %v987_v34  ;;  %v1118_v9 = vrot.slane %v1086_v35, 3  ;;  %v1199_v35 = vrot.slane %v3482_v51, %v3496_v55 }
  0xc7   : > { %v867_v8 = vsel %vm406_vm8, %v855_v14, %v866_v19  ;;  %v1079_v14 = vsel %vm705_vm7, %v1074_v21, %v3621_v60  ;;  %v998_v39 = vsel %vm483_vm9, %v984_v56, %v997_v5  ;;  %v1091_v19 = vmul.f32 %v1077_v11, %v3508_v3 }
  0xc8   : > { %v1088_v60 = vmul.f32 %v1079_v14, %v3534_v31  ;;  %v1093_v21 = vmul.f32 %v1079_v14, %v3516_v7  ;;  %v1000_v59 = vsel %vm483_vm9, %v987_v34, %v999_v17  ;;  %v1098_v57 = vmul.f32 %v1079_v14, %v3666_v47 }
  0xc9   : > { %1148 = vrot.lane.b32.xlu0 %v1129_v49, %s3341_s21  ;;  %v865_v49 = vsel %vm406_vm8, %v852_v53, %v864_v30  ;;  %v985_v53 = vsel %vm483_vm9, %v983_v50, %v984_v56  ;;  %v1121_v30 = vrot.slane %v1087_v40, 3  ;;  %v1119_v42 = vrot.slane %v1091_v19, 3 }
  0xca   : > { %1158 = vrot.lane.b32.xlu1 %v1139_v62, %s3341_s21  ;;  %v3701_v62 = vpop.permute.xlu0 %1204  ;;  %v1097_v56 = vmul.f32 %v1078_v1, %v3664_v45  ;;  %v1124_v5 = vrot.slane %v1088_v60, 3  ;;  %v1195_v17 = vrot.slane %v3487_v52, %v3496_v55 }
  0xcb   : > { %v1212_v13 = vsel %vm705_vm7, %v3701_v62, %v3699_v61 }
  0xcc   : > { %v1134_v14 = vrot.slane %v1097_v56, 3 }
  0xcd   : > { %874 = vrot.lane.b32.xlu0 %v853_v10, %s3341_s21  ;;  %v989_v10 = vrot.slane %v953_v33, 2 }
  0xce   : > { %872 = vrot.lane.b32.xlu1 %v850_v12, %s3341_s21  ;;  %v990_v12 = vrot.slane %v958_v44, 2 }
  0xd0   : > { %v991_v20 = vsel %vm483_vm9, %v989_v10, %v990_v12  ;;  %v1002_v58 = vsel %vm483_vm9, %v990_v12, %v1001_v16 }
  0xd1   : > { %882 = vrot.lane.b32.xlu0 %v863_v2, %s3341_s21  ;;  %v1092_v2 = vmul.f32 %v1078_v1, %v3513_v6 }
  0xd2   : > { %876 = vrot.lane.b32.xlu1 %v856_v27, %s3341_s21  ;;  %v1226_v27 = vmul.f32 %v1212_v13, %v3508_v3 }
  0xd3   : > { %v1122_v33 = vrot.slane %v1092_v2, 3  ;;  %v1220_v2 = vmul.f32 %v3701_v62, %v3523_v15 }
  0xd4   : > { %v1254_v44 = vrot.slane %v1226_v27, 4 }
  0xd5   : > { %886 = vrot.lane.b32.xlu0 %v867_v8, %s3341_s21  ;;  %v1096_v8 = vmul.f32 %v1077_v11, %v3651_v36  ;;  %v1123_v34 = vsel %vm560_vm10, %v1121_v30, %v1122_v33  ;;  %v1136_v11 = vrot.slane %v1098_v57, 3  ;;  %v1135_v16 = vsel %vm560_vm10, %v1122_v33, %v1134_v14 }
  0xd6   : > { %884 = vrot.lane.b32.xlu1 %v865_v49, %s3341_s21  ;;  %v1231_v49 = vmul.f32 %v1212_v13, %v3651_v36  ;;  %v1250_v19 = vrot.slane %v1220_v2, 4 }
  0xd7   : > { %v1132_v0 = vrot.slane %v1096_v8, 3 }
  0xd8   : > { %v1267_v50 = vrot.slane %v1231_v49, 4 }
  0xd9   : > { %1009 = vrot.lane.b32.xlu0 %v988_v4, %s3341_s21  ;;  %v1120_v4 = vsel %vm560_vm10, %v1118_v9, %v1119_v42  ;;  %v1133_v12 = vsel %vm560_vm10, %v1119_v42, %v1132_v0 }
  0xda   : > { %1007 = vrot.lane.b32.xlu1 %v985_v53, %s3341_s21  ;;  %v1125_v53 = vrot.slane %v1093_v21, 3  ;;  %v3741_v10 = vsel %vm637_vm11, %v1254_v44, %v1267_v50 }
  0xdc   : > { %v1126_v1 = vsel %vm560_vm10, %v1124_v5, %v1125_v53  ;;  %v1137_v40 = vsel %vm560_vm10, %v1125_v53, %v1136_v11 }
  0xdd   : > { %1017 = vrot.lane.b32.xlu0 %v998_v39, %s3341_s21  ;;  %v3753_v39 = vmul.f32 %v3701_v62, %v3548_v41 }
  0xde   : > { %1011 = vrot.lane.b32.xlu1 %v991_v20, %s3341_s21  ;;  %v1221_v20 = vmul.f32 %v1212_v13, %v3525_v18 }
  0xdf   : > { %v6344_v27 = vrot.slane %v3753_v39, 4 }
  0xe0   : > { %v1253_v60 = vrot.slane %v1221_v20, 4 }
  0xe1   : > { %1021 = vrot.lane.b32.xlu0 %v1002_v58, %s3341_s21  ;;  %v1252_v21 = vsel %vm637_vm11, %v1250_v19, %v6344_v27 }
  0xe2   : > { %1019 = vrot.lane.b32.xlu1 %v1000_v59, %s3341_s21  ;;  %v1255_v52 = vsel %vm637_vm11, %v1253_v60, %v1254_v44 }
  0xe5   : > { %1144 = vrot.lane.b32.xlu0 %v1123_v34, %s3341_s21 }
  0xe6   : > { %1142 = vrot.lane.b32.xlu1 %v1120_v4, %s3341_s21 }
  0xe9   : > { %1152 = vrot.lane.b32.xlu0 %v1133_v12, %s3341_s21 }
  0xea   : > { %1146 = vrot.lane.b32.xlu1 %v1126_v1, %s3341_s21 }
  0xed   : > { %1156 = vrot.lane.b32.xlu0 %v1137_v40, %s3341_s21 }
  0xee   : > { %1154 = vrot.lane.b32.xlu1 %v1135_v16, %s3341_s21 }
  0xf1   : > { %1208 = vrot.lane.b32.xlu0 %v1195_v17, %s3340_s27 }
  0xf2   : > { %1210 = vrot.lane.b32.xlu1 %v1199_v35, %s3340_s27 }
  0xf5   : > { %1275 = vrot.lane.b32.xlu0 %v1252_v21, %s3341_s21 }
  0xf6   : > { %1277 = vrot.lane.b32.xlu1 %v1255_v52, %s3341_s21 }
 0x113   : > { %v3772_v13 = vpop.permute.xlu0 %734 }
 0x114   : > { %6484 = vst [vmem:[#allocation6_spill] sm:$0xff] %v3772_v13  ;;  %v3774_v51 = vpop.permute.xlu1 %736 }
 0x115   : > { %6485 = vst [vmem:[#allocation7_spill] sm:$0xff] %v3774_v51 }
 0x117   : > { %v3776_v30 = vpop.permute.xlu0 %742 }
 0x118   : > { %6486 = vst [vmem:[#allocation8_spill] sm:$0xff] %v3776_v30  ;;  %v3778_v58 = vpop.permute.xlu1 %740  ;;  %v4428_v30 = vld [vmem:[#allocation2 + $0x58] sm:$0xf] }
 0x119   : > { %6487 = vst [vmem:[#allocation9_spill] sm:$0xff] %v3778_v58  ;;  %6593 = vst [vmem:[#allocation112_spill] sm:$0xff] %v4428_v30 }
 0x11b   : > { %v3780_v59 = vpop.permute.xlu0 %738 }
 0x11c   : > { %6488 = vst [vmem:[#allocation10_spill] sm:$0xff] %v3780_v59  ;;  %v3782_v33 = vpop.permute.xlu1 %744  ;;  %v4425_v59 = vld [vmem:[#allocation2 + $0x50] sm:$0xf] }
 0x11d   : > { %6489 = vst [vmem:[#allocation11_spill] sm:$0xff] %v3782_v33 }
 0x11f   : > { %v3784_v8 = vpop.permute.xlu0 %746 }
 0x120   : > { %6490 = vst [vmem:[#allocation12_spill] sm:$0xff] %v3784_v8  ;;  %v3786_v9 = vpop.permute.xlu1 %752 }
 0x121   : > { %6491 = vst [vmem:[#allocation13_spill] sm:$0xff] %v3786_v9 }
 0x123   : > { %v3788_v42 = vpop.permute.xlu0 %750 }
 0x124   : > { %6492 = vst [vmem:[#allocation14_spill] sm:$0xff] %v3788_v42  ;;  %v3790_v44 = vpop.permute.xlu1 %748  ;;  %v4417_v42 = vld [vmem:[#allocation2 + $0x40] sm:$0xff] }
 0x125   : > { %6493 = vst [vmem:[#allocation15_spill] sm:$0xff] %v3790_v44 }
 0x127   : > { %v3792_v49 = vpop.permute.xlu0 %870 }
 0x128   : > { %6494 = vst [vmem:[#allocation16_spill] sm:$0xff] %v3792_v49  ;;  %v3794_v50 = vpop.permute.xlu1 %880 }
 0x129   : > { %6495 = vst [vmem:[#allocation17_spill] sm:$0xff] %v3794_v50 }
 0x12b   : > { %v3796_v56 = vpop.permute.xlu0 %878 }
 0x12c   : > { %6496 = vst [vmem:[#allocation18_spill] sm:$0xff] %v3796_v56  ;;  %v3798_v57 = vpop.permute.xlu1 %888 }
 0x12d   : > { %6497 = vst [vmem:[#allocation19_spill] sm:$0xff] %v3798_v57 }
 0x12f   : > { %v3800_v34 = vpop.permute.xlu0 %1005 }
 0x130   : > { %6498 = vst [vmem:[#allocation20_spill] sm:$0xff] %v3800_v34  ;;  %v3802_v0 = vpop.permute.xlu1 %1015 }
 0x131   : > { %6499 = vst [vmem:[#allocation21_spill] sm:$0xff] %v3802_v0 }
 0x133   : > { %v3804_v4 = vpop.permute.xlu0 %1013 }
 0x134   : > { %6500 = vst [vmem:[#allocation22_spill] sm:$0xff] %v3804_v4  ;;  %v3806_v5 = vpop.permute.xlu1 %1023 }
 0x135   : > { %6501 = vst [vmem:[#allocation23_spill] sm:$0xff] %v3806_v5 }
 0x137   : > { %v3808_v53 = vpop.permute.xlu0 %1140 }
 0x138   : > { %6502 = vst [vmem:[#allocation24_spill] sm:$0xff] %v3808_v53  ;;  %v3810_v12 = vpop.permute.xlu1 %1150 }
 0x139   : > { %6503 = vst [vmem:[#allocation25_spill] sm:$0xff] %v3810_v12 }
 0x13b   : > { %v3812_v11 = vpop.permute.xlu0 %1148 }
 0x13c   : > { %6504 = vst [vmem:[#allocation26_spill] sm:$0xff] %v3812_v11  ;;  %v3814_v1 = vpop.permute.xlu1 %1158 }
 0x13d   : > { %6505 = vst [vmem:[#allocation27_spill] sm:$0xff] %v3814_v1 }
 0x13f   : > { %v3816_v14 = vpop.permute.xlu0 %874 }
 0x140   : > { %6506 = vst [vmem:[#allocation28_spill] sm:$0xff] %v3816_v14  ;;  %v3818_v40 = vpop.permute.xlu1 %872 }
 0x141   : > { %6507 = vst [vmem:[#allocation29_spill] sm:$0xff] %v3818_v40 }
 0x143   : > { %v3820_v2 = vpop.permute.xlu0 %882 }
 0x144   : > { %6508 = vst [vmem:[#allocation30_spill] sm:$0xff] %v3820_v2  ;;  %v3822_v16 = vpop.permute.xlu1 %876 }
 0x145   : > { %6509 = vst [vmem:[#allocation31_spill] sm:$0xff] %v3822_v16 }
 0x147   : > { %v3824_v17 = vpop.permute.xlu0 %886 }
 0x148   : > { %6510 = vst [vmem:[#allocation32_spill] sm:$0xff] %v3824_v17  ;;  %v3826_v20 = vpop.permute.xlu1 %884 }
 0x149   : > { %6511 = vst [vmem:[#allocation33_spill] sm:$0xff] %v3826_v20 }
 0x14b   : > { %v3828_v35 = vpop.permute.xlu0 %1009 }
 0x14c   : > { %6512 = vst [vmem:[#allocation34_spill] sm:$0xff] %v3828_v35  ;;  %v3830_v19 = vpop.permute.xlu1 %1007 }
 0x14d   : > { %6513 = vst [vmem:[#allocation35_spill] sm:$0xff] %v3830_v19 }
 0x14f   : > { %v3832_v60 = vpop.permute.xlu0 %1017 }
 0x150   : > { %6514 = vst [vmem:[#allocation36_spill] sm:$0xff] %v3832_v60  ;;  %v3834_v21 = vpop.permute.xlu1 %1011 }
 0x151   : > { %6515 = vst [vmem:[#allocation37_spill] sm:$0xff] %v3834_v21 }
 0x153   : > { %v3836_v52 = vpop.permute.xlu0 %1021 }
 0x154   : > { %6516 = vst [vmem:[#allocation38_spill] sm:$0xff] %v3836_v52  ;;  %v3838_v27 = vpop.permute.xlu1 %1019 }
 0x155   : > { %6517 = vst [vmem:[#allocation39_spill] sm:$0xff] %v3838_v27 }
 0x157   : > { %v3840_v1 = vpop.permute.xlu0 %1144 }
 0x158   : > { %6518 = vst [vmem:[#allocation40_spill] sm:$0xff] %v3840_v1  ;;  %v3842_v11 = vpop.permute.xlu1 %1142 }
 0x159   : > { %6519 = vst [vmem:[#allocation41_spill] sm:$0xff] %v3842_v11 }
 0x15b   : > { %v3844_v12 = vpop.permute.xlu0 %1152 }
 0x15c   : > { %6520 = vst [vmem:[#allocation42_spill] sm:$0xff] %v3844_v12  ;;  %v3846_v53 = vpop.permute.xlu1 %1146  ;;  %v1230_v12 = vmul.f32 %v3701_v62, %v3565_v54 }
 0x15d   : > { %6521 = vst [vmem:[#allocation43_spill] sm:$0xff] %v3846_v53 }
 0x15e   : > { %v1265_v56 = vrot.slane %v1230_v12, 4 }
 0x15f   : > { %v3848_v5 = vpop.permute.xlu0 %1156 }
 0x160   : > { %6522 = vst [vmem:[#allocation44_spill] sm:$0xff] %v3848_v5  ;;  %v3850_v4 = vpop.permute.xlu1 %1154 }
 0x161   : > { %6523 = vst [vmem:[#allocation45_spill] sm:$0xff] %v3850_v4 }
 0x163   : > { %v1209_v0 = vpop.permute.xlu0 %1208 }
 0x164   : > { %v1213_v21 = vsel %vm705_vm7, %v3699_v61, %v1209_v0  ;;  %v1211_v60 = vpop.permute.xlu1 %1210 }
 0x165   : > { %v1222_v52 = vmul.f32 %v1213_v21, %v3541_v38  ;;  %v1227_v27 = vmul.f32 %v1213_v21, %v3513_v6  ;;  %v1214_v1 = vsel %vm705_vm7, %v1209_v0, %v1211_v60  ;;  %v1224_v4 = vmul.f32 %v1211_v60, %v3531_v26 }
 0x166   : > { %v1223_v53 = vmul.f32 %v1214_v1, %v3534_v31  ;;  %v1228_v5 = vmul.f32 %v1214_v1, %v3516_v7  ;;  %v1229_v11 = vmul.f32 %v1211_v60, %v3558_v48  ;;  %v1232_v0 = vmul.f32 %v1213_v21, %v3664_v45 }
 0x167   : > { %v1256_v35 = vrot.slane %v1222_v52, 4  ;;  %v1257_v61 = vrot.slane %v1227_v27, 4  ;;  %v1262_v17 = vrot.slane %v1224_v4, 4  ;;  %v1233_v52 = vmul.f32 %v1214_v1, %v3666_v47 }
 0x168   : > { %v1259_v34 = vrot.slane %v1223_v53, 4  ;;  %v1260_v19 = vrot.slane %v1228_v5, 4  ;;  %v1263_v57 = vrot.slane %v1229_v11, 4  ;;  %v6524_v27 = vrot.slane %v3753_v39, 4 }
 0x169   : > { %v1258_v20 = vsel %vm637_vm11, %v1256_v35, %v1257_v61  ;;  %v1269_v5 = vrot.slane %v1232_v0, 4  ;;  %v1234_v53 = vmul.f32 %v1211_v60, %v3577_v63  ;;  %v1271_v11 = vrot.slane %v1233_v52, 4  ;;  %v3901_v35 = vpop.permute.xlu1 %1277 }
 0x16a   : > { %1279 = vrot.lane.b32.xlu0 %v1258_v20, %s3341_s21  ;;  %v1261_v62 = vsel %vm637_vm11, %v1259_v34, %v1260_v19  ;;  %v1264_v16 = vsel %vm637_vm11, %v1262_v17, %v1263_v57  ;;  %v1266_v4 = vsel %vm637_vm11, %v6524_v27, %v1265_v56  ;;  %v3881_v1 = vsub.s32 2, %v3386_v22  ;;  %6526 = vst [vmem:[#allocation47_spill] sm:$0xff] %v3901_v35  ;;  %v4391_v35 = vld [vmem:[#allocation2 + $0x48] sm:$0xff] }
 0x16b   : > { %1281 = vrot.lane.b32.xlu1 %v1261_v62, %s3341_s21  ;;  %v1270_v34 = vsel %vm637_vm11, %v1257_v61, %v1269_v5  ;;  %v1273_v12 = vrot.slane %v1234_v53, 4  ;;  %v1272_v39 = vsel %vm637_vm11, %v1260_v19, %v1271_v11  ;;  %6588 = vst [vmem:[#allocation108_spill] sm:$0xff] %v4391_v35 }
 0x16c   : > { %v1330_v17 = vrot.slane %v3417_v29, %v3881_v1  ;;  %v1334_v20 = vrot.slane %v3412_v28, %v3881_v1 }
 0x16d   : > { %v1274_v56 = vsel %vm637_vm11, %v1263_v57, %v1273_v12  ;;  %v3899_v57 = vpop.permute.xlu0 %1275 }
 0x16e   : > { %1283 = vrot.lane.b32.xlu0 %v1264_v16, %s3341_s21  ;;  %v1322_v16 = vrot.slane %v3401_v25, %v3881_v1  ;;  %6525 = vst [vmem:[#allocation46_spill] sm:$0xff] %v3899_v57 }
 0x16f   : > { %1285 = vrot.lane.b32.xlu1 %v1266_v4, %s3341_s21 }
 0x172   : > { %1287 = vrot.lane.b32.xlu0 %v3741_v10, %s3341_s21  ;;  %v1326_v10 = vrot.slane %v3396_v24, %v3881_v1 }
 0x173   : > { %1289 = vrot.lane.b32.xlu1 %v1270_v34, %s3341_s21 }
 0x176   : > { %1291 = vrot.lane.b32.xlu0 %v1272_v39, %s3341_s21 }
 0x177   : > { %1293 = vrot.lane.b32.xlu1 %v1274_v56, %s3341_s21 }
 0x17a   : > { %1339 = vrot.lane.b32.xlu0 %v1322_v16, %s3339_s18 }
 0x17b   : > { %1341 = vrot.lane.b32.xlu1 %v1326_v10, %s3339_s18 }
 0x17e   : > { %1343 = vrot.lane.b32.xlu0 %v1330_v17, %s3339_s18 }
 0x17f   : > { %1345 = vrot.lane.b32.xlu1 %v1334_v20, %s3339_s18 }
 0x1dc   : > { %v3903_v19 = vpop.permute.xlu0 %1279 }
 0x1dd   : > { %6527 = vst [vmem:[#allocation48_spill] sm:$0xff] %v3903_v19  ;;  %v3905_v60 = vpop.permute.xlu1 %1281 }
 0x1de   : > { %6528 = vst [vmem:[#allocation49_spill] sm:$0xff] %v3905_v60 }
 0x1e0   : > { %v3907_v21 = vpop.permute.xlu0 %1283 }
 0x1e1   : > { %6529 = vst [vmem:[#allocation50_spill] sm:$0xff] %v3907_v21  ;;  %v3909_v61 = vpop.permute.xlu1 %1285 }
 0x1e2   : > { %6530 = vst [vmem:[#allocation51_spill] sm:$0xff] %v3909_v61 }
 0x1e4   : > { %v3911_v0 = vpop.permute.xlu0 %1287 }
 0x1e5   : > { %6531 = vst [vmem:[#allocation52_spill] sm:$0xff] %v3911_v0  ;;  %v3913_v62 = vpop.permute.xlu1 %1289 }
 0x1e6   : > { %6532 = vst [vmem:[#allocation53_spill] sm:$0xff] %v3913_v62 }
 0x1e8   : > { %v3915_v52 = vpop.permute.xlu0 %1291 }
 0x1e9   : > { %6533 = vst [vmem:[#allocation54_spill] sm:$0xff] %v3915_v52  ;;  %v3917_v27 = vpop.permute.xlu1 %1293 }
 0x1ea   : > { %6534 = vst [vmem:[#allocation55_spill] sm:$0xff] %v3917_v27 }
 0x1ec   : > { %v1340_v4 = vpop.permute.xlu0 %1339 }
 0x1ed   : > { %v1342_v5 = vpop.permute.xlu1 %1341  ;;  %v1355_v53 = vmul.f32 %v1340_v4, %v3523_v15 }
 0x1ee   : > { %v1347_v11 = vsel %vm277_vm2, %v1340_v4, %v1342_v5 }
 0x1ef   : > { %1375 = vrot.lane.b32.xlu0 %v1355_v53, %s3339_s18  ;;  %v1356_v34 = vmul.f32 %v1347_v11, %v3525_v18  ;;  %v1360_v53 = vmul.f32 %v1340_v4, %v3548_v41 }
 0x1f0   : > { %v1344_v12 = vpop.permute.xlu0 %1343 }
 0x1f1   : > { %v1348_v39 = vsel %vm277_vm2, %v1342_v5, %v1344_v12  ;;  %v1346_v56 = vpop.permute.xlu1 %1345  ;;  %1377 = vrot.lane.b32.xlu1 %v1356_v34, %s3339_s18  ;;  %v1361_v5 = vmul.f32 %v1347_v11, %v3508_v3 }
 0x1f2   : > { %v1357_v16 = vmul.f32 %v1348_v39, %v3541_v38  ;;  %v1349_v10 = vsel %vm277_vm2, %v1344_v12, %v1346_v56  ;;  %v1359_v20 = vmul.f32 %v1346_v56, %v3531_v26  ;;  %v1362_v34 = vmul.f32 %v1348_v39, %v3513_v6 }
 0x1f3   : > { %v1358_v17 = vmul.f32 %v1349_v10, %v3534_v31  ;;  %v3939_v12 = vsub.s32 7, %v3386_v22 }
 0x1f4   : > { %1379 = vrot.lane.b32.xlu0 %v1357_v16, %s3339_s18  ;;  %v1363_v16 = vmul.f32 %v1349_v10, %v3516_v7 }
 0x1f5   : > { %1381 = vrot.lane.b32.xlu1 %v1358_v17, %s3339_s18  ;;  %v1364_v17 = vmul.f32 %v1346_v56, %v3558_v48  ;;  %v1422_v4 = vrot.slane %v3401_v25, %v3939_v12  ;;  %v1426_v11 = vrot.slane %v3396_v24, %v3939_v12  ;;  %v1430_v39 = vrot.slane %v3417_v29, %v3939_v12 }
 0x1f6   : > { %v1434_v56 = vrot.slane %v3412_v28, %v3939_v12 }
 0x1f8   : > { %1383 = vrot.lane.b32.xlu0 %v1359_v20, %s3339_s18 }
 0x1f9   : > { %1385 = vrot.lane.b32.xlu1 %v1360_v53, %s3339_s18 }
 0x1fc   : > { %1387 = vrot.lane.b32.xlu0 %v1361_v5, %s3339_s18 }
 0x1fd   : > { %1389 = vrot.lane.b32.xlu1 %v1362_v34, %s3339_s18 }
 0x200   : > { %1391 = vrot.lane.b32.xlu0 %v1363_v16, %s3339_s18 }
 0x201   : > { %1393 = vrot.lane.b32.xlu1 %v1364_v17, %s3339_s18 }
 0x204   : > { %1439 = vrot.lane.b32.xlu0 %v1422_v4, %s3339_s18 }
 0x205   : > { %1441 = vrot.lane.b32.xlu1 %v1426_v11, %s3339_s18 }
 0x208   : > { %1443 = vrot.lane.b32.xlu0 %v1430_v39, %s3339_s18 }
 0x209   : > { %1445 = vrot.lane.b32.xlu1 %v1434_v56, %s3339_s18 }
 0x261   : > { %v3957_v25 = vpop.permute.xlu0 %1375 }
 0x262   : > { %6535 = vst [vmem:[#allocation56_spill] sm:$0xff] %v3957_v25 }
 0x263   : > { %v3959_v10 = vpop.permute.xlu1 %1377 }
 0x264   : > { %6536 = vst [vmem:[#allocation57_spill] sm:$0xff] %v3959_v10 }
 0x266   : > { %v3961_v20 = vpop.permute.xlu0 %1379 }
 0x267   : > { %6537 = vst [vmem:[#allocation58_spill] sm:$0xff] %v3961_v20  ;;  %v3963_v24 = vpop.permute.xlu1 %1381 }
 0x268   : > { %6538 = vst [vmem:[#allocation59_spill] sm:$0xff] %v3963_v24 }
 0x26a   : > { %v3965_v53 = vpop.permute.xlu0 %1383 }
 0x26b   : > { %6539 = vst [vmem:[#allocation60_spill] sm:$0xff] %v3965_v53  ;;  %v3967_v29 = vpop.permute.xlu1 %1385 }
 0x26c   : > { %6540 = vst [vmem:[#allocation61_spill] sm:$0xff] %v3967_v29 }
 0x26e   : > { %v3969_v5 = vpop.permute.xlu0 %1387 }
 0x26f   : > { %6541 = vst [vmem:[#allocation62_spill] sm:$0xff] %v3969_v5  ;;  %v3971_v34 = vpop.permute.xlu1 %1389 }
 0x270   : > { %6542 = vst [vmem:[#allocation63_spill] sm:$0xff] %v3971_v34 }
 0x272   : > { %v3973_v28 = vpop.permute.xlu0 %1391 }
 0x273   : > { %6543 = vst [vmem:[#allocation64_spill] sm:$0xff] %v3973_v28  ;;  %v3975_v16 = vpop.permute.xlu1 %1393 }
 0x274   : > { %6544 = vst [vmem:[#allocation65_spill] sm:$0xff] %v3975_v16 }
 0x276   : > { %v1440_v17 = vpop.permute.xlu0 %1439 }
 0x277   : > { %v1442_v4 = vpop.permute.xlu1 %1441  ;;  %v1455_v11 = vmul.f32 %v1440_v17, %v3523_v15  ;;  %v1460_v39 = vmul.f32 %v1440_v17, %v3548_v41  ;;  %v1465_v62 = vmul.f32 %v1440_v17, %v3565_v54 }
 0x278   : > { %v1447_v56 = vsel %vm277_vm2, %v1440_v17, %v1442_v4 }
 0x279   : > { %v1456_v27 = vmul.f32 %v1447_v56, %v3525_v18  ;;  %v1461_v29 = vmul.f32 %v1447_v56, %v3508_v3  ;;  %v1485_v53 = vrot.slane %v1455_v11, 1  ;;  %v1486_v24 = vrot.slane %v1460_v39, 1 }
 0x27a   : > { %v1444_v5 = vpop.permute.xlu0 %1443  ;;  %v1500_v57 = vrot.slane %v1465_v62, 1 }
 0x27b   : > { %v1488_v34 = vrot.slane %v1456_v27, 1  ;;  %v1489_v20 = vrot.slane %v1461_v29, 1  ;;  %v1448_v28 = vsel %vm277_vm2, %v1442_v4, %v1444_v5  ;;  %v1446_v16 = vpop.permute.xlu1 %1445  ;;  %v1487_v61 = vsel %vm406_vm8, %v1485_v53, %v1486_v24 }
 0x27c   : > { %v1457_v25 = vmul.f32 %v1448_v28, %v3541_v38  ;;  %v1462_v10 = vmul.f32 %v1448_v28, %v3513_v6  ;;  %v1449_v52 = vsel %vm277_vm2, %v1444_v5, %v1446_v16  ;;  %1510 = vrot.lane.b32.xlu0 %v1487_v61, %s3339_s18  ;;  %v1459_v4 = vmul.f32 %v1446_v16, %v3531_v26 }
 0x27d   : > { %v1490_v0 = vsel %vm406_vm8, %v1488_v34, %v1489_v20  ;;  %v1458_v11 = vmul.f32 %v1449_v52, %v3534_v31  ;;  %v1463_v27 = vmul.f32 %v1449_v52, %v3516_v7  ;;  %v1464_v17 = vmul.f32 %v1446_v16, %v3558_v48 }
 0x27e   : > { %v1491_v29 = vrot.slane %v1457_v25, 1  ;;  %v1492_v39 = vrot.slane %v1462_v10, 1  ;;  %1512 = vrot.lane.b32.xlu1 %v1490_v0, %s3339_s18  ;;  %v1466_v53 = vmul.f32 %v1447_v56, %v3651_v36  ;;  %v1467_v34 = vmul.f32 %v1448_v28, %v3664_v45 }
 0x27f   : > { %v1494_v21 = vrot.slane %v1458_v11, 1  ;;  %v1495_v5 = vrot.slane %v1463_v27, 1  ;;  %v1497_v25 = vrot.slane %v1459_v4, 1  ;;  %v1498_v10 = vrot.slane %v1464_v17, 1 }
 0x280   : > { %v1493_v60 = vsel %vm406_vm8, %v1491_v29, %v1492_v39  ;;  %v1502_v61 = vrot.slane %v1466_v53, 1  ;;  %v1504_v0 = vrot.slane %v1467_v34, 1  ;;  %v1501_v27 = vsel %vm406_vm8, %v1486_v24, %v1500_v57 }
 0x281   : > { %v1496_v19 = vsel %vm406_vm8, %v1494_v21, %v1495_v5  ;;  %1514 = vrot.lane.b32.xlu0 %v1493_v60, %s3339_s18  ;;  %v1499_v11 = vsel %vm406_vm8, %v1497_v25, %v1498_v10  ;;  %v1468_v56 = vmul.f32 %v1449_v52, %v3666_v47  ;;  %v1469_v28 = vmul.f32 %v1446_v16, %v3577_v63 }
 0x282   : > { %1516 = vrot.lane.b32.xlu1 %v1496_v19, %s3339_s18  ;;  %v1503_v21 = vsel %vm406_vm8, %v1489_v20, %v1502_v61  ;;  %v1505_v60 = vsel %vm406_vm8, %v1492_v39, %v1504_v0  ;;  %v4012_v57 = vsub.s32 4, %v3386_v22  ;;  %v4021_v20 = vld [vmem:[%s6341_s1 + $0x20] sm:$0xff]  ;;  %v4028_v22 = vld [vmem:[%s6341_s1 + $0x28] sm:$0xff]  ;;  %v4039_v39 = vld [vmem:[%s6341_s1 + $0x38] sm:$0xff] }
 0x283   : > { %v1506_v62 = vrot.slane %v1468_v56, 1  ;;  %v1508_v19 = vrot.slane %v1469_v28, 1 }
 0x284   : > { %6545 = vst [vmem:[#allocation66_spill] sm:$0xff] %v4012_v57  ;;  %v1557_v24 = vrot.slane %v4021_v20, %v4012_v57  ;;  %v1561_v16 = vrot.slane %v4028_v22, %v4012_v57  ;;  %v1565_v29 = vrot.slane %v3459_v43, %v4012_v57  ;;  %v1569_v4 = vrot.slane %v4039_v39, %v4012_v57 }
 0x285   : > { %1518 = vrot.lane.b32.xlu0 %v1499_v11, %s3339_s18  ;;  %v1507_v52 = vsel %vm406_vm8, %v1495_v5, %v1506_v62  ;;  %v1509_v63 = vsel %vm406_vm8, %v1498_v10, %v1508_v19 }
 0x286   : > { %1520 = vrot.lane.b32.xlu1 %v1501_v27, %s3339_s18 }
 0x289   : > { %1522 = vrot.lane.b32.xlu0 %v1503_v21, %s3339_s18 }
 0x28a   : > { %1524 = vrot.lane.b32.xlu1 %v1505_v60, %s3339_s18 }
 0x28d   : > { %1526 = vrot.lane.b32.xlu0 %v1507_v52, %s3339_s18 }
 0x28e   : > { %1528 = vrot.lane.b32.xlu1 %v1509_v63, %s3339_s18 }
 0x291   : > { %1574 = vrot.lane.b32.xlu0 %v1557_v24, %s3339_s18 }
 0x292   : > { %1576 = vrot.lane.b32.xlu1 %v1561_v16, %s3339_s18 }
 0x295   : > { %1578 = vrot.lane.b32.xlu0 %v1565_v29, %s3339_s18 }
 0x296   : > { %1580 = vrot.lane.b32.xlu1 %v1569_v4, %s3339_s18 }
 0x2ee   : > { %v4045_v5 = vpop.permute.xlu0 %1510 }
 0x2ef   : > { %6546 = vst [vmem:[#allocation67_spill] sm:$0xff] %v4045_v5 }
 0x2f0   : > { %v4047_v17 = vpop.permute.xlu1 %1512 }
 0x2f1   : > { %6547 = vst [vmem:[#allocation68_spill] sm:$0xff] %v4047_v17 }
 0x2f3   : > { %v4049_v53 = vpop.permute.xlu0 %1514 }
 0x2f4   : > { %6548 = vst [vmem:[#allocation69_spill] sm:$0xff] %v4049_v53  ;;  %v4051_v34 = vpop.permute.xlu1 %1516 }
 0x2f5   : > { %6549 = vst [vmem:[#allocation70_spill] sm:$0xff] %v4051_v34 }
 0x2f7   : > { %v4053_v43 = vpop.permute.xlu0 %1518 }
 0x2f8   : > { %6550 = vst [vmem:[#allocation71_spill] sm:$0xff] %v4053_v43  ;;  %v4055_v25 = vpop.permute.xlu1 %1520 }
 0x2f9   : > { %6551 = vst [vmem:[#allocation72_spill] sm:$0xff] %v4055_v25 }
 0x2fb   : > { %v4057_v10 = vpop.permute.xlu0 %1522 }
 0x2fc   : > { %6552 = vst [vmem:[#allocation73_spill] sm:$0xff] %v4057_v10  ;;  %v4059_v61 = vpop.permute.xlu1 %1524 }
 0x2fd   : > { %6553 = vst [vmem:[#allocation74_spill] sm:$0xff] %v4059_v61 }
 0x2ff   : > { %v4061_v0 = vpop.permute.xlu0 %1526 }
 0x300   : > { %6554 = vst [vmem:[#allocation75_spill] sm:$0xff] %v4061_v0  ;;  %v4063_v11 = vpop.permute.xlu1 %1528 }
 0x301   : > { %6555 = vst [vmem:[#allocation76_spill] sm:$0xff] %v4063_v11 }
 0x303   : > { %v1575_v27 = vpop.permute.xlu0 %1574 }
 0x304   : > { %v1577_v56 = vpop.permute.xlu1 %1576  ;;  %v1590_v21 = vmul.f32 %v1575_v27, %v3523_v15  ;;  %v1595_v60 = vmul.f32 %v1575_v27, %v3548_v41 }
 0x305   : > { %v1582_v28 = vsel %vm277_vm2, %v1575_v27, %v1577_v56 }
 0x306   : > { %v1591_v62 = vmul.f32 %v1582_v28, %v3525_v18  ;;  %v1596_v19 = vmul.f32 %v1582_v28, %v3508_v3  ;;  %v1620_v52 = vrot.slane %v1590_v21, 2  ;;  %v1621_v63 = vrot.slane %v1595_v60, 2 }
 0x307   : > { %v1579_v29 = vpop.permute.xlu0 %1578 }
 0x308   : > { %v1623_v24 = vrot.slane %v1591_v62, 2  ;;  %v1624_v16 = vrot.slane %v1596_v19, 2  ;;  %v4070_v4 = vpop.permute.xlu1 %1580  ;;  %v1583_v11 = vsel %vm277_vm2, %v1577_v56, %v1579_v29  ;;  %v1622_v15 = vsel %vm483_vm9, %v1620_v52, %v1621_v63 }
 0x309   : > { %v1584_v0 = vsel %vm277_vm2, %v1579_v29, %v4070_v4  ;;  %v1592_v41 = vmul.f32 %v1583_v11, %v3541_v38  ;;  %v1597_v18 = vmul.f32 %v1583_v11, %v3513_v6  ;;  %1645 = vrot.lane.b32.xlu0 %v1622_v15, %s3339_s18  ;;  %v1594_v21 = vmul.f32 %v4070_v4, %v3531_v26 }
 0x30a   : > { %v1625_v3 = vsel %vm483_vm9, %v1623_v24, %v1624_v16  ;;  %v1593_v56 = vmul.f32 %v1584_v0, %v3534_v31  ;;  %v1598_v60 = vmul.f32 %v1584_v0, %v3516_v7  ;;  %v4087_v62 = vmul.f32 %v4070_v4, %v3558_v48 }
 0x30b   : > { %1647 = vrot.lane.b32.xlu1 %v1625_v3, %s3339_s18  ;;  %v1600_v38 = vmul.f32 %v1575_v27, %v3565_v54  ;;  %v1626_v6 = vrot.slane %v1592_v41, 2  ;;  %v1627_v19 = vrot.slane %v1597_v18, 2  ;;  %v1601_v24 = vmul.f32 %v1582_v28, %v3651_v36 }
 0x30c   : > { %v1629_v52 = vrot.slane %v1593_v56, 2  ;;  %v1630_v29 = vrot.slane %v1598_v60, 2  ;;  %v1632_v15 = vrot.slane %v1594_v21, 2  ;;  %v1633_v3 = vrot.slane %v4087_v62, 2  ;;  %v4128_v56 = vld [vmem:[%s6341_s1 + $0x50] sm:$0xff] }
 0x30d   : > { %v1628_v26 = vsel %vm483_vm9, %v1626_v6, %v1627_v19  ;;  %v1602_v31 = vmul.f32 %v1583_v11, %v3664_v45  ;;  %v1635_v48 = vrot.slane %v1600_v38, 2  ;;  %v1637_v54 = vrot.slane %v1601_v24, 2  ;;  %v4136_v38 = vld [vmem:[%s6341_s1 + $0x58] sm:$0xff]  ;;  %v202_v62 = vld [vmem:[%s6342_s2] sm:$0xf] }
 0x30e   : > { %1649 = vrot.lane.b32.xlu0 %v1628_v26, %s3339_s18  ;;  %v1631_v7 = vsel %vm483_vm9, %v1629_v52, %v1630_v29  ;;  %v1634_v27 = vsel %vm483_vm9, %v1632_v15, %v1633_v3  ;;  %v1603_v36 = vmul.f32 %v1584_v0, %v3666_v47  ;;  %v4111_v47 = vld [vmem:[%s6341_s1 + $0x40] sm:$0xff]  ;;  %v1700_v60 = vrot.slane %v4128_v56, %v3391_v23 }
 0x30f   : > { %1651 = vrot.lane.b32.xlu1 %v1631_v7, %s3339_s18  ;;  %v1639_v28 = vrot.slane %v1602_v31, 2  ;;  %v1636_v41 = vsel %vm483_vm9, %v1621_v63, %v1635_v48  ;;  %v1638_v45 = vsel %vm483_vm9, %v1624_v16, %v1637_v54  ;;  %v1692_v0 = vrot.slane %v4111_v47, %v3391_v23  ;;  %v4120_v16 = vld [vmem:[%s6341_s1 + $0x48] sm:$0xff]  ;;  %v4162_v31 = vld [vmem:[%s6341_s1 + $0x30] sm:$0xff]  ;;  %v3283_v54 = vld [vmem:[%s6341_s1] sm:$0xff] }
 0x310   : > { %v1641_v11 = vrot.slane %v1603_v36, 2  ;;  %v1696_v21 = vrot.slane %v4120_v16, %v3391_v23  ;;  %v1704_v6 = vrot.slane %v4136_v38, %v3391_v23  ;;  %v1831_v52 = vrot.slane %v4120_v16, %v3426_v32  ;;  %v3284_v36 = vld [vmem:[%s6341_s1 + $0x8] sm:$0xff] }
 0x311   : > { %v1640_v18 = vsel %vm483_vm9, %v1627_v19, %v1639_v28  ;;  %v1827_v19 = vrot.slane %v4111_v47, %v3426_v32  ;;  %v1839_v24 = vrot.slane %v4136_v38, %v3426_v32  ;;  %v2062_v26 = vrot.slane %v4021_v20, %v3467_v46 }
 0x312   : > { %1653 = vrot.lane.b32.xlu0 %v1634_v27, %s3339_s18  ;;  %v1642_v63 = vsel %vm483_vm9, %v1630_v29, %v1641_v11  ;;  %v1835_v29 = vrot.slane %v4128_v56, %v3426_v32  ;;  %v2066_v15 = vrot.slane %v4028_v22, %v3467_v46  ;;  %v2070_v7 = vrot.slane %v4162_v31, %v3467_v46  ;;  %v3286_v11 = vld [vmem:[%s6341_s1 + $0x18] sm:$0xff]  ;;  %v4293_v32 = vld [vmem:[#allocation2] sm:$0xff] }
 0x313   : > { %1655 = vrot.lane.b32.xlu1 %v1636_v41, %s3339_s18  ;;  %v2074_v48 = vrot.slane %v4039_v39, %v3467_v46  ;;  %v1962_v27 = vrot.slane %v3283_v54, %v3441_v37  ;;  %v1966_v28 = vrot.slane %v3284_v36, %v3441_v37  ;;  %v4183_v41 = vld [vmem:[%s6341_s1 + $0x10] sm:$0xff]  ;;  %6573 = vst [vmem:[#allocation94_spill] sm:$0xff] %v4293_v32 }
 0x314   : > { %v4305_v61 = vrot.slane %v3286_v11, %v3496_v55  ;;  %v4321_v25 = vrot.slane %v4183_v41, %v3467_v46  ;;  %v4329_v43 = vrot.slane %v4183_v41, %v3496_v55 }
 0x316   : > { %1657 = vrot.lane.b32.xlu0 %v1638_v45, %s3339_s18  ;;  %v1970_v45 = vrot.slane %v4183_v41, %v3441_v37  ;;  %6576 = vst [vmem:[#allocation97_spill] sm:$0xff] %v4305_v61  ;;  %6580 = vst [vmem:[#allocation101_spill] sm:$0xff] %v4329_v43  ;;  %v4350_v41 = vrot.slane %v4028_v22, %v3939_v12 }
 0x317   : > { %1659 = vrot.lane.b32.xlu1 %v1640_v18, %s3339_s18  ;;  %v1974_v18 = vrot.slane %v3286_v11, %v3441_v37 }
 0x318   : > { %6584 = vst [vmem:[#allocation105_spill] sm:$0xff] %v4350_v41 }
 0x31a   : > { %1661 = vrot.lane.b32.xlu0 %v1642_v63, %s3339_s18  ;;  %v2201_v63 = vrot.slane %v4028_v22, %v3496_v55 }
 0x31b   : > { %1709 = vrot.lane.b32.xlu1 %v1692_v0, %s3339_s18  ;;  %v2197_v0 = vrot.slane %v4021_v20, %v3496_v55 }
 0x31e   : > { %1711 = vrot.lane.b32.xlu0 %v1696_v21, %s3339_s18  ;;  %v2205_v21 = vrot.slane %v4162_v31, %v3496_v55 }
 0x31f   : > { %1713 = vrot.lane.b32.xlu1 %v1700_v60, %s3339_s18  ;;  %v2209_v60 = vrot.slane %v4039_v39, %v3496_v55 }
 0x322   : > { %1715 = vrot.lane.b32.xlu0 %v1704_v6, %s3339_s18  ;;  %v2332_v6 = vrot.slane %v4111_v47, %v3881_v1 }
 0x323   : > { %1844 = vrot.lane.b32.xlu1 %v1827_v19, %s3339_s18  ;;  %v2336_v19 = vrot.slane %v4120_v16, %v3881_v1 }
 0x326   : > { %1846 = vrot.lane.b32.xlu0 %v1831_v52, %s3339_s18  ;;  %v2340_v52 = vrot.slane %v4128_v56, %v3881_v1 }
 0x327   : > { %1848 = vrot.lane.b32.xlu1 %v1835_v29, %s3339_s18  ;;  %v2344_v29 = vrot.slane %v4136_v38, %v3881_v1 }
 0x32a   : > { %1850 = vrot.lane.b32.xlu0 %v1839_v24, %s3339_s18  ;;  %v2467_v24 = vrot.slane %v4111_v47, %v3939_v12 }
 0x32b   : > { %2079 = vrot.lane.b32.xlu1 %v2062_v26, %s3341_s21  ;;  %v2471_v26 = vrot.slane %v4120_v16, %v3939_v12 }
 0x32e   : > { %2081 = vrot.lane.b32.xlu0 %v2066_v15, %s3341_s21  ;;  %v4222_v15 = vld [vmem:[#allocation2 + $0x70] sm:$0xf] }
 0x32f   : > { %2083 = vrot.lane.b32.xlu1 %v2070_v7, %s3341_s21  ;;  %6556 = vst [vmem:[#allocation77_spill] sm:$0xff] %v4222_v15  ;;  %v1604_v7 = vmul.f32 %v4222_v15, %v4070_v4 }
 0x332   : > { %2085 = vrot.lane.b32.xlu0 %v2074_v48, %s3341_s21  ;;  %v2475_v48 = vrot.slane %v4128_v56, %v3939_v12 }
 0x333   : > { %1979 = vrot.lane.b32.xlu1 %v1962_v27, %s3341_s21  ;;  %v2479_v27 = vrot.slane %v4136_v38, %v3939_v12 }
 0x336   : > { %1981 = vrot.lane.b32.xlu0 %v1966_v28, %s3341_s21  ;;  %v1643_v28 = vrot.slane %v1604_v7, 2  ;;  %v4274_v7 = vrot.slane %v202_v62, %v3467_v46 }
 0x337   : > { %1983 = vrot.lane.b32.xlu1 %v1970_v45, %s3341_s21 }
 0x338   : > { %v1644_v45 = vsel %vm483_vm9, %v1633_v3, %v1643_v28  ;;  %v4258_v3 = vrot.slane %v3283_v54, %v3467_v46  ;;  %6570 = vst [vmem:[#allocation91_spill] sm:$0xff] %v4274_v7 }
 0x33a   : > { %1985 = vrot.lane.b32.xlu0 %v1974_v18, %s3341_s21  ;;  %6565 = vst [vmem:[#allocation86_spill] sm:$0xff] %v4258_v3  ;;  %v350_v2 = vmul.f32 %v4293_v32, %v4258_v3 }
 0x33b   : > { %2214 = vrot.lane.b32.xlu1 %v2197_v0, %s3341_s21 }
 0x33e   : > { %2216 = vrot.lane.b32.xlu0 %v2201_v63, %s3341_s21 }
 0x33f   : > { %2218 = vrot.lane.b32.xlu1 %v2205_v21, %s3341_s21 }
 0x342   : > { %2220 = vrot.lane.b32.xlu0 %v2209_v60, %s3341_s21 }
 0x343   : > { %2349 = vrot.lane.b32.xlu1 %v2332_v6, %s3341_s21 }
 0x346   : > { %2351 = vrot.lane.b32.xlu0 %v2336_v19, %s3341_s21 }
 0x347   : > { %2353 = vrot.lane.b32.xlu1 %v2340_v52, %s3341_s21  ;;  %v4261_v52 = vrot.slane %v3283_v54, %v3496_v55  ;;  %v4281_v54 = vrot.slane %v3284_v36, %v3467_v46 }
 0x349   : > { %6566 = vst [vmem:[#allocation87_spill] sm:$0xff] %v4261_v52 }
 0x34a   : > { %2355 = vrot.lane.b32.xlu0 %v2344_v29, %s3341_s21  ;;  %v4265_v29 = vrot.slane %v4021_v20, %v3881_v1 }
 0x34b   : > { %2484 = vrot.lane.b32.xlu1 %v2467_v24, %s3341_s21  ;;  %v4269_v24 = vrot.slane %v4021_v20, %v3939_v12  ;;  %v4291_v20 = vrot.slane %v4028_v22, %v3881_v1  ;;  %v4369_v22 = vrot.slane %v4120_v16, %v4012_v57  ;;  %v4382_v16 = vmul.f32 %v4293_v32, %v4261_v52 }
 0x34c   : > { %6567 = vst [vmem:[#allocation88_spill] sm:$0xff] %v4265_v29 }
 0x34d   : > { %6568 = vst [vmem:[#allocation89_spill] sm:$0xff] %v4269_v24  ;;  %6572 = vst [vmem:[#allocation93_spill] sm:$0xff] %v4291_v20 }
 0x34e   : > { %2486 = vrot.lane.b32.xlu0 %v2471_v26, %s3341_s21  ;;  %6587 = vst [vmem:[#allocation107_spill] sm:$0xff] %v4369_v22 }
 0x34f   : > { %2488 = vrot.lane.b32.xlu1 %v2475_v48, %s3341_s21  ;;  %v4278_v48 = vrot.slane %v4111_v47, %v4012_v57  ;;  %v4296_v47 = vld [vmem:[#allocation2 + $0x28] sm:$0xff] }
 0x350   : > { %6574 = vst [vmem:[#allocation95_spill] sm:$0xff] %v4296_v47 }
 0x351   : > { %6571 = vst [vmem:[#allocation92_spill] sm:$0xff] %v4278_v48  ;;  %v4407_v49 = vmul.f32 %v4293_v32, %v4278_v48 }
 0x352   : > { %2490 = vrot.lane.b32.xlu0 %v2479_v27, %s3341_s21  ;;  %v4284_v27 = vrot.slane %v3284_v36, %v3496_v55  ;;  %v4302_v36 = vrot.slane %v3286_v11, %v3467_v46  ;;  %v4337_v46 = vrot.slane %v202_v62, %v3881_v1 }
 0x353   : > { %1663 = vrot.lane.b32.xlu1 %v1644_v45, %s3339_s18  ;;  %v4287_v45 = vrot.slane %v202_v62, %v3391_v23  ;;  %v4309_v23 = vrot.slane %v4039_v39, %v3881_v1  ;;  %6589 = vst [vmem:[#allocation109_spill] sm:$0xff] %v4407_v49 }
 0x354   : > { %6575 = vst [vmem:[#allocation96_spill] sm:$0xff] %v4302_v36  ;;  %6582 = vst [vmem:[#allocation103_spill] sm:$0xff] %v4337_v46 }
 0x355   : > { %6577 = vst [vmem:[#allocation98_spill] sm:$0xff] %v4309_v23 }
 0x37b   : > { %v4238_v4 = vpop.permute.xlu0 %1645 }
 0x37c   : > { %6557 = vst [vmem:[#allocation78_spill] sm:$0xff] %v4238_v4  ;;  %v4352_v4 = vld [vmem:[#allocation2 + $0x10] sm:$0xff] }
 0x37d   : > { %v4240_v18 = vpop.permute.xlu1 %1647 }
 0x37e   : > { %6558 = vst [vmem:[#allocation79_spill] sm:$0xff] %v4240_v18 }
 0x380   : > { %v4242_v0 = vpop.permute.xlu0 %1649 }
 0x381   : > { %6559 = vst [vmem:[#allocation80_spill] sm:$0xff] %v4242_v0  ;;  %v4244_v63 = vpop.permute.xlu1 %1651 }
 0x382   : > { %6560 = vst [vmem:[#allocation81_spill] sm:$0xff] %v4244_v63  ;;  %v4325_v63 = vrot.slane %v202_v62, %v3441_v37  ;;  %v4342_v37 = vld [vmem:[#allocation2 + $0x30] sm:$0xff]  ;;  %v4355_v62 = vld [vmem:[#allocation2 + $0x38] sm:$0xff] }
 0x383   : > { %6583 = vst [vmem:[#allocation104_spill] sm:$0xff] %v4342_v37  ;;  %v4411_v40 = vmul.f32 %v4342_v37, %v4284_v27  ;;  %v4415_v44 = vmul.f32 %v4342_v37, %v4291_v20 }
 0x384   : > { %v4246_v21 = vpop.permute.xlu0 %1653  ;;  %6579 = vst [vmem:[#allocation100_spill] sm:$0xff] %v4325_v63 }
 0x385   : > { %6561 = vst [vmem:[#allocation82_spill] sm:$0xff] %v4246_v21  ;;  %v4248_v60 = vpop.permute.xlu1 %1655  ;;  %6590 = vst [vmem:[#allocation110_spill] sm:$0xff] %v4411_v40 }
 0x386   : > { %6562 = vst [vmem:[#allocation83_spill] sm:$0xff] %v4248_v60  ;;  %v4313_v60 = vrot.slane %v4039_v39, %v3939_v12  ;;  %v4333_v39 = vrot.slane %v4162_v31, %v3881_v1  ;;  %6591 = vst [vmem:[#allocation111_spill] sm:$0xff] %v4415_v44 }
 0x388   : > { %v4250_v6 = vpop.permute.xlu0 %1657  ;;  %6578 = vst [vmem:[#allocation99_spill] sm:$0xff] %v4313_v60  ;;  %6581 = vst [vmem:[#allocation102_spill] sm:$0xff] %v4333_v39 }
 0x389   : > { %6563 = vst [vmem:[#allocation84_spill] sm:$0xff] %v4250_v6  ;;  %v4252_v19 = vpop.permute.xlu1 %1659  ;;  %v4317_v6 = vrot.slane %v4136_v38, %v4012_v57 }
 0x38a   : > { %6564 = vst [vmem:[#allocation85_spill] sm:$0xff] %v4252_v19 }
 0x38c   : > { %v4271_v26 = vpop.permute.xlu0 %1661 }
 0x38d   : > { %6569 = vst [vmem:[#allocation90_spill] sm:$0xff] %v4271_v26  ;;  %v1710_v28 = vpop.permute.xlu1 %1709 }
 0x38e   : > { %v1725_v26 = vmul.f32 %v4293_v32, %v1710_v28  ;;  %v4299_v19 = vmul.f32 %v4296_v47, %v1710_v28  ;;  %v1735_v58 = vmul.f32 %v4425_v59, %v1710_v28 }
 0x390   : > { %v1712_v10 = vpop.permute.xlu0 %1711  ;;  %v1755_v21 = vrot.slane %v1725_v26, 3  ;;  %v4339_v26 = vld [vmem:[#allocation2 + $0x8] sm:$0xff]  ;;  %v6585_v53 = vrot.slane %v4299_v19, 3 }
 0x391   : > { %v1717_v38 = vsel %vm277_vm2, %v1710_v28, %v1712_v10  ;;  %v1714_v34 = vpop.permute.xlu1 %1713  ;;  %v4447_v28 = vrot.slane %v4128_v56, %v4012_v57 }
 0x392   : > { %v1726_v11 = vmul.f32 %v4339_v26, %v1717_v38  ;;  %v4345_v0 = vmul.f32 %v4342_v37, %v1717_v38  ;;  %v1718_v55 = vsel %vm277_vm2, %v1712_v10, %v1714_v34  ;;  %v1757_v5 = vsel %vm560_vm10, %v1755_v21, %v6585_v53 }
 0x393   : > { %v1727_v1 = vmul.f32 %v4352_v4, %v1718_v55  ;;  %v4358_v18 = vmul.f32 %v4355_v62, %v1718_v55  ;;  %v4365_v10 = vrot.slane %v4162_v31, %v3939_v12  ;;  %1780 = vrot.lane.b32.xlu0 %v1757_v5, %s3339_s18  ;;  %v4384_v31 = vld [vmem:[#allocation2 + $0x18] sm:$0xff]  ;;  %v4387_v5 = vld [vmem:[#allocation2 + $0x20] sm:$0xff]  ;;  %v4403_v53 = vmul.f32 %v4293_v32, %v4269_v24 }
 0x394   : > { %v1758_v17 = vrot.slane %v1726_v11, 3  ;;  %v4373_v50 = vpop.permute.xlu0 %1715  ;;  %v6592_v33 = vrot.slane %v4345_v0, 3  ;;  %v1736_v13 = vmul.f32 %v4428_v30, %v1717_v38  ;;  %6596 = vst [vmem:[#allocation114_spill] sm:$0xff] %v4447_v28  ;;  %v385_v3 = vmul.f32 %v4384_v31, %v4305_v61 }
 0x395   : > { %6586 = vst [vmem:[#allocation106_spill] sm:$0xff] %v4365_v10  ;;  %v1761_v14 = vrot.slane %v1727_v1, 3  ;;  %v1719_v12 = vsel %vm277_vm2, %v1714_v34, %v4373_v50  ;;  %v1729_v11 = vmul.f32 %v4387_v5, %v4373_v50  ;;  %v4395_v1 = vmul.f32 %v4391_v35, %v4373_v50  ;;  %v4432_v22 = vpop.permute.xlu1 %1844 }
 0x396   : > { %v1728_v21 = vmul.f32 %v4384_v31, %v1719_v12  ;;  %v4399_v34 = vmul.f32 %v4293_v32, %v4265_v29  ;;  %v4420_v9 = vmul.f32 %v4417_v42, %v1719_v12  ;;  %v1760_v8 = vsel %vm560_vm10, %v1758_v17, %v6592_v33 }
 0x397   : > { %v1767_v51 = vrot.slane %v1729_v11, 3  ;;  %1782 = vrot.lane.b32.xlu1 %v1760_v8, %s3339_s18  ;;  %v6594_v10 = vrot.slane %v4358_v18, 3  ;;  %v4439_v33 = vadd.f32 %v350_v2, %v4274_v7  ;;  %v4443_v17 = vmul.f32 %v4342_v37, %v4350_v41  ;;  %v4469_v7 = vld [vmem:[#allocation2 + $0x60] sm:$0xf] }
 0x398   : > { %v1764_v38 = vrot.slane %v1728_v21, 3  ;;  %v1765_v57 = vrot.slane %v4420_v9, 3  ;;  %v1772_v21 = vrot.slane %v1736_v13, 3  ;;  %v6597_v8 = vrot.slane %v4395_v1, 3  ;;  %v1847_v28 = vpop.permute.xlu0 %1846 }
 0x399   : > { %v1763_v39 = vsel %vm560_vm10, %v1761_v14, %v6594_v10  ;;  %6595 = vst [vmem:[#allocation113_spill] sm:$0xff] %v4443_v17  ;;  %v353_v10 = vmul.f32 %v4384_v31, %v4302_v36  ;;  %v1770_v14 = vrot.slane %v1735_v58, 3  ;;  %v4466_v2 = vmul.f32 %v4417_v42, %v4305_v61 }
 0x39a   : > { %1784 = vrot.lane.b32.xlu0 %v1763_v39, %s3339_s18  ;;  %v1769_v11 = vsel %vm560_vm10, %v1767_v51, %v6597_v8  ;;  %v1737_v56 = vmul.f32 %v4469_v7, %v1718_v55  ;;  %v1766_v9 = vsel %vm560_vm10, %v1764_v38, %v1765_v57  ;;  %v462_v13 = vmul.f32 %v4384_v31, %v4309_v23  ;;  %v1849_v55 = vpop.permute.xlu1 %1848  ;;  %v4494_v39 = vld [vmem:[#allocation2 + $0x68] sm:$0xf] }
 0x39b   : > { %v4478_v51 = vmul.f32 %v4417_v42, %v4309_v23  ;;  %v4482_v58 = vmul.f32 %v4384_v31, %v4313_v60  ;;  %v4486_v8 = vmul.f32 %v4417_v42, %v4313_v60  ;;  %1786 = vrot.lane.b32.xlu1 %v1766_v9, %s3339_s18  ;;  %v361_v38 = vadd.f32 %v353_v10, %v4325_v63 }
 0x39c   : > { %v4492_v36 = vmul.f32 %v4384_v31, %v4317_v6  ;;  %v1738_v23 = vmul.f32 %v4494_v39, %v1719_v12  ;;  %v1739_v61 = vmul.f32 %v4222_v15, %v4373_v50  ;;  %v1852_v60 = vsel %vm277_vm2, %v4432_v22, %v1847_v28 }
 0x39d   : > { %6598 = vst [vmem:[#allocation115_spill] sm:$0xff] %v4478_v51  ;;  %v6599_v17 = vrot.slane %v4299_v19, 3  ;;  %v1774_v63 = vrot.slane %v1737_v56, 3  ;;  %v1860_v44 = vmul.f32 %v4293_v32, %v4432_v22  ;;  %v4511_v12 = vmul.f32 %v4296_v47, %v4432_v22 }
 0x39e   : > { %1788 = vrot.lane.b32.xlu0 %v1769_v11, %s3339_s18  ;;  %v416_v11 = vrot.slane %v385_v3, 1  ;;  %v6600_v3 = vrot.slane %v4345_v0, 3  ;;  %v4514_v50 = vsel %vm277_vm2, %v1847_v28, %v1849_v55  ;;  %v4519_v19 = vmul.f32 %v4296_v47, %v4261_v52 }
 0x39f   : > { %v1771_v9 = vsel %vm560_vm10, %v6599_v17, %v1770_v14  ;;  %v4523_v0 = vmul.f32 %v4296_v47, %v4265_v29  ;;  %v493_v14 = vrot.slane %v462_v13, 2  ;;  %v4529_v56 = vmul.f32 %v4296_v47, %v4269_v24 }
 0x3a0   : > { %v1773_v10 = vsel %vm560_vm10, %v6600_v3, %v1772_v21  ;;  %1790 = vrot.lane.b32.xlu1 %v1771_v9, %s3339_s18  ;;  %v1861_v28 = vmul.f32 %v4339_v26, %v1852_v60  ;;  %v4533_v21 = vmul.f32 %v4342_v37, %v1852_v60  ;;  %v4535_v3 = vpop.permute.xlu0 %1850  ;;  %v4539_v29 = vmul.f32 %v4296_v47, %v4278_v48 }
 0x3a1   : > { %v1778_v17 = vrot.slane %v1739_v61, 3  ;;  %v1862_v13 = vmul.f32 %v4352_v4, %v4514_v50  ;;  %v4545_v9 = vmul.f32 %v4355_v62, %v4514_v50  ;;  %v1890_v24 = vrot.slane %v1860_v44, 4 }
 0x3a2   : > { %1792 = vrot.lane.b32.xlu0 %v1773_v10, %s3339_s18  ;;  %v1776_v10 = vrot.slane %v1738_v23, 3  ;;  %v6430_v32 = vrot.slane %v4511_v12, 4  ;;  %v6601_v52 = vrot.slane %v4358_v18, 3  ;;  %v6602_v48 = vrot.slane %v4466_v2, 1 }
 0x3a3   : > { %v6429_v47 = vrot.slane %v4478_v51, 2  ;;  %v1854_v15 = vsel %vm277_vm2, %v1849_v55, %v4535_v3  ;;  %v4569_v55 = vmul.f32 %v4391_v35, %v4535_v3 }
 0x3a4   : > { %v1775_v37 = vsel %vm560_vm10, %v6601_v52, %v1774_v63  ;;  %v1777_v23 = vsel %vm560_vm10, %v1765_v57, %v1776_v10  ;;  %v418_v61 = vsel %vm406_vm8, %v416_v11, %v6602_v48  ;;  %v1893_v57 = vrot.slane %v1861_v28, 4 }
 0x3a5   : > { %1794 = vrot.lane.b32.xlu1 %v1775_v37, %s3339_s18  ;;  %v1896_v52 = vrot.slane %v1862_v13, 4  ;;  %v1864_v11 = vmul.f32 %v4387_v5, %v4535_v3  ;;  %v4571_v37 = vpop.permute.xlu1 %2079  ;;  %v1863_v10 = vmul.f32 %v4384_v31, %v1854_v15  ;;  %v6603_v28 = vrot.slane %v4395_v1, 3 }
 0x3a6   : > { %1796 = vrot.lane.b32.xlu0 %v1777_v23, %s3339_s18  ;;  %v4575_v23 = vmul.f32 %v4417_v42, %v1854_v15  ;;  %v1892_v49 = vsel %vm637_vm11, %v1890_v24, %v6430_v32  ;;  %v438_v63 = vadd.f32 %v418_v61, %v361_v38  ;;  %v495_v44 = vsel %vm483_vm9, %v493_v14, %v6429_v47  ;;  %v4607_v47 = vpop.permute.xlu0 %2081 }
 0x3a7   : > { %v1779_v13 = vsel %vm560_vm10, %v6603_v28, %v1778_v17  ;;  %v6604_v1 = vrot.slane %v4519_v19, 1  ;;  %v6605_v17 = vrot.slane %v4382_v16, 1  ;;  %v383_v24 = vmul.f32 %v4339_v26, %v4284_v27 }
 0x3a8   : > { %v384_v38 = vmul.f32 %v4352_v4, %v4329_v43  ;;  %v4601_v61 = vmul.f32 %v4355_v62, %v4329_v43  ;;  %v1870_v14 = vmul.f32 %v4425_v59, %v4432_v22  ;;  %v6608_v48 = vrot.slane %v4545_v9, 4 }
 0x3a9   : > { %1798 = vrot.lane.b32.xlu1 %v1779_v13, %s3339_s18  ;;  %v409_v28 = vsel %vm406_vm8, %v6605_v17, %v6604_v1  ;;  %v1902_v13 = vrot.slane %v1864_v11, 4  ;;  %v6607_v1 = vrot.slane %v4533_v21, 4  ;;  %v1899_v18 = vrot.slane %v1863_v10, 4 }
 0x3aa   : > { %1915 = vrot.lane.b32.xlu0 %v1892_v49, %s3339_s18  ;;  %6606 = vst [vmem:[#allocation116_spill] sm:$0xff] %v4601_v61  ;;  %v1871_v49 = vmul.f32 %v4428_v30, %v1852_v60  ;;  %v1898_v32 = vsel %vm637_vm11, %v1896_v52, %v6608_v48  ;;  %v1900_v35 = vrot.slane %v4575_v23, 4  ;;  %v435_v22 = vadd.f32 %v409_v28, %v4439_v33 }
 0x3ab   : > { %v1895_v17 = vsel %vm637_vm11, %v1893_v57, %v6607_v1  ;;  %v6609_v60 = vrot.slane %v4523_v0, 2  ;;  %v6610_v11 = vrot.slane %v4399_v34, 2  ;;  %v4625_v57 = vmul.f32 %v4417_v42, %v4317_v6  ;;  %v4627_v1 = vpop.permute.xlu1 %2083 }
 0x3ac   : > { %v6611_v33 = vrot.slane %v4529_v56, 3  ;;  %v6612_v52 = vrot.slane %v4403_v53, 3  ;;  %v351_v48 = vmul.f32 %v4339_v26, %v4281_v54  ;;  %v352_v10 = vmul.f32 %v4352_v4, %v4321_v25 }
 0x3ad   : > { %v486_v16 = vsel %vm483_vm9, %v6610_v11, %v6609_v60  ;;  %1917 = vrot.lane.b32.xlu1 %v1895_v17, %s3339_s18  ;;  %v410_v23 = vrot.slane %v383_v24, 1  ;;  %v413_v28 = vrot.slane %v384_v38, 1  ;;  %v6439_v60 = vrot.slane %v4601_v61, 1 }
 0x3ae   : > { %1919 = vrot.lane.b32.xlu0 %v1898_v32, %s3339_s18  ;;  %v4636_v34 = vsel %vm560_vm10, %v6612_v52, %v6611_v33  ;;  %v1905_v17 = vrot.slane %v1870_v14, 4  ;;  %v1872_v32 = vmul.f32 %v4469_v7, %v4514_v50  ;;  %v1907_v11 = vrot.slane %v1871_v49, 4  ;;  %v4654_v14 = vpop.permute.xlu0 %2085 }
 0x3af   : > { %v1873_v53 = vmul.f32 %v4494_v39, %v1854_v15  ;;  %v1901_v33 = vsel %vm637_vm11, %v1899_v18, %v1900_v35  ;;  %v6613_v52 = vrot.slane %v4569_v55, 4  ;;  %v515_v51 = vadd.f32 %v495_v44, %v438_v63  ;;  %v6614_v18 = vld [vmem:[#allocation102_spill] sm:$0xff] }
 0x3b0   : > { %v647_v30 = vrot.slane %v4492_v36, 4  ;;  %v460_v38 = vmul.f32 %v4339_v26, %v4291_v20  ;;  %v359_v15 = vadd.f32 %v351_v48, %v4287_v45  ;;  %v360_v50 = vadd.f32 %v352_v10, %v4337_v46  ;;  %v4674_v10 = vpop.permute.xlu1 %1979 }
 0x3b1   : > { %v1904_v43 = vsel %vm637_vm11, %v1902_v13, %v6613_v52  ;;  %1921 = vrot.lane.b32.xlu1 %v1901_v33, %s3339_s18  ;;  %v461_v44 = vmul.f32 %v4352_v4, %v6614_v18  ;;  %v4664_v36 = vmul.f32 %v4355_v62, %v6614_v18  ;;  %v6616_v63 = vrot.slane %v4411_v40, 1  ;;  %v6617_v33 = vld [vmem:[#allocation77_spill] sm:$0xff]  ;;  %v6623_v40 = vld [vmem:[#allocation106_spill] sm:$0xff] }
 0x3b2   : > { %1923 = vrot.lane.b32.xlu0 %v1904_v43, %s3339_s18  ;;  %v415_v43 = vsel %vm406_vm8, %v413_v28, %v6439_v60  ;;  %v537_v13 = vmul.f32 %v4339_v26, %v4350_v41  ;;  %v1909_v48 = vrot.slane %v1872_v32, 4  ;;  %v1874_v52 = vmul.f32 %v6617_v33, %v4535_v3  ;;  %v6621_v60 = vld [vmem:[#allocation109_spill] sm:$0xff] }
 0x3b3   : > { %6615 = vst [vmem:[#allocation117_spill] sm:$0xff] %v4664_v36  ;;  %v412_v49 = vsel %vm406_vm8, %v410_v23, %v6616_v63  ;;  %v6618_v24 = vrot.slane %v4511_v12, 4  ;;  %v6619_v18 = vrot.slane %v4533_v21, 4  ;;  %v1911_v63 = vrot.slane %v1873_v53, 4 }
 0x3b4   : > { %v6620_v28 = vrot.slane %v4539_v29, 4  ;;  %v6622_v61 = vrot.slane %v6621_v60, 4  ;;  %v487_v41 = vrot.slane %v460_v38, 2  ;;  %v538_v3 = vmul.f32 %v4352_v4, %v6623_v40 }
 0x3b5   : > { %v1906_v46 = vsel %vm637_vm11, %v6618_v24, %v1905_v17  ;;  %v1908_v23 = vsel %vm637_vm11, %v6619_v18, %v1907_v11  ;;  %v4695_v12 = vmul.f32 %v4355_v62, %v6623_v40  ;;  %v6625_v21 = vrot.slane %v4486_v8, 3 }
 0x3b6   : > { %v4689_v32 = vsel %vm637_vm11, %v6622_v61, %v6620_v28  ;;  %1925 = vrot.lane.b32.xlu1 %v1906_v46, %s3339_s18  ;;  %1927 = vrot.lane.b32.xlu0 %v1908_v23, %s3339_s18  ;;  %v6626_v17 = vrot.slane %v4482_v58, 3  ;;  %v436_v61 = vadd.f32 %v412_v49, %v359_v15  ;;  %v490_v11 = vrot.slane %v461_v44, 2  ;;  %v1982_v46 = vpop.permute.xlu0 %1981  ;;  %v6629_v15 = vld [vmem:[#allocation111_spill] sm:$0xff] }
 0x3b7   : > { %6624 = vst [vmem:[#allocation109_spill] sm:$0xff] %v4695_v12  ;;  %v6445_v53 = vrot.slane %v4664_v36, 2  ;;  %v512_v24 = vadd.f32 %v486_v16, %v435_v22  ;;  %v6627_v18 = vrot.slane %v4625_v57, 4  ;;  %v437_v33 = vadd.f32 %v415_v43, %v360_v50  ;;  %v6631_v22 = vld [vmem:[#allocation107_spill] sm:$0xff]  ;;  %v1984_v50 = vpop.permute.xlu1 %1983 }
 0x3b8   : > { %v572_v60 = vsel %vm560_vm10, %v6626_v17, %v6625_v21  ;;  %v564_v40 = vrot.slane %v537_v13, 3  ;;  %v1913_v23 = vrot.slane %v1874_v52, 4  ;;  %v6628_v20 = vrot.slane %v4545_v9, 4  ;;  %v6632_v9 = vld [vmem:[#allocation104_spill] sm:$0xff]  ;;  %v6634_v52 = vld [vmem:[#allocation114_spill] sm:$0xff] }
 0x3b9   : > { %v592_v38 = vadd.f32 %v572_v60, %v515_v51  ;;  %v649_v28 = vsel %vm637_vm11, %v647_v30, %v6627_v18  ;;  %v1912_v21 = vsel %vm637_vm11, %v1900_v35, %v1911_v63  ;;  %v6630_v44 = vrot.slane %v6629_v15, 2  ;;  %v6635_v17 = vld [vmem:[#allocation94_spill] sm:$0xff] }
 0x3ba   : > { %v1910_v58 = vsel %vm637_vm11, %v6628_v20, %v1909_v48  ;;  %v567_v16 = vrot.slane %v538_v3, 3  ;;  %v6447_v51 = vrot.slane %v4695_v12, 3  ;;  %v614_v30 = vmul.f32 %v4339_v26, %v6631_v22  ;;  %1931 = vrot.lane.b32.xlu0 %v1912_v21, %s3339_s18 }
 0x3bb   : > { %v489_v49 = vsel %vm483_vm9, %v487_v41, %v6630_v44  ;;  %1929 = vrot.lane.b32.xlu1 %v1910_v58, %s3339_s18  ;;  %v492_v20 = vsel %vm483_vm9, %v490_v11, %v6445_v53  ;;  %v4725_v43 = vmul.f32 %v6632_v9, %v6631_v22  ;;  %v6633_v41 = vld [vmem:[#allocation87_spill] sm:$0xff]  ;;  %v615_v63 = vmul.f32 %v4352_v4, %v6634_v52  ;;  %v6636_v11 = vld [vmem:[#allocation113_spill] sm:$0xff] }
 0x3bc   : > { %v513_v35 = vadd.f32 %v489_v49, %v436_v61  ;;  %v390_v13 = vmul.f32 %v4425_v59, %v6633_v41  ;;  %v514_v48 = vadd.f32 %v492_v20, %v437_v33  ;;  %v4733_v3 = vmul.f32 %v4355_v62, %v6634_v52  ;;  %v6639_v41 = vld [vmem:[#allocation86_spill] sm:$0xff]  ;;  %v6640_v53 = vld [vmem:[#allocation95_spill] sm:$0xff]  ;;  %v6641_v52 = vld [vmem:[#allocation88_spill] sm:$0xff] }
 0x3bd   : > { %v1995_v60 = vmul.f32 %v6635_v17, %v4674_v10  ;;  %v6637_v61 = vrot.slane %v6636_v11, 3  ;;  %v1987_v58 = vsel %vm754_vm12, %v4674_v10, %v1982_v46  ;;  %v4743_v21 = vsel %vm754_vm12, %v1982_v46, %v1984_v50 }
 0x3be   : > { %v6638_v33 = vrot.slane %v4569_v55, 4  ;;  %v569_v49 = vsel %vm560_vm10, %v567_v16, %v6447_v51  ;;  %v641_v20 = vrot.slane %v614_v30, 4  ;;  %v354_v11 = vmul.f32 %v6640_v53, %v6639_v41  ;;  %v6643_v16 = vld [vmem:[#allocation92_spill] sm:$0xff] }
 0x3bf   : > { %v566_v18 = vsel %vm560_vm10, %v564_v40, %v6637_v61  ;;  %v467_v40 = vmul.f32 %v4425_v59, %v6641_v52  ;;  %v4755_v61 = vpop.permute.xlu0 %1985  ;;  %2015 = vrot.lane.b32.xlu0 %v1995_v60, %s3340_s27  ;;  %v6451_v55 = vrot.slane %v4725_v43, 4  ;;  %v419_v46 = vrot.slane %v390_v13, 1  ;;  %v6645_v41 = vld [vmem:[#allocation96_spill] sm:$0xff] }
 0x3c0   : > { %v1914_v44 = vsel %vm637_vm11, %v6638_v33, %v1913_v23  ;;  %v6642_v23 = vld [vmem:[#allocation89_spill] sm:$0xff]  ;;  %v621_v30 = vmul.f32 %v4425_v59, %v6643_v16  ;;  %v644_v51 = vrot.slane %v615_v63, 4  ;;  %v1996_v52 = vmul.f32 %v4339_v26, %v1987_v58  ;;  %v6644_v16 = vld [vmem:[#allocation91_spill] sm:$0xff] }
 0x3c1   : > { %1933 = vrot.lane.b32.xlu1 %v1914_v44, %s3339_s18  ;;  %v544_v33 = vmul.f32 %v4425_v59, %v6642_v23  ;;  %v1997_v12 = vmul.f32 %v4352_v4, %v4743_v21  ;;  %v589_v44 = vadd.f32 %v4636_v34, %v512_v24  ;;  %v590_v60 = vadd.f32 %v566_v18, %v513_v35 }
 0x3c2   : > { %v591_v36 = vadd.f32 %v569_v49, %v514_v48  ;;  %v1989_v13 = vsel %vm754_vm12, %v1984_v50, %v4755_v61  ;;  %v643_v23 = vsel %vm637_vm11, %v641_v20, %v6451_v55  ;;  %v362_v63 = vadd.f32 %v354_v11, %v6644_v16  ;;  %v6647_v48 = vld [vmem:[#allocation97_spill] sm:$0xff]  ;;  %v6649_v20 = vld [vmem:[#allocation98_spill] sm:$0xff] }
 0x3c3   : > { %v496_v22 = vrot.slane %v467_v40, 2  ;;  %v357_v15 = vmul.f32 %v4417_v42, %v6645_v41  ;;  %2019 = vrot.lane.b32.xlu0 %v1997_v12, %s3340_s27  ;;  %v6646_v34 = vrot.slane %v4519_v19, 1  ;;  %v573_v35 = vrot.slane %v544_v33, 3 }
 0x3c4   : > { %v650_v50 = vrot.slane %v621_v30, 4  ;;  %v393_v18 = vmul.f32 %v4494_v39, %v6647_v48  ;;  %v6648_v49 = vrot.slane %v4733_v3, 4  ;;  %v470_v40 = vmul.f32 %v4494_v39, %v6649_v20 }
 0x3c5   : > { %2017 = vrot.lane.b32.xlu1 %v1996_v52, %s3340_s27  ;;  %v420_v24 = vsel %vm406_vm8, %v6646_v34, %v419_v46  ;;  %v1998_v41 = vmul.f32 %v4384_v31, %v1989_v13  ;;  %v1999_v12 = vmul.f32 %v4387_v5, %v4755_v61  ;;  %v4793_v19 = vadd.f32 %v4689_v32, %v589_v44  ;;  %v6651_v34 = vld [vmem:[#allocation100_spill] sm:$0xff] }
 0x3c6   : > { %v646_v11 = vsel %vm637_vm11, %v644_v51, %v6648_v49  ;;  %v4795_v46 = vadd.f32 %v649_v28, %v592_v38  ;;  %v4797_v33 = vadd.f32 %v643_v23, %v590_v60  ;;  %v439_v52 = vadd.f32 %v420_v24, %v362_v63  ;;  %v6654_v60 = vld [vmem:[#allocation99_spill] sm:$0xff]  ;;  %v6656_v49 = vld [vmem:[#allocation112_spill] sm:$0xff] }
 0x3c7   : > { %v4799_v30 = vadd.f32 %v646_v11, %v591_v36  ;;  %v6650_v51 = vrot.slane %v4523_v0, 2  ;;  %v365_v48 = vadd.f32 %v357_v15, %v6651_v34  ;;  %2023 = vrot.lane.b32.xlu0 %v1999_v12, %s3340_s27  ;;  %v6652_v32 = vrot.slane %v4529_v56, 3 }
 0x3c8   : > { %v6653_v28 = vrot.slane %v4539_v29, 4  ;;  %v425_v44 = vrot.slane %v393_v18, 1  ;;  %v547_v0 = vmul.f32 %v4494_v39, %v6654_v60  ;;  %v2087_v15 = vsel %vm754_vm12, %v4571_v37, %v4607_v47 }
 0x3c9   : > { %v497_v16 = vsel %vm483_vm9, %v6650_v51, %v496_v22  ;;  %2021 = vrot.lane.b32.xlu1 %v1998_v41, %s3340_s27  ;;  %v574_v38 = vsel %vm560_vm10, %v6652_v32, %v573_v35  ;;  %v502_v22 = vrot.slane %v470_v40, 2  ;;  %v2000_v23 = vmul.f32 %v6640_v53, %v4674_v10 }
 0x3ca   : > { %v4813_v36 = vsel %vm637_vm11, %v6653_v28, %v650_v50  ;;  %v2001_v56 = vmul.f32 %v6632_v9, %v1987_v58  ;;  %v355_v29 = vmul.f32 %v6632_v9, %v4281_v54  ;;  %v2095_v63 = vmul.f32 %v6635_v17, %v4571_v37 }
 0x3cb   : > { %v4829_v24 = vmul.f32 %v6640_v53, %v4571_v37  ;;  %v4834_v35 = vsel %vm754_vm12, %v4607_v47, %v4627_v1  ;;  %v516_v50 = vadd.f32 %v497_v16, %v439_v52  ;;  %v624_v10 = vmul.f32 %v4494_v39, %v4317_v6  ;;  %v6657_v6 = vld [vmem:[#allocation115_spill] sm:$0xff] }
 0x3cc   : > { %v356_v58 = vmul.f32 %v4355_v62, %v4321_v25  ;;  %2027 = vrot.lane.b32.xlu0 %v2001_v56, %s3340_s27  ;;  %v6655_v54 = vrot.slane %v4466_v2, 1  ;;  %v391_v11 = vmul.f32 %v6656_v49, %v4284_v27  ;;  %v2096_v47 = vmul.f32 %v4339_v26, %v2087_v15 }
 0x3cd   : > { %2025 = vrot.lane.b32.xlu1 %v2000_v23, %s3340_s27  ;;  %v4849_v20 = vmul.f32 %v6632_v9, %v2087_v15  ;;  %v6658_v40 = vrot.slane %v6657_v6, 2  ;;  %v2097_v41 = vmul.f32 %v4352_v4, %v4834_v35  ;;  %v2002_v2 = vmul.f32 %v4355_v62, %v4743_v21  ;;  %v6659_v21 = vld [vmem:[#allocation101_spill] sm:$0xff] }
 0x3ce   : > { %v426_v18 = vsel %vm406_vm8, %v6655_v54, %v425_v44  ;;  %v2003_v12 = vmul.f32 %v4417_v42, %v1989_v13  ;;  %v363_v52 = vadd.f32 %v355_v29, %v4287_v45  ;;  %v2125_v27 = vrot.slane %v2095_v63, 1  ;;  %v6662_v6 = vld [vmem:[#allocation93_spill] sm:$0xff] }
 0x3cf   : > { %v503_v25 = vsel %vm483_vm9, %v6658_v40, %v502_v22  ;;  %v2126_v51 = vrot.slane %v4829_v24, 1  ;;  %v4863_v16 = vmul.f32 %v4355_v62, %v4834_v35  ;;  %v593_v34 = vadd.f32 %v574_v38, %v516_v50  ;;  %v6660_v38 = vld [vmem:[#allocation108_spill] sm:$0xff]  ;;  %v6663_v40 = vld [vmem:[#allocation110_spill] sm:$0xff] }
 0x3d0   : > { %v442_v32 = vadd.f32 %v426_v18, %v365_v48  ;;  %v579_v28 = vrot.slane %v547_v0, 3  ;;  %v2089_v44 = vsel %vm754_vm12, %v4627_v1, %v4654_v14  ;;  %2031 = vrot.lane.b32.xlu0 %v2003_v12, %s3340_s27  ;;  %v392_v45 = vmul.f32 %v4469_v7, %v6659_v21  ;;  %v6665_v21 = vld [vmem:[#allocation102_spill] sm:$0xff] }
 0x3d1   : > { %2029 = vrot.lane.b32.xlu1 %v2002_v2, %s3340_s27  ;;  %v421_v13 = vrot.slane %v391_v11, 1  ;;  %v2128_v60 = vrot.slane %v2096_v47, 1  ;;  %v2129_v22 = vrot.slane %v4849_v20, 1  ;;  %v2131_v23 = vrot.slane %v2097_v41, 1 }
 0x3d2   : > { %v2099_v48 = vmul.f32 %v4387_v5, %v4654_v14  ;;  %v4877_v0 = vmul.f32 %v6660_v38, %v4654_v14  ;;  %v2004_v1 = vmul.f32 %v6660_v38, %v4755_v61  ;;  %v2132_v56 = vrot.slane %v4863_v16, 1 }
 0x3d3   : > { %v2098_v29 = vmul.f32 %v4384_v31, %v2089_v44  ;;  %v4884_v63 = vmul.f32 %v4417_v42, %v2089_v44  ;;  %v2127_v50 = vsel %vm406_vm8, %v2125_v27, %v2126_v51  ;;  %v519_v54 = vadd.f32 %v503_v25, %v442_v32  ;;  %v6666_v27 = vld [vmem:[#allocation105_spill] sm:$0xff] }
 0x3d4   : > { %v6661_v18 = vrot.slane %v4486_v8, 3  ;;  %v656_v47 = vrot.slane %v624_v10, 4  ;;  %v468_v61 = vmul.f32 %v6656_v49, %v6662_v6  ;;  %2150 = vrot.lane.b32.xlu0 %v2127_v50, %s3340_s27  ;;  %v6664_v41 = vrot.slane %v6663_v40, 1  ;;  %v4907_v50 = vpop.permute.xlu1 %2214 }
 0x3d5   : > { %2033 = vrot.lane.b32.xlu1 %v2004_v1, %s3340_s27  ;;  %v423_v12 = vrot.slane %v392_v45, 1  ;;  %v469_v25 = vmul.f32 %v4469_v7, %v6665_v21  ;;  %v545_v8 = vmul.f32 %v6656_v49, %v6666_v27  ;;  %v2105_v10 = vmul.f32 %v4425_v59, %v4571_v37  ;;  %v6669_v21 = vld [vmem:[#allocation106_spill] sm:$0xff] }
 0x3d6   : > { %v580_v11 = vsel %vm560_vm10, %v6661_v18, %v579_v28  ;;  %v422_v2 = vsel %vm406_vm8, %v6664_v41, %v421_v13  ;;  %v2106_v32 = vmul.f32 %v6656_v49, %v2087_v15  ;;  %v2137_v28 = vrot.slane %v2099_v48, 1  ;;  %v6668_v48 = vld [vmem:[#allocation103_spill] sm:$0xff] }
 0x3d7   : > { %v2138_v1 = vrot.slane %v4877_v0, 1  ;;  %v2130_v45 = vsel %vm406_vm8, %v2128_v60, %v2129_v22  ;;  %v2133_v13 = vsel %vm406_vm8, %v2131_v23, %v2132_v56  ;;  %v2134_v18 = vrot.slane %v2098_v29, 1  ;;  %v6670_v60 = vld [vmem:[#allocation116_spill] sm:$0xff]  ;;  %v6689_v0 = vld [vmem:[#allocation10_spill] sm:$0xff] }
 0x3d8   : > { %v2135_v6 = vrot.slane %v4884_v63, 1  ;;  %v6667_v37 = vrot.slane %v4625_v57, 4  ;;  %v364_v40 = vadd.f32 %v356_v58, %v6668_v48  ;;  %v498_v41 = vrot.slane %v468_v61, 2  ;;  %2154 = vrot.lane.b32.xlu0 %v2133_v13, %s3340_s27 }
 0x3d9   : > { %v546_v27 = vmul.f32 %v4469_v7, %v6669_v21  ;;  %2152 = vrot.lane.b32.xlu1 %v2130_v45, %s3340_s27  ;;  %v6671_v55 = vrot.slane %v6670_v60, 1  ;;  %v440_v29 = vadd.f32 %v422_v2, %v363_v52  ;;  %v500_v63 = vrot.slane %v469_v25, 2  ;;  %v2217_v21 = vpop.permute.xlu0 %2216  ;;  %v6672_v2 = vld [vmem:[#allocation111_spill] sm:$0xff] }
 0x3da   : > { %v657_v15 = vsel %vm637_vm11, %v6667_v37, %v656_v47  ;;  %v2107_v57 = vmul.f32 %v4469_v7, %v4834_v35  ;;  %v4930_v47 = vadd.f32 %v4813_v36, %v593_v34  ;;  %v596_v58 = vadd.f32 %v580_v11, %v519_v54  ;;  %v6674_v34 = vld [vmem:[#allocation107_spill] sm:$0xff]  ;;  %v2219_v11 = vpop.permute.xlu1 %2218 }
 0x3db   : > { %v424_v23 = vsel %vm406_vm8, %v6671_v55, %v423_v12  ;;  %v575_v61 = vrot.slane %v545_v8, 3  ;;  %v2140_v37 = vrot.slane %v2105_v10, 1  ;;  %v2142_v48 = vrot.slane %v2106_v32, 1  ;;  %v6677_v32 = vld [vmem:[#allocation114_spill] sm:$0xff] }
 0x3dc   : > { %v2108_v45 = vmul.f32 %v4494_v39, %v2089_v44  ;;  %v2136_v13 = vsel %vm406_vm8, %v2134_v18, %v2135_v6  ;;  %v2139_v55 = vsel %vm406_vm8, %v2137_v28, %v2138_v1  ;;  %v441_v52 = vadd.f32 %v424_v23, %v364_v40  ;;  %v6675_v44 = vld [vmem:[#allocation117_spill] sm:$0xff] }
 0x3dd   : > { %v6673_v12 = vrot.slane %v6672_v2, 2  ;;  %v577_v36 = vrot.slane %v546_v27, 3  ;;  %v622_v54 = vmul.f32 %v6656_v49, %v6674_v34  ;;  %2156 = vrot.lane.b32.xlu1 %v2136_v13, %s3340_s27  ;;  %2158 = vrot.lane.b32.xlu0 %v2139_v55, %s3340_s27  ;;  %v6676_v25 = vrot.slane %v6675_v44, 2  ;;  %v6678_v40 = vld [vmem:[#allocation77_spill] sm:$0xff] }
 0x3de   : > { %v623_v28 = vmul.f32 %v4469_v7, %v6677_v32  ;;  %v2144_v18 = vrot.slane %v2107_v57, 1  ;;  %v2230_v27 = vmul.f32 %v6635_v17, %v4907_v50  ;;  %v4955_v60 = vmul.f32 %v6640_v53, %v4907_v50  ;;  %v6679_v2 = vld [vmem:[#allocation113_spill] sm:$0xff] }
 0x3df   : > { %v499_v35 = vsel %vm483_vm9, %v6673_v12, %v498_v41  ;;  %v501_v8 = vsel %vm483_vm9, %v6676_v25, %v500_v63  ;;  %v2109_v41 = vmul.f32 %v6678_v40, %v4654_v14  ;;  %v2222_v23 = vsel %vm754_vm12, %v4907_v50, %v2217_v21 }
 0x3e0   : > { %v517_v10 = vadd.f32 %v499_v35, %v440_v29  ;;  %v4960_v63 = vsel %vm754_vm12, %v2217_v21, %v2219_v11  ;;  %v2141_v29 = vsel %vm406_vm8, %v2126_v51, %v2140_v37  ;;  %v2143_v14 = vsel %vm406_vm8, %v2129_v22, %v2142_v48  ;;  %v4979_v22 = vpop.permute.xlu0 %2220 }
 0x3e1   : > { %v2146_v57 = vrot.slane %v2108_v45, 1  ;;  %v4968_v13 = vadd.f32 %v657_v15, %v596_v58  ;;  %v518_v55 = vadd.f32 %v501_v8, %v441_v52  ;;  %v6680_v12 = vrot.slane %v6679_v2, 3  ;;  %2160 = vrot.lane.b32.xlu1 %v2141_v29, %s3340_s27  ;;  %2162 = vrot.lane.b32.xlu0 %v2143_v14, %s3340_s27  ;;  %v6681_v15 = vld [vmem:[#allocation109_spill] sm:$0xff]  ;;  %v6686_v2 = vld [vmem:[#allocation6_spill] sm:$0xff] }
 0x3e2   : > { %v652_v34 = vrot.slane %v622_v54, 4  ;;  %v654_v21 = vrot.slane %v623_v28, 4  ;;  %v2231_v51 = vmul.f32 %v4339_v26, %v2222_v23  ;;  %v4977_v20 = vmul.f32 %v6632_v9, %v2222_v23 }
 0x3e3   : > { %v576_v35 = vsel %vm560_vm10, %v6680_v12, %v575_v61  ;;  %v6682_v58 = vrot.slane %v6681_v15, 3  ;;  %v2148_v48 = vrot.slane %v2109_v41, 1  ;;  %v2232_v61 = vmul.f32 %v4352_v4, %v4960_v63  ;;  %v6691_v15 = vld [vmem:[#allocation11_spill] sm:$0xff] }
 0x3e4   : > { %v594_v24 = vadd.f32 %v576_v35, %v517_v10  ;;  %v4988_v45 = vmul.f32 %v4355_v62, %v4960_v63  ;;  %v2260_v52 = vrot.slane %v2230_v27, 2  ;;  %v2261_v54 = vrot.slane %v4955_v60, 2  ;;  %v6687_v35 = vld [vmem:[#allocation8_spill] sm:$0xff] }
 0x3e5   : > { %v578_v37 = vsel %vm560_vm10, %v6682_v58, %v577_v36  ;;  %v2145_v44 = vsel %vm406_vm8, %v2132_v56, %v2144_v18  ;;  %v2147_v25 = vsel %vm406_vm8, %v2135_v6, %v2146_v57  ;;  %v6683_v36 = vrot.slane %v4725_v43, 4 }
 0x3e6   : > { %v595_v8 = vadd.f32 %v578_v37, %v518_v55  ;;  %v2224_v32 = vsel %vm754_vm12, %v2219_v11, %v4979_v22  ;;  %2164 = vrot.lane.b32.xlu1 %v2145_v44, %s3340_s27  ;;  %2166 = vrot.lane.b32.xlu0 %v2147_v25, %s3340_s27  ;;  %v6684_v28 = vrot.slane %v4733_v3, 4  ;;  %v2263_v56 = vrot.slane %v2231_v51, 2  ;;  %v6685_v55 = vld [vmem:[#allocation7_spill] sm:$0xff]  ;;  %v6692_v37 = vld [vmem:[#allocation13_spill] sm:$0xff] }
 0x3e7   : > { %v653_v10 = vsel %vm637_vm11, %v6683_v36, %v652_v34  ;;  %v2264_v6 = vrot.slane %v4977_v20, 2  ;;  %v2266_v18 = vrot.slane %v2232_v61, 2  ;;  %v2267_v43 = vrot.slane %v4988_v45, 2  ;;  %v6688_v34 = vld [vmem:[#allocation9_spill] sm:$0xff]  ;;  %v6690_v20 = vld [vmem:[#allocation12_spill] sm:$0xff]  ;;  %v5047_v36 = vpop.permute.xlu1 %2349 }
 0x3e8   : > { %v655_v16 = vsel %vm637_vm11, %v6684_v28, %v654_v21  ;;  %v671_v41 = vadd.f32 %v653_v10, %v594_v24  ;;  %v2234_v27 = vmul.f32 %v4387_v5, %v4979_v22  ;;  %v5011_v11 = vmul.f32 %v6660_v38, %v4979_v22 }
 0x3e9   : > { %v2233_v29 = vmul.f32 %v4384_v31, %v2224_v32  ;;  %v5015_v3 = vmul.f32 %v4417_v42, %v2224_v32  ;;  %v2149_v14 = vsel %vm406_vm8, %v2138_v1, %v2148_v48  ;;  %v2262_v57 = vsel %vm483_vm9, %v2260_v52, %v2261_v54  ;;  %v6693_v48 = vld [vmem:[#allocation14_spill] sm:$0xff] }
 0x3ea   : > { %v755_v12 = vsel %vm754_vm12, %v6686_v2, %v6685_v55  ;;  %v758_v24 = vsel %vm754_vm12, %v6688_v34, %v6687_v35  ;;  %v672_v21 = vadd.f32 %v655_v16, %v595_v8  ;;  %2168 = vrot.lane.b32.xlu1 %v2149_v14, %s3340_s27  ;;  %2285 = vrot.lane.b32.xlu0 %v2262_v57, %s3340_s27  ;;  %v2272_v25 = vrot.slane %v2234_v27, 2 }
 0x3eb   : > { %v756_v1 = vsel %vm754_vm12, %v6685_v55, %v6689_v0  ;;  %v757_v51 = vsel %vm754_vm12, %v6689_v0, %v6688_v34  ;;  %v759_v58 = vsel %vm754_vm12, %v6691_v15, %v6690_v20  ;;  %v762_v61 = vsel %vm754_vm12, %v6693_v48, %v6692_v37  ;;  %v2352_v34 = vpop.permute.xlu0 %2351  ;;  %v6699_v15 = vld [vmem:[#allocation17_spill] sm:$0xff]  ;;  %v6700_v37 = vld [vmem:[#allocation31_spill] sm:$0xff] }
 0x3ec   : > { %v2240_v52 = vmul.f32 %v4425_v59, %v4907_v50  ;;  %v2241_v44 = vmul.f32 %v6656_v49, %v2222_v23  ;;  %v2273_v8 = vrot.slane %v5011_v11, 2  ;;  %v2265_v10 = vsel %vm483_vm9, %v2263_v56, %v2264_v6  ;;  %v6694_v56 = vld [vmem:[#allocation15_spill] sm:$0xff]  ;;  %v6710_v11 = vld [vmem:[#allocation37_spill] sm:$0xff] }
 0x3ed   : > { %v2268_v28 = vsel %vm483_vm9, %v2266_v18, %v2267_v43  ;;  %v2269_v16 = vrot.slane %v2233_v29, 2  ;;  %v2270_v14 = vrot.slane %v5015_v3, 2  ;;  %v771_v57 = vadd.f32 %v755_v12, %v4793_v19  ;;  %v6695_v29 = vld [vmem:[#allocation29_spill] sm:$0xff]  ;;  %v6696_v3 = vld [vmem:[#allocation16_spill] sm:$0xff] }
 0x3ee   : > { %v774_v50 = vadd.f32 %v758_v24, %v4795_v46  ;;  %v772_v23 = vadd.f32 %v756_v1, %v4797_v33  ;;  %2287 = vrot.lane.b32.xlu1 %v2265_v10, %s3340_s27  ;;  %2289 = vrot.lane.b32.xlu0 %v2268_v28, %s3340_s27  ;;  %v773_v27 = vadd.f32 %v757_v51, %v4799_v30  ;;  %v2275_v30 = vrot.slane %v2240_v52, 2  ;;  %v2354_v51 = vpop.permute.xlu1 %2353 }
 0x3ef   : > { %v760_v55 = vsel %vm754_vm12, %v6690_v20, %v6694_v56  ;;  %v761_v18 = vsel %vm754_vm12, %v6694_v56, %v6693_v48  ;;  %v2242_v19 = vmul.f32 %v4469_v7, %v4960_v63  ;;  %v775_v46 = vadd.f32 %v759_v58, %v4930_v47  ;;  %v6697_v47 = vld [vmem:[#allocation28_spill] sm:$0xff]  ;;  %v6698_v20 = vld [vmem:[#allocation30_spill] sm:$0xff]  ;;  %v6702_v56 = vld [vmem:[#allocation19_spill] sm:$0xff] }
 0x3f0   : > { %v778_v33 = vadd.f32 %v762_v61, %v4968_v13  ;;  %v890_v2 = vsel %vm754_vm12, %v6696_v3, %v6695_v29  ;;  %v2277_v12 = vrot.slane %v2241_v44, 2  ;;  %v2243_v35 = vmul.f32 %v4494_v39, %v2224_v32 }
 0x3f1   : > { %v2271_v24 = vsel %vm483_vm9, %v2269_v16, %v2270_v14  ;;  %v2274_v0 = vsel %vm483_vm9, %v2272_v25, %v2273_v8  ;;  %v776_v63 = vadd.f32 %v760_v55, %v671_v41  ;;  %v5078_v1 = vadd.f32 %v761_v18, %v672_v21  ;;  %v6703_v55 = vld [vmem:[#allocation32_spill] sm:$0xff]  ;;  %v6704_v18 = vld [vmem:[#allocation33_spill] sm:$0xff] }
 0x3f2   : > { %v891_v13 = vsel %vm754_vm12, %v6695_v29, %v6697_v47  ;;  %2291 = vrot.lane.b32.xlu1 %v2271_v24, %s3340_s27  ;;  %2293 = vrot.lane.b32.xlu0 %v2274_v0, %s3340_s27  ;;  %v5085_v32 = vadd.f32 %v890_v2, %v771_v57  ;;  %v894_v58 = vsel %vm754_vm12, %v6699_v15, %v6698_v20  ;;  %v2279_v21 = vrot.slane %v2242_v19, 2  ;;  %v6709_v15 = vld [vmem:[#allocation21_spill] sm:$0xff] }
 0x3f3   : > { %v892_v41 = vsel %vm754_vm12, %v6697_v47, %v6700_v37  ;;  %v2244_v48 = vmul.f32 %v6678_v40, %v4979_v22  ;;  %v2365_v61 = vmul.f32 %v6635_v17, %v5047_v36  ;;  %v5099_v52 = vmul.f32 %v6640_v53, %v5047_v36  ;;  %v6701_v17 = vld [vmem:[#allocation18_spill] sm:$0xff] }
 0x3f4   : > { %v2357_v44 = vsel %vm754_vm12, %v5047_v36, %v2352_v34  ;;  %v5104_v25 = vsel %vm754_vm12, %v2352_v34, %v2354_v51  ;;  %v2276_v10 = vsel %vm483_vm9, %v2261_v54, %v2275_v30  ;;  %v2278_v28 = vsel %vm483_vm9, %v2264_v6, %v2277_v12 }
 0x3f5   : > { %v2281_v40 = vrot.slane %v2243_v35, 2  ;;  %v907_v22 = vadd.f32 %v891_v13, %v772_v23  ;;  %v910_v16 = vadd.f32 %v894_v58, %v775_v46  ;;  %v893_v53 = vsel %vm754_vm12, %v6700_v37, %v6701_v17  ;;  %v5122_v23 = vpop.permute.xlu0 %2355  ;;  %v6705_v13 = vld [vmem:[#allocation35_spill] sm:$0xff]  ;;  %v5172_v58 = vpop.permute.xlu1 %2484  ;;  %v6711_v37 = vld [vmem:[#allocation22_spill] sm:$0xff] }
 0x3f6   : > { %2295 = vrot.lane.b32.xlu1 %v2276_v10, %s3340_s27  ;;  %2297 = vrot.lane.b32.xlu0 %v2278_v28, %s3340_s27  ;;  %v908_v57 = vadd.f32 %v892_v41, %v773_v27  ;;  %v897_v60 = vsel %vm754_vm12, %v6703_v55, %v6702_v56  ;;  %v2366_v54 = vmul.f32 %v4339_v26, %v2357_v44  ;;  %v2283_v46 = vrot.slane %v2244_v48, 2  ;;  %v6713_v48 = vld [vmem:[#allocation38_spill] sm:$0xff]  ;;  %v6714_v10 = vld [vmem:[#allocation39_spill] sm:$0xff] }
 0x3f7   : > { %v5120_v6 = vmul.f32 %v6632_v9, %v2357_v44  ;;  %v895_v19 = vsel %vm754_vm12, %v6698_v20, %v6704_v18  ;;  %v2367_v29 = vmul.f32 %v4352_v4, %v5104_v25  ;;  %v5131_v27 = vmul.f32 %v4355_v62, %v5104_v25  ;;  %v6707_v20 = vld [vmem:[#allocation34_spill] sm:$0xff] }
 0x3f8   : > { %v2395_v3 = vrot.slane %v2365_v61, 3  ;;  %v2396_v26 = vrot.slane %v5099_v52, 3  ;;  %v2280_v9 = vsel %vm483_vm9, %v2267_v43, %v2279_v21  ;;  %v2282_v2 = vsel %vm483_vm9, %v2270_v14, %v2281_v40  ;;  %v6712_v21 = vld [vmem:[#allocation23_spill] sm:$0xff] }
 0x3f9   : > { %v909_v30 = vadd.f32 %v893_v53, %v774_v50  ;;  %v913_v12 = vadd.f32 %v897_v60, %v778_v33  ;;  %v2359_v35 = vsel %vm754_vm12, %v2354_v51, %v5122_v23  ;;  %v896_v4 = vsel %vm754_vm12, %v6704_v18, %v6703_v55  ;;  %v6706_v51 = vld [vmem:[#allocation20_spill] sm:$0xff]  ;;  %v2487_v40 = vpop.permute.xlu0 %2486 }
 0x3fa   : > { %2299 = vrot.lane.b32.xlu1 %v2280_v9, %s3340_s27  ;;  %2301 = vrot.lane.b32.xlu0 %v2282_v2, %s3340_s27  ;;  %v911_v62 = vadd.f32 %v895_v19, %v776_v63  ;;  %v2398_v34 = vrot.slane %v2366_v54, 3  ;;  %v2399_v45 = vrot.slane %v5120_v6, 3  ;;  %v2401_v43 = vrot.slane %v2367_v29, 3  ;;  %v6724_v6 = vld [vmem:[#allocation44_spill] sm:$0xff] }
 0x3fb   : > { %v2402_v14 = vrot.slane %v5131_v27, 3  ;;  %v2369_v50 = vmul.f32 %v4387_v5, %v5122_v23  ;;  %v5151_v33 = vmul.f32 %v6660_v38, %v5122_v23  ;;  %v2368_v24 = vmul.f32 %v4384_v31, %v2359_v35  ;;  %v6708_v31 = vld [vmem:[#allocation36_spill] sm:$0xff] }
 0x3fc   : > { %v5155_v0 = vmul.f32 %v4417_v42, %v2359_v35  ;;  %v2284_v63 = vsel %vm483_vm9, %v2273_v8, %v2283_v46  ;;  %v2397_v47 = vsel %vm560_vm10, %v2395_v3, %v2396_v26  ;;  %v1025_v5 = vsel %vm754_vm12, %v6706_v51, %v6705_v13 }
 0x3fd   : > { %v1026_v38 = vsel %vm754_vm12, %v6705_v13, %v6707_v20  ;;  %v1029_v42 = vsel %vm754_vm12, %v6709_v15, %v6708_v31  ;;  %v1027_v8 = vsel %vm754_vm12, %v6707_v20, %v6710_v11  ;;  %v1028_v41 = vsel %vm754_vm12, %v6710_v11, %v6711_v37  ;;  %v6721_v13 = vld [vmem:[#allocation26_spill] sm:$0xff] }
 0x3fe   : > { %2303 = vrot.lane.b32.xlu1 %v2284_v63, %s3340_s27  ;;  %2420 = vrot.lane.b32.xlu0 %v2397_v47, %s3340_s27  ;;  %v1032_v61 = vsel %vm754_vm12, %v6713_v48, %v6712_v21  ;;  %v1030_v28 = vsel %vm754_vm12, %v6708_v31, %v6714_v10  ;;  %v2375_v17 = vmul.f32 %v4425_v59, %v5047_v36  ;;  %v2407_v56 = vrot.slane %v2369_v50, 3  ;;  %v6719_v50 = vld [vmem:[#allocation25_spill] sm:$0xff]  ;;  %v6720_v63 = vld [vmem:[#allocation43_spill] sm:$0xff]  ;;  %v5238_v20 = vld [vmem:[#allocation2 + $0x70] sm:$0xf] }
 0x3ff   : > { %v2376_v53 = vmul.f32 %v6656_v49, %v2357_v44  ;;  %v2408_v55 = vrot.slane %v5151_v33, 3  ;;  %v2400_v60 = vsel %vm560_vm10, %v2398_v34, %v2399_v45  ;;  %v2403_v54 = vsel %vm560_vm10, %v2401_v43, %v2402_v14  ;;  %v5211_v43 = vpop.permute.xlu0 %2490  ;;  %6722 = vst [vmem:[#allocation104_spill] sm:$0xff] %v5238_v20  ;;  %v3303_v31 = vld [vmem:[#allocation2] sm:$0xff]  ;;  %v6730_v33 = vld [vmem:[#allocation49_spill] sm:$0xff] }
 0x400   : > { %v2404_v18 = vrot.slane %v2368_v24, 3  ;;  %v2405_v19 = vrot.slane %v5155_v0, 3  ;;  %v912_v46 = vadd.f32 %v896_v4, %v5078_v1  ;;  %v1041_v59 = vadd.f32 %v1025_v5, %v5085_v32  ;;  %v2489_v32 = vpop.permute.xlu1 %2488  ;;  %v5309_v0 = vld [vmem:[#allocation2 + $0x20] sm:$0xff] }
 0x401   : > { %v1042_v36 = vadd.f32 %v1026_v38, %v907_v22  ;;  %v1045_v49 = vadd.f32 %v1029_v42, %v910_v16  ;;  %v1043_v44 = vadd.f32 %v1027_v8, %v908_v57  ;;  %v1031_v29 = vsel %vm754_vm12, %v6714_v10, %v6713_v48  ;;  %v3304_v42 = vld [vmem:[#allocation2 + $0x28] sm:$0xff] }
 0x402   : > { %2422 = vrot.lane.b32.xlu1 %v2400_v60, %s3340_s27  ;;  %2424 = vrot.lane.b32.xlu0 %v2403_v54, %s3340_s27  ;;  %v2377_v3 = vmul.f32 %v4469_v7, %v5104_v25  ;;  %v1044_v9 = vadd.f32 %v1028_v41, %v909_v30  ;;  %v1048_v2 = vadd.f32 %v1032_v61, %v913_v12  ;;  %v2410_v1 = vrot.slane %v2375_v17, 3  ;;  %v6715_v25 = vld [vmem:[#allocation41_spill] sm:$0xff]  ;;  %v6716_v30 = vld [vmem:[#allocation24_spill] sm:$0xff] }
 0x403   : > { %v5208_v34 = vadd.f32 %v1030_v28, %v911_v62  ;;  %v2412_v22 = vrot.slane %v2376_v53, 3  ;;  %v2378_v4 = vmul.f32 %v4494_v39, %v2359_v35  ;;  %v2406_v16 = vsel %vm560_vm10, %v2404_v18, %v2405_v19  ;;  %v6717_v62 = vld [vmem:[#allocation40_spill] sm:$0xff]  ;;  %v6718_v35 = vld [vmem:[#allocation42_spill] sm:$0xff] }
 0x404   : > { %v2409_v57 = vsel %vm560_vm10, %v2407_v56, %v2408_v55  ;;  %v5219_v7 = vadd.f32 %v1031_v29, %v912_v46  ;;  %v1160_v12 = vsel %vm754_vm12, %v6716_v30, %v6715_v25  ;;  %v1161_v39 = vsel %vm754_vm12, %v6715_v25, %v6717_v62  ;;  %v5263_v17 = vpop.permute.xlu1 %1663  ;;  %v5275_v56 = vld [vmem:[#allocation2 + $0x30] sm:$0xff] }
 0x405   : > { %v1164_v24 = vsel %vm754_vm12, %v6719_v50, %v6718_v35  ;;  %v1162_v47 = vsel %vm754_vm12, %v6717_v62, %v6720_v63  ;;  %v1163_v51 = vsel %vm754_vm12, %v6720_v63, %v6721_v13  ;;  %v2414_v5 = vrot.slane %v2377_v3, 3  ;;  %v1781_v21 = vpop.permute.xlu0 %1780  ;;  %v5282_v46 = vld [vmem:[#allocation2 + $0x10] sm:$0xff] }
 0x406   : > { %2426 = vrot.lane.b32.xlu1 %v2406_v16, %s3340_s27  ;;  %2428 = vrot.lane.b32.xlu0 %v2409_v57, %s3340_s27  ;;  %v2379_v38 = vmul.f32 %v5238_v20, %v5122_v23  ;;  %v2500_v15 = vmul.f32 %v3303_v31, %v5172_v58  ;;  %v5244_v11 = vmul.f32 %v3304_v42, %v5172_v58  ;;  %v2416_v48 = vrot.slane %v2378_v4, 3 }
 0x407   : > { %v2492_v8 = vsel %vm754_vm12, %v5172_v58, %v2487_v40  ;;  %v5249_v37 = vsel %vm754_vm12, %v2487_v40, %v2489_v32  ;;  %v2411_v41 = vsel %vm560_vm10, %v2396_v26, %v2410_v1  ;;  %v2413_v23 = vsel %vm560_vm10, %v2399_v45, %v2412_v22  ;;  %v6723_v26 = vld [vmem:[#allocation27_spill] sm:$0xff]  ;;  %v5272_v40 = vld [vmem:[#allocation2 + $0x8] sm:$0xff] }
 0x408   : > { %v5257_v61 = vadd.f32 %v1160_v12, %v1041_v59  ;;  %v5259_v10 = vadd.f32 %v1161_v39, %v1042_v36  ;;  %v5261_v28 = vadd.f32 %v1164_v24, %v1045_v49  ;;  %v5267_v52 = vadd.f32 %v1162_v47, %v1043_v44  ;;  %v5286_v36 = vld [vmem:[#allocation2 + $0x38] sm:$0xff]  ;;  %v6725_v22 = vld [vmem:[#allocation45_spill] sm:$0xff]  ;;  %v5329_v24 = vld [vmem:[#allocation2 + $0x40] sm:$0xff] }
 0x409   : > { %v1167_v45 = vsel %vm754_vm12, %v6724_v6, %v6723_v26  ;;  %v2501_v53 = vmul.f32 %v5272_v40, %v2492_v8  ;;  %v5278_v60 = vmul.f32 %v5275_v56, %v2492_v8  ;;  %v5280_v54 = vadd.f32 %v1163_v51, %v1044_v9  ;;  %v1783_v27 = vpop.permute.xlu1 %1782  ;;  %v5317_v12 = vld [vmem:[#allocation2 + $0x48] sm:$0xff]  ;;  %v5358_v26 = vld [vmem:[#allocation2 + $0x58] sm:$0xf] }
 0x40a   : > { %2430 = vrot.lane.b32.xlu1 %v2411_v41, %s3340_s27  ;;  %2432 = vrot.lane.b32.xlu0 %v2413_v23, %s3340_s27  ;;  %v2418_v18 = vrot.slane %v2379_v38, 3  ;;  %v2502_v59 = vmul.f32 %v5282_v46, %v5249_v37  ;;  %v5290_v49 = vmul.f32 %v5286_v36, %v5249_v37  ;;  %v2530_v44 = vrot.slane %v2500_v15, 4  ;;  %6726 = vst [vmem:[#allocation87_spill] sm:$0xff] %v5317_v12  ;;  %v6728_v38 = vld [vmem:[#allocation46_spill] sm:$0xff]  ;;  %v6729_v15 = vld [vmem:[#allocation48_spill] sm:$0xff] }
 0x40b   : > { %v2531_v29 = vrot.slane %v5244_v11, 4  ;;  %v2415_v3 = vsel %vm560_vm10, %v2402_v14, %v2414_v5  ;;  %v2417_v9 = vsel %vm560_vm10, %v2405_v19, %v2416_v48  ;;  %v5299_v1 = vadd.f32 %v1167_v45, %v1048_v2  ;;  %v6727_v5 = vld [vmem:[#allocation47_spill] sm:$0xff]  ;;  %v6731_v41 = vld [vmem:[#allocation50_spill] sm:$0xff]  ;;  %v6744_v11 = vld [vmem:[#allocation60_spill] sm:$0xff] }
 0x40c   : > { %v1165_v4 = vsel %vm754_vm12, %v6718_v35, %v6725_v22  ;;  %v2494_v16 = vsel %vm754_vm12, %v2489_v32, %v5211_v43  ;;  %v2533_v57 = vrot.slane %v2501_v53, 4  ;;  %v2534_v14 = vrot.slane %v5278_v60, 4  ;;  %v1785_v25 = vpop.permute.xlu0 %1784  ;;  %v5326_v35 = vld [vmem:[#allocation2 + $0x18] sm:$0xff]  ;;  %v6748_v60 = vld [vmem:[#allocation78_spill] sm:$0xff] }
 0x40d   : > { %v2504_v19 = vmul.f32 %v5309_v0, %v5211_v43  ;;  %v5314_v2 = vsel %vm277_vm2, %v1781_v21, %v1783_v27  ;;  %v2536_v30 = vrot.slane %v2502_v59, 4  ;;  %v2537_v32 = vrot.slane %v5290_v49, 4  ;;  %v3313_v21 = vld [vmem:[#allocation2 + $0x50] sm:$0xf]  ;;  %v1787_v59 = vpop.permute.xlu1 %1786 }
 0x40e   : > { %2434 = vrot.lane.b32.xlu1 %v2415_v3, %s3340_s27  ;;  %2436 = vrot.lane.b32.xlu0 %v2417_v9, %s3340_s27  ;;  %v5321_v62 = vmul.f32 %v5317_v12, %v5211_v43  ;;  %v5324_v39 = vsel %vm277_vm2, %v1783_v27, %v1785_v25  ;;  %v2503_v50 = vmul.f32 %v5326_v35, %v2494_v16 }
 0x40f   : > { %v5332_v63 = vmul.f32 %v5329_v24, %v2494_v16  ;;  %v2419_v47 = vsel %vm560_vm10, %v2408_v55, %v2418_v18  ;;  %v2532_v13 = vsel %vm637_vm11, %v2530_v44, %v2531_v29  ;;  %v1166_v51 = vsel %vm754_vm12, %v6725_v22, %v6724_v6 }
 0x410   : > { %v1295_v31 = vsel %vm754_vm12, %v6728_v38, %v6727_v5  ;;  %v1296_v42 = vsel %vm754_vm12, %v6727_v5, %v6729_v15  ;;  %v1297_v55 = vsel %vm754_vm12, %v6729_v15, %v6730_v33  ;;  %v1298_v23 = vsel %vm754_vm12, %v6730_v33, %v6731_v41  ;;  %v1789_v45 = vpop.permute.xlu0 %1788  ;;  %v5391_v5 = vld [vmem:[#allocation2 + $0x60] sm:$0xf]  ;;  %v6736_v41 = vld [vmem:[#allocation54_spill] sm:$0xff] }
 0x411   : > { %v2510_v48 = vmul.f32 %v3313_v21, %v5172_v58  ;;  %v2511_v6 = vmul.f32 %v5358_v26, %v2492_v8  ;;  %v2542_v53 = vrot.slane %v2504_v19, 4  ;;  %v2543_v18 = vrot.slane %v5321_v62, 4  ;;  %v6760_v62 = vld [vmem:[#allocation83_spill] sm:$0xff] }
 0x412   : > { %2438 = vrot.lane.b32.xlu1 %v2419_v47, %s3340_s27  ;;  %2555 = vrot.lane.b32.xlu0 %v2532_v13, %s3340_s27  ;;  %v2535_v44 = vsel %vm637_vm11, %v2533_v57, %v2534_v14  ;;  %v2538_v3 = vsel %vm637_vm11, %v2536_v30, %v2537_v32  ;;  %v5369_v9 = vsel %vm277_vm2, %v1785_v25, %v1787_v59  ;;  %v2539_v8 = vrot.slane %v2503_v50, 4  ;;  %v6732_v47 = vld [vmem:[#allocation52_spill] sm:$0xff]  ;;  %v6733_v13 = vld [vmem:[#allocation51_spill] sm:$0xff]  ;;  %v1791_v38 = vpop.permute.xlu1 %1790 }
 0x413   : > { %v5372_v58 = vsel %vm277_vm2, %v1787_v59, %v1789_v45  ;;  %v2540_v22 = vrot.slane %v5332_v63, 4  ;;  %v1181_v27 = vadd.f32 %v1165_v4, %v5208_v34  ;;  %v5377_v19 = vadd.f32 %v1166_v51, %v5219_v7  ;;  %v6734_v63 = vld [vmem:[#allocation53_spill] sm:$0xff]  ;;  %v6740_v45 = vld [vmem:[#allocation59_spill] sm:$0xff] }
 0x414   : > { %v1311_v57 = vadd.f32 %v1295_v31, %v5257_v61  ;;  %v1312_v25 = vadd.f32 %v1296_v42, %v5259_v10  ;;  %v1313_v30 = vadd.f32 %v1297_v55, %v5267_v52  ;;  %v1299_v50 = vsel %vm754_vm12, %v6733_v13, %v6732_v47  ;;  %v1793_v7 = vpop.permute.xlu0 %1792  ;;  %v5395_v52 = vld [vmem:[#allocation2 + $0x68] sm:$0xf]  ;;  %v6742_v59 = vld [vmem:[#allocation67_spill] sm:$0xff] }
 0x415   : > { %v1300_v34 = vsel %vm754_vm12, %v6732_v47, %v6734_v63  ;;  %v1314_v4 = vadd.f32 %v1298_v23, %v5280_v54  ;;  %v2545_v61 = vrot.slane %v2510_v48, 4  ;;  %v2547_v51 = vrot.slane %v2511_v6, 4  ;;  %6735 = vst [vmem:[#allocation94_spill] sm:$0xff] %v5395_v52  ;;  %v6738_v23 = vld [vmem:[#allocation56_spill] sm:$0xff]  ;;  %v6739_v48 = vld [vmem:[#allocation58_spill] sm:$0xff] }
 0x416   : > { %2557 = vrot.lane.b32.xlu1 %v2535_v44, %s3340_s27  ;;  %2559 = vrot.lane.b32.xlu0 %v2538_v3, %s3340_s27  ;;  %v2512_v10 = vmul.f32 %v5391_v5, %v5249_v37  ;;  %v2513_v31 = vmul.f32 %v5395_v52, %v2494_v16  ;;  %v5399_v15 = vsel %vm277_vm2, %v1791_v38, %v1793_v7  ;;  %v6737_v16 = vld [vmem:[#allocation57_spill] sm:$0xff] }
 0x417   : > { %v2541_v42 = vsel %vm637_vm11, %v2539_v8, %v2540_v22  ;;  %v2544_v54 = vsel %vm637_vm11, %v2542_v53, %v2543_v18  ;;  %v1315_v33 = vadd.f32 %v1299_v50, %v5261_v28  ;;  %v5406_v55 = vadd.f32 %v1300_v34, %v1181_v27  ;;  %v6741_v53 = vld [vmem:[#allocation68_spill] sm:$0xff]  ;;  %v6743_v3 = vld [vmem:[#allocation69_spill] sm:$0xff]  ;;  %v1795_v13 = vpop.permute.xlu1 %1794 }
 0x418   : > { %v1301_v37 = vsel %vm754_vm12, %v6734_v63, %v6736_v41  ;;  %v1395_v21 = vsel %vm277_vm2, %v6738_v23, %v6737_v16  ;;  %v1396_v6 = vsel %vm277_vm2, %v6737_v16, %v6739_v48  ;;  %v1397_v28 = vsel %vm277_vm2, %v6739_v48, %v6740_v45  ;;  %v1797_v50 = vpop.permute.xlu0 %1796  ;;  %v6747_v48 = vld [vmem:[#allocation79_spill] sm:$0xff] }
 0x419   : > { %v1530_v44 = vsel %vm277_vm2, %v6742_v59, %v6741_v53  ;;  %v1531_v8 = vsel %vm277_vm2, %v6741_v53, %v6743_v3  ;;  %v2549_v27 = vrot.slane %v2512_v10, 4  ;;  %v2514_v47 = vmul.f32 %v5238_v20, %v5211_v43 }
 0x41a   : > { %2561 = vrot.lane.b32.xlu1 %v2541_v42, %s3340_s27  ;;  %2563 = vrot.lane.b32.xlu0 %v2544_v54, %s3340_s27  ;;  %v2546_v63 = vsel %vm637_vm11, %v2531_v29, %v2545_v61  ;;  %v5434_v34 = vsel %vm277_vm2, %v1793_v7, %v1795_v13  ;;  %v5437_v38 = vsel %vm277_vm2, %v1795_v13, %v1797_v50  ;;  %v2551_v10 = vrot.slane %v2513_v31, 4  ;;  %v6745_v7 = vld [vmem:[#allocation62_spill] sm:$0xff]  ;;  %v6746_v61 = vld [vmem:[#allocation61_spill] sm:$0xff] }
 0x41b   : > { %v2548_v42 = vsel %vm637_vm11, %v2534_v14, %v2547_v51  ;;  %v1411_v54 = vadd.f32 %v1395_v21, %v1311_v57  ;;  %v1412_v16 = vadd.f32 %v1396_v6, %v1312_v25  ;;  %v1413_v43 = vadd.f32 %v1397_v28, %v1313_v30  ;;  %v6749_v51 = vld [vmem:[#allocation80_spill] sm:$0xff]  ;;  %v6750_v31 = vld [vmem:[#allocation70_spill] sm:$0xff]  ;;  %v6751_v6 = vld [vmem:[#allocation71_spill] sm:$0xff]  ;;  %v1799_v28 = vpop.permute.xlu1 %1798 }
 0x41c   : > { %v1398_v29 = vsel %vm277_vm2, %v6740_v45, %v6744_v11  ;;  %v1399_v23 = vsel %vm277_vm2, %v6746_v61, %v6745_v7  ;;  %v1665_v14 = vsel %vm277_vm2, %v6748_v60, %v6747_v48  ;;  %v1666_v57 = vsel %vm277_vm2, %v6747_v48, %v6749_v51  ;;  %v1916_v53 = vpop.permute.xlu0 %1915  ;;  %v6754_v11 = vld [vmem:[#allocation82_spill] sm:$0xff]  ;;  %v6755_v61 = vld [vmem:[#allocation73_spill] sm:$0xff] }
 0x41d   : > { %v1546_v25 = vadd.f32 %v1530_v44, %v1411_v54  ;;  %v1547_v30 = vadd.f32 %v1531_v8, %v1412_v16  ;;  %v1532_v21 = vsel %vm277_vm2, %v6743_v3, %v6750_v31  ;;  %v1533_v45 = vsel %vm277_vm2, %v6750_v31, %v6751_v6  ;;  %v6752_v16 = vld [vmem:[#allocation63_spill] sm:$0xff]  ;;  %v6758_v31 = vld [vmem:[#allocation64_spill] sm:$0xff] }
 0x41e   : > { %2565 = vrot.lane.b32.xlu1 %v2546_v63, %s3340_s27  ;;  %2567 = vrot.lane.b32.xlu0 %v2548_v42, %s3340_s27  ;;  %v2553_v59 = vrot.slane %v2514_v47, 4  ;;  %v5463_v13 = vsel %vm277_vm2, %v1797_v50, %v1799_v28  ;;  %v2550_v63 = vsel %vm637_vm11, %v2537_v32, %v2549_v27  ;;  %v2552_v44 = vsel %vm637_vm11, %v2540_v22, %v2551_v10  ;;  %v6753_v50 = vld [vmem:[#allocation81_spill] sm:$0xff]  ;;  %v6759_v6 = vld [vmem:[#allocation84_spill] sm:$0xff] }
 0x41f   : > { %v1414_v8 = vadd.f32 %v1398_v29, %v1314_v4  ;;  %v1681_v42 = vadd.f32 %v1665_v14, %v1546_v25  ;;  %v1682_v54 = vadd.f32 %v1666_v57, %v1547_v30  ;;  %v1415_v3 = vadd.f32 %v1399_v23, %v1315_v33  ;;  %v1918_v29 = vpop.permute.xlu1 %1917  ;;  %v6756_v23 = vld [vmem:[#allocation72_spill] sm:$0xff]  ;;  %v6757_v25 = vld [vmem:[#allocation55_spill] sm:$0xff] }
 0x420   : > { %v1400_v47 = vsel %vm277_vm2, %v6745_v7, %v6752_v16  ;;  %v1667_v49 = vsel %vm277_vm2, %v6749_v51, %v6753_v50  ;;  %v1668_v32 = vsel %vm277_vm2, %v6753_v50, %v6754_v11  ;;  %v1548_v22 = vadd.f32 %v1532_v21, %v1413_v43  ;;  %v1920_v33 = vpop.permute.xlu0 %1919  ;;  %v6764_v50 = vld [vmem:[#allocation85_spill] sm:$0xff]  ;;  %v6765_v11 = vld [vmem:[#allocation90_spill] sm:$0xff] }
 0x421   : > { %v1549_v4 = vadd.f32 %v1533_v45, %v1414_v8  ;;  %v1816_v27 = vadd.f32 %v5314_v2, %v1681_v42  ;;  %v1817_v10 = vadd.f32 %v5324_v39, %v1682_v54  ;;  %v1534_v7 = vsel %vm277_vm2, %v6756_v23, %v6755_v61 }
 0x422   : > { %2569 = vrot.lane.b32.xlu1 %v2550_v63, %s3340_s27  ;;  %2571 = vrot.lane.b32.xlu0 %v2552_v44, %s3340_s27  ;;  %v1935_v48 = vsel %vm277_vm2, %v1916_v53, %v1918_v29  ;;  %v1936_v60 = vsel %vm277_vm2, %v1918_v29, %v1920_v33  ;;  %v2554_v14 = vsel %vm637_vm11, %v2543_v18, %v2553_v59  ;;  %v6761_v63 = vld [vmem:[#allocation74_spill] sm:$0xff]  ;;  %v6762_v44 = vld [vmem:[#allocation75_spill] sm:$0xff] }
 0x423   : > { %v1683_v43 = vadd.f32 %v1667_v49, %v1548_v22  ;;  %v1684_v51 = vadd.f32 %v1668_v32, %v1549_v4  ;;  %v1951_v57 = vadd.f32 %v1935_v48, %v1816_v27  ;;  %v1952_v2 = vadd.f32 %v1936_v60, %v1817_v10 }
 0x424   : > { %v1317_v39 = vadd.f32 %v1301_v37, %v5377_v19  ;;  %v1302_v30 = vsel %vm754_vm12, %v6736_v41, %v6757_v25  ;;  %v1401_v21 = vsel %vm277_vm2, %v6752_v16, %v6758_v31  ;;  %v1669_v18 = vsel %vm277_vm2, %v6760_v62, %v6759_v6  ;;  %v1922_v19 = vpop.permute.xlu1 %1921  ;;  %v1924_v37 = vpop.permute.xlu0 %1923 }
 0x425   : > { %v1416_v45 = vadd.f32 %v1400_v47, %v5406_v55  ;;  %v1550_v28 = vadd.f32 %v1534_v7, %v1415_v3  ;;  %v1818_v53 = vadd.f32 %v5369_v9, %v1683_v43  ;;  %v1819_v59 = vadd.f32 %v5372_v58, %v1684_v51  ;;  %v6763_v47 = vld [vmem:[#allocation65_spill] sm:$0xff] }
 0x426   : > { %2573 = vrot.lane.b32.xlu1 %v2554_v14, %s3340_s27  ;;  %v1535_v41 = vsel %vm277_vm2, %v6755_v61, %v6761_v63  ;;  %v1536_v8 = vsel %vm277_vm2, %v6761_v63, %v6762_v44  ;;  %v1937_v42 = vsel %vm277_vm2, %v1920_v33, %v1922_v19  ;;  %v1938_v54 = vsel %vm277_vm2, %v1922_v19, %v1924_v37  ;;  %v6766_v61 = vld [vmem:[#allocation76_spill] sm:$0xff] }
 0x427   : > { %v1417_v55 = vadd.f32 %v1401_v21, %v1317_v39  ;;  %v1685_v3 = vadd.f32 %v1669_v18, %v1550_v28  ;;  %v1953_v16 = vadd.f32 %v1937_v42, %v1818_v53  ;;  %v1954_v9 = vadd.f32 %v1938_v54, %v1819_v59 }
 0x428   : > { %v1402_v58 = vsel %vm277_vm2, %v6758_v31, %v6763_v47  ;;  %v1670_v49 = vsel %vm277_vm2, %v6759_v6, %v6764_v50  ;;  %v1671_v32 = vsel %vm277_vm2, %v6764_v50, %v6765_v11  ;;  %v1318_v22 = vadd.f32 %v1302_v30, %v5299_v1  ;;  %v1926_v29 = vpop.permute.xlu1 %1925  ;;  %v1928_v33 = vpop.permute.xlu0 %1927 }
 0x429   : > { %v1551_v4 = vadd.f32 %v1535_v41, %v1416_v45  ;;  %v1552_v27 = vadd.f32 %v1536_v8, %v1417_v55  ;;  %v1820_v10 = vadd.f32 %v5399_v15, %v1685_v3  ;;  %v1537_v23 = vsel %vm277_vm2, %v6762_v44, %v6766_v61 }
 0x42a   : > { %v1939_v7 = vsel %vm277_vm2, %v1926_v29, %v1928_v33  ;;  %v1418_v48 = vadd.f32 %v1402_v58, %v1318_v22  ;;  %v1672_v1 = vsel %vm277_vm2, %v6765_v11, %v5263_v17 }
 0x42b   : > { %v1686_v60 = vadd.f32 %v1670_v49, %v1551_v4  ;;  %v1687_v14 = vadd.f32 %v1671_v32, %v1552_v27  ;;  %v1955_v43 = vadd.f32 %v1939_v7, %v1820_v10 }
 0x42c   : > { %v1553_v51 = vadd.f32 %v1537_v23, %v1418_v48  ;;  %v1932_v30 = vpop.permute.xlu0 %1931 }
 0x42d   : > { %v1821_v39 = vadd.f32 %v5434_v34, %v1686_v60  ;;  %v1822_v15 = vadd.f32 %v5437_v38, %v1687_v14  ;;  %v1930_v25 = vpop.permute.xlu1 %1929 }
 0x42e   : > { %v1940_v31 = vsel %vm277_vm2, %v1928_v33, %v1930_v25  ;;  %v1941_v21 = vsel %vm277_vm2, %v1930_v25, %v1932_v30  ;;  %v1688_v6 = vadd.f32 %v1672_v1, %v1553_v51 }
 0x42f   : > { %v1956_v62 = vadd.f32 %v1940_v31, %v1821_v39  ;;  %v1957_v18 = vadd.f32 %v1941_v21, %v1822_v15 }
 0x430   : > { %v1823_v45 = vadd.f32 %v5463_v13, %v1688_v6  ;;  %v3317_v6 = vld [vmem:[%s6341_s1 + $0x20] sm:$0xff] }
 0x431   : > { %v2016_v53 = vpop.permute.xlu0 %2015 }
 0x433   : > { %v1934_v28 = vpop.permute.xlu1 %1933 }
 0x434   : > { %v1942_v17 = vsel %vm277_vm2, %v1932_v30, %v1934_v28 }
 0x435   : > { %v1958_v59 = vadd.f32 %v1942_v17, %v1823_v45  ;;  %v2020_v34 = vpop.permute.xlu0 %2019  ;;  %v6777_v17 = vld [vmem:[#allocation66_spill] sm:$0xff] }
 0x437   : > { %v2018_v19 = vpop.permute.xlu1 %2017 }
 0x438   : > { %v2035_v38 = vsel %vm705_vm7, %v2016_v53, %v2018_v19  ;;  %v2036_v37 = vsel %vm705_vm7, %v2018_v19, %v2020_v34  ;;  %v3318_v53 = vld [vmem:[%s6341_s1] sm:$0xff] }
 0x439   : > { %v5538_v63 = vadd.f32 %v2035_v38, %v1951_v57  ;;  %v5540_v41 = vadd.f32 %v2036_v37, %v1952_v2  ;;  %v2024_v8 = vpop.permute.xlu0 %2023  ;;  %v6778_v19 = vld [vmem:[#allocation4_spill] sm:$0xff]  ;;  %v6779_v37 = vld [vmem:[#allocation5_spill] sm:$0xff] }
 0x43a   : > { %v3319_v38 = vld [vmem:[%s6341_s1 + $0x40] sm:$0xff] }
 0x43b   : > { %v2022_v44 = vpop.permute.xlu1 %2021 }
 0x43c   : > { %v2037_v42 = vsel %vm705_vm7, %v2020_v34, %v2022_v44  ;;  %v2038_v13 = vsel %vm705_vm7, %v2022_v44, %v2024_v8  ;;  %v5601_v34 = vrot.slane %v3317_v6, %v6778_v19  ;;  %v5607_v44 = vrot.slane %v3319_v38, %v6779_v37 }
 0x43d   : > { %v5544_v54 = vadd.f32 %v2037_v42, %v1953_v16  ;;  %v5546_v55 = vadd.f32 %v2038_v13, %v1954_v9  ;;  %v3320_v13 = vld [vmem:[%s6341_s1 + $0x8] sm:$0xff] }
 0x43e   : > { %v2028_v47 = vpop.permute.xlu0 %2027 }
 0x43f   : > { %6767 = vst [vmem:[#allocation86_spill] sm:$0xff] %v5546_v55  ;;  %v2026_v3 = vpop.permute.xlu1 %2025 }
 0x440   : > { %v2039_v58 = vsel %vm705_vm7, %v2026_v3, %v2028_v47  ;;  %v5619_v3 = vrot.slane %v3320_v13, %v6777_v17  ;;  %v2723_v13 = vmul.f32 %v5272_v40, %v5601_v34 }
 0x441   : > { %v5549_v50 = vadd.f32 %v2039_v58, %v1955_v43 }
 0x442   : > { %v2032_v49 = vpop.permute.xlu0 %2031  ;;  %v2747_v20 = vrot.slane %v2723_v13, 2  ;;  %v5751_v13 = vmul.f32 %v5282_v46, %v5619_v3 }
 0x443   : > { %6768 = vst [vmem:[#allocation95_spill] sm:$0xff] %v5549_v50  ;;  %v2030_v57 = vpop.permute.xlu1 %2029 }
 0x444   : > { %v2040_v2 = vsel %vm705_vm7, %v2028_v47, %v2030_v57  ;;  %v2041_v11 = vsel %vm705_vm7, %v2030_v57, %v2032_v49  ;;  %v3321_v47 = vld [vmem:[%s6341_s1 + $0x28] sm:$0xff]  ;;  %6798 = vst [vmem:[#allocation77_spill] sm:$0xff] %v5751_v13 }
 0x445   : > { %v2056_v32 = vadd.f32 %v2040_v2, %v1956_v62  ;;  %v2057_v22 = vadd.f32 %v2041_v11, %v1957_v18  ;;  %v6774_v62 = vld [vmem:[#allocation3_spill] sm:$0xff]  ;;  %v5632_v2 = vrot.slane %v3321_v47, %v6778_v19  ;;  %v3322_v11 = vld [vmem:[%s6341_s1 + $0x48] sm:$0xff] }
 0x446   : > { %v5553_v27 = vpop.permute.xlu0 %2150  ;;  %v5588_v18 = vrot.slane %v3317_v6, %v6774_v62  ;;  %v5625_v58 = vrot.slane %v3321_v47, %v6774_v62  ;;  %v3327_v6 = vld [vmem:[%s6341_s1 + $0x38] sm:$0xff] }
 0x447   : > { %v2034_v4 = vpop.permute.xlu1 %2033  ;;  %v5685_v47 = vrot.slane %v3327_v6, %v6778_v19 }
 0x448   : > { %v2042_v16 = vsel %vm705_vm7, %v2032_v49, %v2034_v4  ;;  %v2647_v8 = vmul.f32 %v5272_v40, %v5588_v18  ;;  %v5613_v42 = vmul.f32 %v5275_v56, %v5588_v18 }
 0x449   : > { %v2058_v9 = vadd.f32 %v2042_v16, %v1958_v59  ;;  %v5598_v59 = vrot.slane %v3318_v53, %v6777_v17  ;;  %v3324_v16 = vld [vmem:[%s6341_s1 + $0x30] sm:$0xff]  ;;  %v5676_v53 = vrot.slane %v3327_v6, %v6774_v62  ;;  %6788 = vst [vmem:[#allocation102_spill] sm:$0xff] %v5685_v47 }
 0x44a   : > { %v5558_v29 = vpop.permute.xlu0 %2154 }
 0x44b   : > { %v5556_v10 = vpop.permute.xlu1 %2152  ;;  %6786 = vst [vmem:[#allocation93_spill] sm:$0xff] %v5676_v53  ;;  %v5680_v38 = vmul.f32 %v5272_v40, %v5598_v59 }
 0x44d   : > { %6787 = vst [vmem:[#allocation110_spill] sm:$0xff] %v5680_v38  ;;  %v6796_v38 = vrot.slane %v5613_v42, 1 }
 0x44f   : > { %v5560_v33 = vpop.permute.xlu1 %2156  ;;  %v5562_v61 = vpop.permute.xlu0 %2158 }
 0x453   : > { %v5564_v23 = vpop.permute.xlu1 %2160  ;;  %v5566_v7 = vpop.permute.xlu0 %2162 }
 0x454   : > { %6769 = vst [vmem:[#allocation88_spill] sm:$0xff] %v5564_v23  ;;  %6770 = vst [vmem:[#allocation89_spill] sm:$0xff] %v5566_v7 }
 0x458   : > { %v2165_v48 = vpop.permute.xlu1 %2164  ;;  %v2167_v60 = vpop.permute.xlu0 %2166 }
 0x459   : > { %v2175_v14 = vsel %vm705_vm7, %v5566_v7, %v2165_v48  ;;  %v2176_v43 = vsel %vm705_vm7, %v2165_v48, %v2167_v60  ;;  %v5655_v48 = vld [vmem:[%s6341_s1 + $0x60] ss:$0 sm:$0xff] }
 0x45a   : > { %v5571_v1 = vadd.f32 %v2175_v14, %v2056_v32  ;;  %v5573_v51 = vadd.f32 %v2176_v43, %v2057_v22  ;;  %v5638_v32 = vrot.slane %v3322_v11, %v6779_v37  ;;  %v3323_v22 = vld [vmem:[%s6341_s1 + $0x10] sm:$0xff] }
 0x45b   : > { %v5644_v4 = vrot.slane %v3323_v22, %v6777_v17  ;;  %v3325_v14 = vld [vmem:[%s6341_s1 + $0x50] sm:$0xff]  ;;  %v2671_v22 = vrot.slane %v2647_v8, 1  ;;  %v2875_v8 = vmul.f32 %v5272_v40, %v5655_v48 }
 0x45c   : > { %6771 = vst [vmem:[#allocation92_spill] sm:$0xff] %v5571_v1  ;;  %6772 = vst [vmem:[#allocation91_spill] sm:$0xff] %v5573_v51  ;;  %v2169_v39 = vpop.permute.xlu1 %2168  ;;  %v5575_v15 = vpop.permute.xlu0 %2285  ;;  %v5664_v43 = vrot.slane %v3325_v14, %v6779_v37  ;;  %v2799_v14 = vmul.f32 %v5272_v40, %v5607_v44  ;;  %v2724_v51 = vmul.f32 %v5282_v46, %v5632_v2 }
 0x45d   : > { %v2177_v25 = vsel %vm705_vm7, %v2167_v60, %v2169_v39  ;;  %v5658_v60 = vrot.slane %v3324_v16, %v6778_v19  ;;  %v3326_v39 = vld [vmem:[%s6341_s1 + $0x18] sm:$0xff]  ;;  %v5703_v19 = vld [vmem:[%s6341_s1 + $0x68] ss:$0 sm:$0xff]  ;;  %v2800_v40 = vmul.f32 %v5282_v46, %v5638_v32  ;;  %v5735_v1 = vmul.f32 %v5286_v36, %v5638_v32 }
 0x45e   : > { %v5578_v30 = vadd.f32 %v2177_v25, %v2058_v9  ;;  %v5650_v9 = vrot.slane %v3324_v16, %v6774_v62  ;;  %6784 = vst [vmem:[#allocation101_spill] sm:$0xff] %v5664_v43  ;;  %v5670_v25 = vrot.slane %v3326_v39, %v6777_v17  ;;  %v3328_v17 = vld [vmem:[%s6341_s1 + $0x58] sm:$0xff]  ;;  %v5696_v16 = vmul.f32 %v5275_v56, %v5601_v34 }
 0x45f   : > { %6783 = vst [vmem:[#allocation115_spill] sm:$0xff] %v5658_v60  ;;  %v5691_v11 = vrot.slane %v3328_v17, %v6779_v37  ;;  %6790 = vst [vmem:[#allocation103_spill] sm:$0xff] %v5703_v19  ;;  %v5711_v37 = vmul.f32 %v5275_v56, %v5607_v44  ;;  %v5717_v17 = vmul.f32 %v5275_v56, %v5655_v48 }
 0x460   : > { %6773 = vst [vmem:[#allocation96_spill] sm:$0xff] %v5578_v30  ;;  %v5580_v31 = vpop.permute.xlu1 %2287  ;;  %v5582_v21 = vpop.permute.xlu0 %2289  ;;  %6782 = vst [vmem:[#allocation112_spill] sm:$0xff] %v5650_v9  ;;  %v2648_v62 = vmul.f32 %v5282_v46, %v5625_v58  ;;  %v5723_v30 = vmul.f32 %v5286_v36, %v5625_v58  ;;  %v5741_v50 = vmul.f32 %v5286_v36, %v5703_v19 }
 0x461   : > { %6785 = vst [vmem:[#allocation108_spill] sm:$0xff] %v5670_v25  ;;  %6789 = vst [vmem:[#allocation105_spill] sm:$0xff] %v5691_v11  ;;  %v5746_v52 = vsel %vm406_vm8, %v2671_v22, %v6796_v38  ;;  %v6465_v55 = vrot.slane %v5711_v37, 3  ;;  %v2750_v22 = vrot.slane %v2724_v51, 2  ;;  %v5783_v13 = vmul.f32 %v5329_v24, %v5658_v60 }
 0x462   : > { %6794 = vst [vmem:[#allocation107_spill] sm:$0xff] %v5735_v1  ;;  %6795 = vst [vmem:[#allocation117_spill] sm:$0xff] %v5741_v50  ;;  %v2801_v38 = vmul.f32 %v5326_v35, %v5664_v43 }
 0x463   : > { %6797 = vst [vmem:[#allocation114_spill] sm:$0xff] %v5746_v52  ;;  %6804 = vst [vmem:[#allocation8_spill] sm:$0xff] %v5783_v13 }
 0x464   : > { %v5590_v45 = vpop.permute.xlu1 %2291  ;;  %v5592_v28 = vpop.permute.xlu0 %2293 }
 0x465   : > { %6775 = vst [vmem:[#allocation97_spill] sm:$0xff] %v5590_v45  ;;  %6776 = vst [vmem:[#allocation98_spill] sm:$0xff] %v5592_v28  ;;  %v6464_v28 = vrot.slane %v5717_v17, 4  ;;  %v2674_v45 = vrot.slane %v2648_v62, 1  ;;  %v6801_v62 = vrot.slane %v5696_v16, 2 }
 0x467   : > { %v5773_v51 = vsel %vm483_vm9, %v2747_v20, %v6801_v62 }
 0x468   : > { %v5627_v57 = vpop.permute.xlu1 %2295  ;;  %v5629_v49 = vpop.permute.xlu0 %2297  ;;  %6802 = vst [vmem:[#allocation7_spill] sm:$0xff] %v5773_v51  ;;  %v5803_v51 = vmul.f32 %v5329_v24, %v5664_v43  ;;  %v2726_v43 = vmul.f32 %v5309_v0, %v5685_v47 }
 0x469   : > { %6780 = vst [vmem:[#allocation100_spill] sm:$0xff] %v5627_v57  ;;  %6781 = vst [vmem:[#allocation99_spill] sm:$0xff] %v5629_v49  ;;  %v2823_v49 = vrot.slane %v2799_v14, 3  ;;  %v2826_v14 = vrot.slane %v2800_v40, 3  ;;  %v5777_v40 = vmul.f32 %v5329_v24, %v5650_v9 }
 0x46a   : > { %6807 = vst [vmem:[#allocation12_spill] sm:$0xff] %v5803_v51 }
 0x46b   : > { %6803 = vst [vmem:[#allocation6_spill] sm:$0xff] %v5777_v40  ;;  %v5792_v20 = vsel %vm560_vm10, %v2823_v49, %v6465_v55  ;;  %v5812_v49 = vmul.f32 %v5326_v35, %v5644_v4 }
 0x46c   : > { %v5705_v39 = vpop.permute.xlu1 %2299  ;;  %v5707_v6 = vpop.permute.xlu0 %2301  ;;  %6805 = vst [vmem:[#allocation9_spill] sm:$0xff] %v5792_v20  ;;  %v6813_v20 = vrot.slane %v5735_v1, 3 }
 0x46d   : > { %6791 = vst [vmem:[#allocation106_spill] sm:$0xff] %v5705_v39  ;;  %6792 = vst [vmem:[#allocation116_spill] sm:$0xff] %v5707_v6  ;;  %v5729_v6 = vmul.f32 %v5286_v36, %v5632_v2  ;;  %v2876_v39 = vmul.f32 %v5282_v46, %v5703_v19  ;;  %v2899_v19 = vrot.slane %v2875_v8, 4  ;;  %v2649_v8 = vmul.f32 %v5326_v35, %v5650_v9 }
 0x46e   : > { %6810 = vst [vmem:[#allocation13_spill] sm:$0xff] %v5812_v49 }
 0x46f   : > { %6793 = vst [vmem:[#allocation111_spill] sm:$0xff] %v5729_v6  ;;  %v2902_v46 = vrot.slane %v2876_v39, 4  ;;  %v2725_v39 = vmul.f32 %v5326_v35, %v5658_v60  ;;  %v5797_v62 = vsel %vm637_vm11, %v2899_v19, %v6464_v28  ;;  %v6808_v60 = vrot.slane %v5723_v30, 1 }
 0x470   : > { %v5753_v23 = vpop.permute.xlu1 %2303  ;;  %v5755_v7 = vpop.permute.xlu0 %2420  ;;  %6806 = vst [vmem:[#allocation10_spill] sm:$0xff] %v5797_v62  ;;  %v6812_v55 = vrot.slane %v5729_v6, 2 }
 0x471   : > { %6799 = vst [vmem:[#allocation113_spill] sm:$0xff] %v5753_v23  ;;  %v5766_v23 = vld [vmem:[%s6341_s1 + $0x70] ss:$0 sm:$0xff]  ;;  %v5808_v9 = vsel %vm406_vm8, %v2674_v45, %v6808_v60  ;;  %v5828_v45 = vsel %vm560_vm10, %v2826_v14, %v6813_v20  ;;  %v6815_v60 = vrot.slane %v5741_v50, 4  ;;  %v2829_v14 = vrot.slane %v2801_v38, 3 }
 0x472   : > { %6800 = vst [vmem:[#allocation109_spill] sm:$0xff] %v5766_v23  ;;  %6809 = vst [vmem:[#allocation11_spill] sm:$0xff] %v5808_v9  ;;  %v2877_v19 = vmul.f32 %v5326_v35, %v5766_v23  ;;  %v5818_v28 = vmul.f32 %v5329_v24, %v5766_v23  ;;  %v5823_v62 = vsel %vm483_vm9, %v2750_v22, %v6812_v55  ;;  %v2677_v35 = vrot.slane %v2649_v8, 1 }
 0x473   : > { %6814 = vst [vmem:[#allocation15_spill] sm:$0xff] %v5828_v45  ;;  %v5833_v49 = vsel %vm637_vm11, %v2902_v46, %v6815_v60  ;;  %v2753_v23 = vrot.slane %v2725_v39, 2  ;;  %v5839_v55 = vmul.f32 %v5317_v12, %v5676_v53  ;;  %v5849_v46 = vld [vmem:[%s6341_s1 + $0x78] ss:$0 sm:$0xff]  ;;  %v5853_v8 = vmul.f32 %v5317_v12, %v5685_v47 }
 0x474   : > { %v5785_v52 = vpop.permute.xlu1 %2422  ;;  %v5787_v57 = vpop.permute.xlu0 %2424  ;;  %6811 = vst [vmem:[#allocation14_spill] sm:$0xff] %v5818_v28  ;;  %6816 = vst [vmem:[#allocation29_spill] sm:$0xff] %v5833_v49  ;;  %v5857_v39 = vmul.f32 %v5317_v12, %v5691_v11  ;;  %v2905_v60 = vrot.slane %v2877_v19, 4  ;;  %v5862_v38 = vmul.f32 %v5309_v0, %v5670_v25  ;;  %v2650_v20 = vmul.f32 %v5309_v0, %v5676_v53 }
 0x475   : > { %6817 = vst [vmem:[#allocation16_spill] sm:$0xff] %v5849_v46  ;;  %v2802_v50 = vmul.f32 %v5309_v0, %v5691_v11  ;;  %v5872_v49 = vmul.f32 %v5317_v12, %v5849_v46  ;;  %v2655_v19 = vmul.f32 %v5358_v26, %v5588_v18  ;;  %v2878_v25 = vmul.f32 %v5309_v0, %v5849_v46 }
 0x476   : > { %6818 = vst [vmem:[#allocation28_spill] sm:$0xff] %v5862_v38  ;;  %v2731_v53 = vmul.f32 %v5358_v26, %v5601_v34  ;;  %v2807_v47 = vmul.f32 %v5358_v26, %v5607_v44  ;;  %v6819_v12 = vrot.slane %v5777_v40, 1  ;;  %v2883_v0 = vmul.f32 %v5358_v26, %v5655_v48 }
 0x477   : > { %v6820_v34 = vrot.slane %v5783_v13, 2  ;;  %v6821_v46 = vrot.slane %v5803_v51, 3  ;;  %v2680_v18 = vrot.slane %v2650_v20, 1  ;;  %v2756_v9 = vrot.slane %v2726_v43, 2 }
 0x478   : > { %v5841_v22 = vpop.permute.xlu1 %2426  ;;  %v5843_v1 = vpop.permute.xlu0 %2428  ;;  %v5890_v6 = vsel %vm406_vm8, %v2677_v35, %v6819_v12  ;;  %v6822_v12 = vrot.slane %v5818_v28, 4  ;;  %v2832_v40 = vrot.slane %v2802_v50, 3  ;;  %v2909_v26 = vrot.slane %v5872_v49, 4 }
 0x479   : > { %v5899_v44 = vsel %vm483_vm9, %v2753_v23, %v6820_v34  ;;  %v5904_v38 = vsel %vm560_vm10, %v2829_v14, %v6821_v46  ;;  %v2683_v48 = vrot.slane %v2655_v19, 1  ;;  %v6823_v13 = vrot.slane %v5839_v55, 1 }
 0x47a   : > { %v5909_v35 = vsel %vm637_vm11, %v2905_v60, %v6822_v12  ;;  %v2908_v34 = vrot.slane %v2878_v25, 4  ;;  %v2759_v51 = vrot.slane %v2731_v53, 2  ;;  %v2835_v14 = vrot.slane %v2807_v47, 3 }
 0x47b   : > { %v5915_v23 = vsel %vm406_vm8, %v2680_v18, %v6823_v13  ;;  %v6824_v60 = vrot.slane %v5853_v8, 2  ;;  %v6825_v50 = vrot.slane %v5857_v39, 3  ;;  %v5933_v13 = vmul.f32 %v5275_v56, %v5598_v59 }
 0x47c   : > { %v5883_v45 = vpop.permute.xlu1 %2430  ;;  %v5885_v11 = vpop.permute.xlu0 %2432  ;;  %v2911_v25 = vrot.slane %v2883_v0, 4  ;;  %v2170_v53 = vsel %vm705_vm7, %v5553_v27, %v5556_v10  ;;  %v2171_v47 = vsel %vm705_vm7, %v5556_v10, %v5558_v29  ;;  %v5950_v56 = vsel %vm637_vm11, %v2908_v34, %v2909_v26 }
 0x47d   : > { %v5924_v43 = vsel %vm483_vm9, %v2756_v9, %v6824_v60  ;;  %v5929_v20 = vsel %vm560_vm10, %v2832_v40, %v6825_v50  ;;  %v5943_v9 = vmul.f32 %v5286_v36, %v5619_v3  ;;  %v2656_v40 = vmul.f32 %v5391_v5, %v5625_v58  ;;  %v6830_v50 = vld [vmem:[#allocation97_spill] sm:$0xff] }
 0x47e   : > { %v6826_v59 = vrot.slane %v5613_v42, 1  ;;  %v5959_v10 = vmul.f32 %v5391_v5, %v5632_v2  ;;  %v5963_v36 = vmul.f32 %v5391_v5, %v5638_v32  ;;  %v2305_v3 = vsel %vm705_vm7, %v5575_v15, %v5580_v31 }
 0x47f   : > { %v2306_v58 = vsel %vm705_vm7, %v5580_v31, %v5582_v21  ;;  %v6827_v42 = vrot.slane %v5696_v16, 2  ;;  %v6828_v2 = vrot.slane %v5711_v37, 3  ;;  %v2186_v32 = vadd.f32 %v2170_v53, %v5538_v63  ;;  %v6833_v53 = vld [vmem:[#allocation86_spill] sm:$0xff] }
 0x480   : > { %v5917_v46 = vpop.permute.xlu1 %2434  ;;  %v5919_v28 = vpop.permute.xlu0 %2436  ;;  %v5955_v27 = vsel %vm406_vm8, %v6826_v59, %v2683_v48  ;;  %v2187_v0 = vadd.f32 %v2171_v47, %v5540_v41  ;;  %v2172_v15 = vsel %vm705_vm7, %v5558_v29, %v5560_v33  ;;  %v6829_v16 = vrot.slane %v5717_v17, 4  ;;  %v6835_v59 = vld [vmem:[#allocation88_spill] sm:$0xff] }
 0x481   : > { %v5974_v19 = vsel %vm483_vm9, %v6827_v42, %v2759_v51  ;;  %v5979_v18 = vsel %vm560_vm10, %v6828_v2, %v2835_v14  ;;  %v2173_v37 = vsel %vm705_vm7, %v5560_v33, %v5562_v61  ;;  %v2440_v63 = vsel %vm705_vm7, %v5755_v7, %v5785_v52  ;;  %v6831_v61 = vld [vmem:[#allocation98_spill] sm:$0xff] }
 0x482   : > { %v5991_v51 = vsel %vm637_vm11, %v6829_v16, %v2911_v25  ;;  %v2441_v41 = vsel %vm705_vm7, %v5785_v52, %v5787_v57  ;;  %v2685_v29 = vrot.slane %v2656_v40, 1  ;;  %v2321_v48 = vadd.f32 %v2305_v3, %v2186_v32  ;;  %v6832_v25 = vld [vmem:[#allocation103_spill] sm:$0xff]  ;;  %v6834_v40 = vld [vmem:[#allocation89_spill] sm:$0xff] }
 0x483   : > { %v2322_v34 = vadd.f32 %v2306_v58, %v2187_v0  ;;  %v2761_v17 = vrot.slane %v5959_v10, 2  ;;  %v2837_v14 = vrot.slane %v5963_v36, 3  ;;  %v2188_v60 = vadd.f32 %v2172_v15, %v5544_v54 }
 0x484   : > { %v5986_v12 = vpop.permute.xlu1 %2438  ;;  %v2556_v31 = vpop.permute.xlu0 %2555  ;;  %v2307_v33 = vsel %vm705_vm7, %v5582_v21, %v6830_v50  ;;  %v2308_v7 = vsel %vm705_vm7, %v6830_v50, %v6831_v61  ;;  %v6013_v52 = vmul.f32 %v5391_v5, %v6832_v25  ;;  %v2189_v47 = vadd.f32 %v2173_v37, %v6833_v53  ;;  %v6836_v37 = vld [vmem:[#allocation99_spill] sm:$0xff] }
 0x485   : > { %v2174_v10 = vsel %vm705_vm7, %v6835_v59, %v6834_v40  ;;  %v2456_v36 = vadd.f32 %v2440_v63, %v2321_v48  ;;  %v2457_v54 = vadd.f32 %v2441_v41, %v2322_v34  ;;  %v2442_v21 = vsel %vm705_vm7, %v5787_v57, %v5841_v22  ;;  %v6837_v63 = vld [vmem:[#allocation100_spill] sm:$0xff]  ;;  %v6844_v59 = vld [vmem:[#allocation114_spill] sm:$0xff] }
 0x486   : > { %v2443_v42 = vsel %vm705_vm7, %v5841_v22, %v5843_v1  ;;  %v2323_v32 = vadd.f32 %v2307_v33, %v2188_v60  ;;  %v2324_v0 = vadd.f32 %v2308_v7, %v2189_v47  ;;  %v2309_v41 = vsel %vm705_vm7, %v6837_v63, %v6836_v37  ;;  %v6839_v22 = vld [vmem:[#allocation112_spill] sm:$0xff]  ;;  %v6841_v33 = vld [vmem:[#allocation110_spill] sm:$0xff]  ;;  %v6842_v7 = vld [vmem:[#allocation77_spill] sm:$0xff] }
 0x487   : > { %v6838_v48 = vrot.slane %v5723_v30, 1  ;;  %v6037_v1 = vmul.f32 %v5329_v24, %v5644_v4  ;;  %v6843_v30 = vld [vmem:[#allocation95_spill] sm:$0xff] }
 0x488   : > { %v2558_v3 = vpop.permute.xlu1 %2557  ;;  %v2560_v58 = vpop.permute.xlu0 %2559  ;;  %v2458_v60 = vadd.f32 %v2442_v21, %v2323_v32  ;;  %v2459_v50 = vadd.f32 %v2443_v42, %v2324_v0  ;;  %v2190_v40 = vadd.f32 %v2174_v10, %v6843_v30  ;;  %v6847_v10 = vld [vmem:[#allocation115_spill] sm:$0xff] }
 0x489   : > { %v2575_v5 = vsel %vm705_vm7, %v2556_v31, %v2558_v3  ;;  %v2576_v2 = vsel %vm705_vm7, %v2558_v3, %v2560_v58  ;;  %v6033_v57 = vsel %vm406_vm8, %v6838_v48, %v2685_v29  ;;  %v6840_v31 = vld [vmem:[#allocation94_spill] sm:$0xff]  ;;  %v2444_v29 = vsel %vm705_vm7, %v5883_v45, %v5885_v11  ;;  %v6850_v48 = vld [vmem:[#allocation13_spill] sm:$0xff] }
 0x48a   : > { %v2591_v15 = vadd.f32 %v2575_v5, %v2456_v36  ;;  %v2592_v16 = vadd.f32 %v2576_v2, %v2457_v54  ;;  %v6041_v34 = vmul.f32 %v6840_v31, %v6839_v22  ;;  %v6845_v54 = vld [vmem:[#allocation11_spill] sm:$0xff]  ;;  %v2325_v5 = vadd.f32 %v2309_v41, %v2190_v40  ;;  %v6846_v2 = vld [vmem:[#allocation106_spill] sm:$0xff] }
 0x48b   : > { %v2310_v32 = vsel %vm705_vm7, %v6836_v37, %v6846_v2  ;;  %v2733_v0 = vmul.f32 %v6840_v31, %v6847_v10  ;;  %v6860_v10 = vld [vmem:[#allocation29_spill] sm:$0xff] }
 0x48c   : > { %v2623_v61 = vadd.f32 %v6841_v33, %v2591_v15  ;;  %v2624_v25 = vadd.f32 %v6842_v7, %v2592_v16  ;;  %v2562_v53 = vpop.permute.xlu1 %2561  ;;  %v2564_v47 = vpop.permute.xlu0 %2563  ;;  %v6848_v15 = vld [vmem:[#allocation101_spill] sm:$0xff]  ;;  %v6852_v7 = vld [vmem:[#allocation111_spill] sm:$0xff] }
 0x48d   : > { %v2577_v24 = vsel %vm705_vm7, %v2560_v58, %v2562_v53  ;;  %v2578_v4 = vsel %vm705_vm7, %v2562_v53, %v2564_v47  ;;  %v6060_v45 = vmul.f32 %v6840_v31, %v6848_v15  ;;  %v6849_v58 = vld [vmem:[#allocation7_spill] sm:$0xff] }
 0x48e   : > { %v2699_v36 = vadd.f32 %v6844_v59, %v2623_v61  ;;  %v2700_v3 = vadd.f32 %v6845_v54, %v2624_v25  ;;  %v2593_v21 = vadd.f32 %v2577_v24, %v2458_v60  ;;  %v2594_v42 = vadd.f32 %v2578_v4, %v2459_v50  ;;  %v6851_v60 = vld [vmem:[#allocation28_spill] sm:$0xff]  ;;  %v6854_v47 = vld [vmem:[#allocation107_spill] sm:$0xff] }
 0x48f   : > { %v2460_v61 = vadd.f32 %v2444_v29, %v2325_v5  ;;  %v6853_v25 = vrot.slane %v6852_v7, 2  ;;  %v6855_v30 = vrot.slane %v6854_v47, 3  ;;  %v6857_v4 = vld [vmem:[#allocation15_spill] sm:$0xff]  ;;  %v6858_v54 = vld [vmem:[#allocation92_spill] sm:$0xff]  ;;  %v6859_v5 = vld [vmem:[#allocation10_spill] sm:$0xff] }
 0x490   : > { %v2775_v16 = vadd.f32 %v6849_v58, %v2699_v36  ;;  %v2776_v63 = vadd.f32 %v5823_v62, %v2700_v3  ;;  %v2625_v22 = vadd.f32 %v6850_v48, %v2593_v21  ;;  %v2626_v50 = vadd.f32 %v6851_v60, %v2594_v42  ;;  %v2566_v41 = vpop.permute.xlu1 %2565  ;;  %v2568_v33 = vpop.permute.xlu0 %2567  ;;  %v6856_v62 = vld [vmem:[#allocation9_spill] sm:$0xff] }
 0x491   : > { %v2579_v37 = vsel %vm705_vm7, %v2566_v41, %v2568_v33  ;;  %v6070_v53 = vsel %vm483_vm9, %v6853_v25, %v2761_v17  ;;  %v6075_v40 = vsel %vm560_vm10, %v6855_v30, %v2837_v14  ;;  %v2326_v3 = vadd.f32 %v2310_v32, %v6858_v54  ;;  %v6869_v54 = vld [vmem:[#allocation102_spill] sm:$0xff] }
 0x492   : > { %v2851_v24 = vadd.f32 %v6856_v62, %v2775_v16  ;;  %v2852_v59 = vadd.f32 %v6857_v4, %v2776_v63  ;;  %v2701_v36 = vadd.f32 %v5890_v6, %v2625_v22  ;;  %v2702_v29 = vadd.f32 %v5915_v23, %v2626_v50  ;;  %v6861_v63 = vld [vmem:[#allocation109_spill] sm:$0xff]  ;;  %v6867_v4 = vld [vmem:[#allocation104_spill] sm:$0xff] }
 0x493   : > { %v2445_v17 = vsel %vm705_vm7, %v5885_v11, %v5917_v46  ;;  %v2595_v21 = vadd.f32 %v2579_v37, %v2460_v61  ;;  %v2913_v42 = vrot.slane %v6013_v52, 4  ;;  %v2687_v11 = vrot.slane %v6041_v34, 1  ;;  %v6862_v61 = vld [vmem:[#allocation108_spill] sm:$0xff]  ;;  %v6863_v37 = vld [vmem:[#allocation87_spill] sm:$0xff] }
 0x494   : > { %v6087_v14 = vadd.f32 %v6859_v5, %v2851_v24  ;;  %v6090_v15 = vadd.f32 %v6860_v10, %v2852_v59  ;;  %v2777_v58 = vadd.f32 %v5899_v44, %v2701_v36  ;;  %v2778_v6 = vadd.f32 %v5924_v43, %v2702_v29  ;;  %v2570_v23 = vpop.permute.xlu1 %2569  ;;  %v6866_v24 = vld [vmem:[#allocation93_spill] sm:$0xff] }
 0x495   : > { %v2627_v32 = vadd.f32 %v5933_v13, %v2595_v21  ;;  %v2580_v16 = vsel %vm705_vm7, %v2568_v33, %v2570_v23  ;;  %v6099_v52 = vmul.f32 %v6840_v31, %v6861_v63  ;;  %v2461_v48 = vadd.f32 %v2445_v17, %v2326_v3 }
 0x496   : > { %v6102_v22 = vmul.f32 0.70710677, %v6087_v14  ;;  %v6105_v60 = vmul.f32 0.70710677, %v6090_v15  ;;  %v2763_v44 = vrot.slane %v2733_v0, 2  ;;  %v2853_v43 = vadd.f32 %v5904_v38, %v2777_v58  ;;  %v6872_v58 = vld [vmem:[#allocation113_spill] sm:$0xff] }
 0x497   : > { %v2854_v13 = vadd.f32 %v5929_v20, %v2778_v6  ;;  %v2703_v50 = vadd.f32 %v5955_v27, %v2627_v32  ;;  %v2839_v34 = vrot.slane %v6060_v45, 3  ;;  %v2596_v33 = vadd.f32 %v2580_v16, %v2461_v48  ;;  %v6864_v20 = vld [vmem:[#allocation117_spill] sm:$0xff]  ;;  %v6873_v16 = vld [vmem:[#allocation8_spill] sm:$0xff]  ;;  %v2572_v48 = vpop.permute.xlu0 %2571 }
 0x498   : > { %v6112_v41 = vand.u32 2147483647, %v6102_v22  ;;  %v6115_v31 = vand.u32 2147483647, %v6105_v60  ;;  %v6119_v7 = vmul.f32 %v6863_v37, %v6862_v61  ;;  %v6122_v0 = vadd.f32 %v5909_v35, %v2853_v43  ;;  %v6868_v35 = vld [vmem:[#allocation116_spill] sm:$0xff]  ;;  %v6875_v43 = vld [vmem:[#allocation91_spill] sm:$0xff] }
 0x499   : > { %v6125_v38 = vadd.f32 %v5950_v56, %v2854_v13  ;;  %v6865_v27 = vrot.slane %v6864_v20, 4  ;;  %v2915_v25 = vrot.slane %v6099_v52, 4  ;;  %v2779_v62 = vadd.f32 %v5974_v19, %v2703_v50  ;;  %v6876_v37 = vld [vmem:[#allocation96_spill] sm:$0xff] }
 0x49a   : > { %v2951_v47 = vmul.f32 0.3275911, %v6112_v41  ;;  %v2952_v30 = vmul.f32 0.3275911, %v6115_v31  ;;  %v2658_v59 = vmul.f32 %v6867_v4, %v6866_v24  ;;  %v2311_v56 = vsel %vm705_vm7, %v6846_v2, %v6868_v35  ;;  %v6877_v24 = vld [vmem:[#allocation12_spill] sm:$0xff] }
 0x49b   : > { %v2914_v45 = vsel %vm637_vm11, %v6865_v27, %v2913_v42  ;;  %v6140_v36 = vmul.f32 0.70710677, %v6122_v0  ;;  %v6143_v29 = vmul.f32 0.70710677, %v6125_v38  ;;  %v6147_v3 = vmul.f32 %v6867_v4, %v6869_v54  ;;  %v6870_v42 = vld [vmem:[#allocation6_spill] sm:$0xff]  ;;  %v6879_v54 = vld [vmem:[#allocation105_spill] sm:$0xff] }
 0x49c   : > { %v2959_v17 = vadd.f32 1.0, %v2951_v47  ;;  %v2960_v21 = vadd.f32 1.0, %v2952_v30  ;;  %v2628_v19 = vadd.f32 %v5943_v9, %v2596_v33  ;;  %v6871_v5 = vrot.slane %v6870_v42, 1  ;;  %v2574_v47 = vpop.permute.xlu1 %2573 }
 0x49d   : > { %v2312_v2 = vsel %vm705_vm7, %v6868_v35, %v6872_v58  ;;  %v2945_v6 = vand.u32 2147483647, %v6140_v36  ;;  %v6158_v32 = vand.u32 2147483647, %v6143_v29  ;;  %v6874_v63 = vrot.slane %v6873_v16, 2  ;;  %v6880_v58 = vld [vmem:[#allocation14_spill] sm:$0xff] }
 0x49e   : > { %v2688_v10 = vsel %vm406_vm8, %v6871_v5, %v2687_v11  ;;  %v2327_v9 = vadd.f32 %v2311_v56, %v6875_v43  ;;  %v2446_v11 = vsel %vm705_vm7, %v5917_v46, %v5919_v28  ;;  %3243 = vrcp.f32 %v2959_v17 }
 0x49f   : > { %v2764_v52 = vsel %vm483_vm9, %v6874_v63, %v2763_v44  ;;  %v2855_v13 = vadd.f32 %v5979_v18, %v2779_v62  ;;  %v2447_v50 = vsel %vm705_vm7, %v5919_v28, %v5986_v12  ;;  %3245 = vrcp.f32 %v2960_v21 }
 0x4a0   : > { %v2953_v33 = vmul.f32 0.3275911, %v2945_v6  ;;  %v2954_v61 = vmul.f32 0.3275911, %v6158_v32  ;;  %v2328_v44 = vadd.f32 %v2312_v2, %v6876_v37  ;;  %v2704_v27 = vadd.f32 %v6033_v57, %v2628_v19 }
 0x4a1   : > { %v6174_v20 = vadd.f32 %v5991_v51, %v2855_v13  ;;  %v2581_v46 = vsel %vm705_vm7, %v2570_v23, %v2572_v48  ;;  %v2462_v30 = vadd.f32 %v2446_v11, %v2327_v9  ;;  %v6878_v4 = vrot.slane %v6877_v24, 3  ;;  %v3329_v51 = vld [vmem:[#allocation2 + $0x70] sm:$0xf] }
 0x4a2   : > { %v2961_v18 = vadd.f32 1.0, %v2953_v33  ;;  %v2962_v62 = vadd.f32 1.0, %v2954_v61  ;;  %v2463_v12 = vadd.f32 %v2447_v50, %v2328_v44  ;;  %v2780_v56 = vadd.f32 %v6070_v53, %v2704_v27 }
 0x4a3   : > { %v2840_v28 = vsel %vm560_vm10, %v6878_v4, %v2839_v34  ;;  %v6182_v35 = vmul.f32 0.70710677, %v6174_v20  ;;  %v2810_v17 = vmul.f32 %v3329_v51, %v6879_v54  ;;  %v3055_v57 = vsub.f32 0.0, %v6112_v41 }
 0x4a4   : > { %3247 = vrcp.f32 %v2961_v18  ;;  %v2597_v23 = vadd.f32 %v2581_v46, %v2462_v30  ;;  %v2582_v21 = vsel %vm705_vm7, %v2572_v48, %v2574_v47  ;;  %v3056_v19 = vsub.f32 0.0, %v6115_v31  ;;  %v6882_v48 = vld [vmem:[#allocation16_spill] sm:$0xff] }
 0x4a5   : > { %3249 = vrcp.f32 %v2962_v62  ;;  %v2947_v34 = vand.u32 2147483647, %v6182_v35  ;;  %v2689_v42 = vrot.slane %v2658_v59, 1  ;;  %v2856_v5 = vadd.f32 %v6075_v40, %v2780_v56 }
 0x4a6   : > { %v6881_v2 = vrot.slane %v6880_v58, 4  ;;  %v2629_v16 = vadd.f32 %v6037_v1, %v2597_v23  ;;  %v2598_v63 = vadd.f32 %v2582_v21, %v2463_v12  ;;  %v3057_v43 = vsub.f32 0.0, %v2945_v6 }
 0x4a7   : > { %v2955_v9 = vmul.f32 0.3275911, %v2947_v34  ;;  %v2765_v11 = vrot.slane %v6147_v3, 2  ;;  %v2886_v13 = vmul.f32 %v3329_v51, %v6882_v48  ;;  %v3063_v50 = vmul.f32 %v3055_v57, %v6112_v41 }
 0x4a8   : > { %v2916_v53 = vsel %vm637_vm11, %v6881_v2, %v2915_v25  ;;  %v6198_v33 = vadd.f32 %v2914_v45, %v2856_v5  ;;  %v2705_v59 = vadd.f32 %v2688_v10, %v2629_v16  ;;  %v2630_v40 = vadd.f32 %v6119_v7, %v2598_v63 }
 0x4a9   : > { %v3064_v61 = vmul.f32 %v3056_v19, %v6115_v31  ;;  %v3058_v25 = vsub.f32 0.0, %v6158_v32  ;;  %v2963_v37 = vadd.f32 1.0, %v2955_v9  ;;  %v6883_v1 = vrot.slane %v5839_v55, 1 }
 0x4aa   : > { %v6207_v3 = vmul.f32 0.70710677, %v6198_v33  ;;  %v2781_v27 = vadd.f32 %v2764_v52, %v2705_v59  ;;  %v2841_v46 = vrot.slane %v2810_v17, 3  ;;  %v3065_v45 = vmul.f32 %v3057_v43, %v2945_v6 }
 0x4ab   : > { %v2690_v44 = vsel %vm406_vm8, %v6883_v1, %v2689_v42  ;;  %3251 = vrcp.f32 %v2963_v37  ;;  %v6884_v10 = vrot.slane %v5853_v8, 2  ;;  %v2917_v31 = vrot.slane %v2886_v13, 4  ;;  %v6212_v47 = vpop.eup %3243 }
 0x4ac   : > { %v2706_v41 = vadd.f32 %v2690_v44, %v2630_v40  ;;  %v3071_v30 = vmul.f32 1.442695, %v3063_v50  ;;  %v6215_v55 = vand.u32 2147483647, %v6207_v3  ;;  %v2857_v18 = vadd.f32 %v2840_v28, %v2781_v27  ;;  %v6217_v24 = vpop.eup %3245 }
 0x4ad   : > { %v2766_v7 = vsel %vm483_vm9, %v6884_v10, %v2765_v11  ;;  %v2983_v52 = vmul.f32 1.0614054, %v6212_v47  ;;  %v3073_v4 = vmul.f32 1.442695, %v3064_v61  ;;  %v3066_v6 = vmul.f32 %v3058_v25, %v6158_v32 }
 0x4ae   : > { %v2782_v62 = vadd.f32 %v2766_v7, %v2706_v41  ;;  %v3059_v12 = vsub.f32 0.0, %v2947_v34  ;;  %v2984_v8 = vmul.f32 1.0614054, %v6217_v24  ;;  %v2956_v56 = vmul.f32 0.3275911, %v6215_v55 }
 0x4af   : > { %v6223_v51 = vadd.f32 %v2916_v53, %v2857_v18  ;;  %v6885_v54 = vrot.slane %v5857_v39, 3  ;;  %v2991_v28 = vadd.f32 -1.4531521, %v2983_v52  ;;  %v3075_v57 = vmul.f32 1.442695, %v3065_v45 }
 0x4b0   : > { %v2918_v23 = vsel %vm637_vm11, %v2909_v26, %v2917_v31  ;;  %3253 = vpow2.f32 %v3071_v30  ;;  %v2992_v32 = vadd.f32 -1.4531521, %v2984_v8  ;;  %v2964_v19 = vadd.f32 1.0, %v2956_v56 }
 0x4b1   : > { %v2842_v17 = vsel %vm560_vm10, %v6885_v54, %v2841_v46  ;;  %v6232_v42 = vmul.f32 0.70710677, %v6223_v51  ;;  %v6234_v5 = vpop.eup %3247  ;;  %v2999_v58 = vmul.f32 %v6212_v47, %v2991_v28  ;;  %3255 = vpow2.f32 %v3073_v4 }
 0x4b2   : > { %v2858_v21 = vadd.f32 %v2842_v17, %v2782_v62  ;;  %v3077_v39 = vmul.f32 1.442695, %v3066_v6  ;;  %v3067_v2 = vmul.f32 %v3059_v12, %v2947_v34  ;;  %v6237_v53 = vpop.eup %3249  ;;  %v3000_v49 = vmul.f32 %v6217_v24, %v2992_v32 }
 0x4b3   : > { %v2985_v26 = vmul.f32 1.0614054, %v6234_v5  ;;  %3257 = vrcp.f32 %v2964_v19  ;;  %v3007_v63 = vadd.f32 1.4214138, %v2999_v58  ;;  %v2986_v43 = vmul.f32 1.0614054, %v6237_v53 }
 0x4b4   : > { %v6241_v16 = vadd.f32 %v2918_v23, %v2858_v21  ;;  %v2949_v9 = vand.u32 2147483647, %v6232_v42  ;;  %v6246_v11 = vmul.f32 0.5, %v6087_v14  ;;  %v3008_v48 = vadd.f32 1.4214138, %v3000_v49 }
 0x4b5   : > { %v2993_v13 = vadd.f32 -1.4531521, %v2985_v26  ;;  %3259 = vpow2.f32 %v3075_v57  ;;  %v3015_v34 = vmul.f32 %v6212_v47, %v3007_v63  ;;  %v2994_v50 = vadd.f32 -1.4531521, %v2986_v43 }
 0x4b6   : > { %3261 = vpow2.f32 %v3077_v39  ;;  %v2957_v59 = vmul.f32 0.3275911, %v2949_v9  ;;  %v3016_v40 = vmul.f32 %v6217_v24, %v3008_v48  ;;  %v3079_v25 = vmul.f32 1.442695, %v3067_v2 }
 0x4b7   : > { %v3001_v61 = vmul.f32 %v6234_v5, %v2993_v13  ;;  %v6252_v37 = vmul.f32 0.70710677, %v6241_v16  ;;  %v3023_v1 = vadd.f32 -0.28449672, %v3015_v34  ;;  %v3002_v14 = vmul.f32 %v6237_v53, %v2994_v50 }
 0x4b8   : > { %v3060_v44 = vsub.f32 0.0, %v6215_v55  ;;  %v2965_v27 = vadd.f32 1.0, %v2957_v59  ;;  %v6256_v46 = vpop.eup %3251  ;;  %v3024_v41 = vadd.f32 -0.28449672, %v3016_v40  ;;  %v6265_v62 = vmul.f32 0.5, %v6090_v15 }
 0x4b9   : > { %v3009_v45 = vadd.f32 1.4214138, %v3001_v61  ;;  %v6259_v10 = vand.u32 2147483647, %v6252_v37  ;;  %v3031_v7 = vmul.f32 %v6212_v47, %v3023_v1  ;;  %v3010_v31 = vadd.f32 1.4214138, %v3002_v14 }
 0x4ba   : > { %v2987_v30 = vmul.f32 1.0614054, %v6256_v46  ;;  %3263 = vrcp.f32 %v2965_v27  ;;  %v3032_v18 = vmul.f32 %v6217_v24, %v3024_v41  ;;  %v3068_v56 = vmul.f32 %v3060_v44, %v6215_v55 }
 0x4bb   : > { %v3017_v52 = vmul.f32 %v6234_v5, %v3009_v45  ;;  %v2958_v4 = vmul.f32 0.3275911, %v6259_v10  ;;  %v3039_v6 = vadd.f32 0.2548296, %v3031_v7  ;;  %v3018_v12 = vmul.f32 %v6237_v53, %v3010_v31 }
 0x4bc   : > { %v2995_v8 = vadd.f32 -1.4531521, %v2987_v30  ;;  %vm3103_vm13 = vcmp.ge.f32.partialorder %v6102_v22, 0.0  ;;  %v3040_v54 = vadd.f32 0.2548296, %v3032_v18  ;;  %3265 = vpow2.f32 %v3079_v25 }
 0x4bd   : > { %v3025_v17 = vadd.f32 -0.28449672, %v3017_v52  ;;  %v2966_v28 = vadd.f32 1.0, %v2958_v4  ;;  %v3254_v57 = vpop.eup %3253  ;;  %v3047_v15 = vmul.f32 %v6212_v47, %v3039_v6  ;;  %vm3104_vm14 = vcmp.ge.f32.partialorder %v6105_v60, 0.0 }
 0x4be   : > { %v3026_v23 = vadd.f32 -0.28449672, %v3018_v12  ;;  %v3003_v21 = vmul.f32 %v6256_v46, %v2995_v8  ;;  %v3061_v32 = vsub.f32 0.0, %v2949_v9  ;;  %v3256_v19 = vpop.eup %3255  ;;  %v3048_v58 = vmul.f32 %v6217_v24, %v3040_v54 }
 0x4bf   : > { %v3033_v55 = vmul.f32 %v6234_v5, %v3025_v17  ;;  %v6278_v39 = vmul.f32 0.5, %v6122_v0  ;;  %3267 = vrcp.f32 %v2966_v28  ;;  %v3087_v49 = vmul.f32 %v3254_v57, %v3047_v15 }
 0x4c0   : > { %v6280_v2 = vpop.eup %3257  ;;  %v3034_v47 = vmul.f32 %v6237_v53, %v3026_v23  ;;  %v3011_v26 = vadd.f32 1.4214138, %v3003_v21  ;;  %v3081_v63 = vmul.f32 1.442695, %v3068_v56  ;;  %v3088_v43 = vmul.f32 %v3256_v19, %v3048_v58 }
 0x4c1   : > { %v3041_v48 = vadd.f32 0.2548296, %v3033_v55  ;;  %v3130_v13 = vmul.f32 0.5, %v6125_v38  ;;  %v2988_v34 = vmul.f32 1.0614054, %v6280_v2  ;;  %v3095_v50 = vsub.f32 1.0, %v3087_v49 }
 0x4c2   : > { %v3260_v24 = vpop.eup %3259  ;;  %v3042_v59 = vadd.f32 0.2548296, %v3034_v47  ;;  %v3019_v0 = vmul.f32 %v6256_v46, %v3011_v26  ;;  %v3069_v40 = vmul.f32 %v3061_v32, %v2949_v9  ;;  %v3096_v25 = vsub.f32 1.0, %v3088_v43 }
 0x4c3   : > { %v3262_v61 = vpop.eup %3261  ;;  %v3049_v1 = vmul.f32 %v6234_v5, %v3041_v48  ;;  %vm3105_vm15 = vcmp.ge.f32.partialorder %v6140_v36, 0.0  ;;  %v2996_v14 = vadd.f32 -1.4531521, %v2988_v34  ;;  %v3111_v44 = vsub.f32 0.0, %v3095_v50 }
 0x4c4   : > { %v3050_v27 = vmul.f32 %v6237_v53, %v3042_v59  ;;  %v3027_v38 = vadd.f32 -0.28449672, %v3019_v0  ;;  %3269 = vpow2.f32 %v3081_v63  ;;  %v3112_v41 = vsub.f32 0.0, %v3096_v25 }
 0x4c5   : > { %v3089_v45 = vmul.f32 %v3260_v24, %v3049_v1  ;;  %v3004_v7 = vmul.f32 %v6280_v2, %v2996_v14  ;;  %v3062_v31 = vsub.f32 0.0, %v6259_v10  ;;  %v3119_v9 = vsel %vm3103_vm13, %v3095_v50, %v3111_v44 }
 0x4c6   : > { %v3090_v30 = vmul.f32 %v3262_v61, %v3050_v27  ;;  %v3035_v5 = vmul.f32 %v6256_v46, %v3027_v38  ;;  %v3083_v18 = vmul.f32 1.442695, %v3069_v40  ;;  %v3135_v4 = vadd.f32 1.0, %v3119_v9 }
 0x4c7   : > { %v6294_v52 = vpop.eup %3263  ;;  %v3120_v53 = vsel %vm3104_vm14, %v3096_v25, %v3112_v41  ;;  %v3097_v6 = vsub.f32 1.0, %v3089_v45  ;;  %v3012_v12 = vadd.f32 1.4214138, %v3004_v7  ;;  %v3070_v57 = vmul.f32 %v3062_v31, %v6259_v10 }
 0x4c8   : > { %v3136_v22 = vadd.f32 1.0, %v3120_v53  ;;  %v3098_v8 = vsub.f32 1.0, %v3090_v30  ;;  %v3043_v56 = vadd.f32 0.2548296, %v3035_v5  ;;  %v2989_v54 = vmul.f32 1.0614054, %v6294_v52 }
 0x4c9   : > { %v3143_v17 = vmul.f32 %v3135_v4, %v6246_v11  ;;  %v3113_v28 = vsub.f32 0.0, %v3097_v6  ;;  %v3020_v60 = vmul.f32 %v6280_v2, %v3012_v12  ;;  %v3266_v15 = vpop.eup %3265  ;;  %vm3106_vm0 = vcmp.ge.f32.partialorder %v6143_v29, 0.0 }
 0x4ca   : > { %v3144_v23 = vmul.f32 %v3136_v22, %v6265_v62  ;;  %v3114_v21 = vsub.f32 0.0, %v3098_v8  ;;  %v3051_v32 = vmul.f32 %v6256_v46, %v3043_v56  ;;  %v2997_v19 = vadd.f32 -1.4531521, %v2989_v54 }
 0x4cb   : > { %3151 = vst [vmem:[%s6303_s8] sm:$0xff] %v3143_v17  ;;  %v3121_v58 = vsel %vm3105_vm15, %v3097_v6, %v3113_v28  ;;  %v3028_v55 = vadd.f32 -0.28449672, %v3020_v60  ;;  %3271 = vpow2.f32 %v3083_v18  ;;  %v3085_v43 = vmul.f32 1.442695, %v3070_v57 }
 0x4cc   : > { %v3268_v11 = vpop.eup %3267  ;;  %3152 = vst [vmem:[%s6303_s8 + $0x8] sm:$0xff] %v3144_v23  ;;  %v3137_v49 = vadd.f32 1.0, %v3121_v58  ;;  %v3122_v10 = vsel %vm3106_vm0, %v3098_v8, %v3114_v21  ;;  %v3091_v47 = vmul.f32 %v3266_v15, %v3051_v32  ;;  %v3005_v62 = vmul.f32 %v6294_v52, %v2997_v19 }
 0x4cd   : > { %v3138_v26 = vadd.f32 1.0, %v3122_v10  ;;  %v3036_v46 = vmul.f32 %v6280_v2, %v3028_v55  ;;  %v2990_v63 = vmul.f32 1.0614054, %v3268_v11  ;;  %vm3107_vm1 = vcmp.ge.f32.partialorder %v6182_v35, 0.0 }
 0x4ce   : > { %v3145_v36 = vmul.f32 %v3137_v49, %v6278_v39  ;;  %v3099_v48 = vsub.f32 1.0, %v3091_v47  ;;  %v3013_v29 = vadd.f32 1.4214138, %v3005_v62  ;;  %3273 = vpow2.f32 %v3085_v43 }
 0x4cf   : > { %v3146_v34 = vmul.f32 %v3138_v26, %v3130_v13  ;;  %v3044_v24 = vadd.f32 0.2548296, %v3036_v46  ;;  %v2998_v50 = vadd.f32 -1.4531521, %v2990_v63  ;;  %v3131_v14 = vmul.f32 0.5, %v6174_v20 }
 0x4d0   : > { %3153 = vst [vmem:[%s6303_s8 + $0x10] sm:$0xff] %v3145_v36  ;;  %v3115_v59 = vsub.f32 0.0, %v3099_v48  ;;  %v3021_v0 = vmul.f32 %v6294_v52, %v3013_v29  ;;  %vm3108_vm2 = vcmp.ge.f32.partialorder %v6207_v3, 0.0  ;;  %v3132_v18 = vmul.f32 0.5, %v6198_v33 }
 0x4d1   : > { %v3270_v40 = vpop.eup %3269  ;;  %3154 = vst [vmem:[%s6303_s8 + $0x18] sm:$0xff] %v3146_v34  ;;  %v3052_v61 = vmul.f32 %v6280_v2, %v3044_v24  ;;  %v3006_v25 = vmul.f32 %v3268_v11, %v2998_v50  ;;  %vm3109_vm3 = vcmp.ge.f32.partialorder %v6232_v42, 0.0  ;;  %vm3110_vm4 = vcmp.ge.f32.partialorder %v6252_v37, 0.0 }
 0x4d2   : > { %v3123_v1 = vsel %vm3107_vm1, %v3099_v48, %v3115_v59  ;;  %v3029_v39 = vadd.f32 -0.28449672, %v3021_v0  ;;  %v3134_v23 = vmul.f32 0.5, %v6241_v16 }
 0x4d3   : > { %v3139_v13 = vadd.f32 1.0, %v3123_v1  ;;  %v3092_v44 = vmul.f32 %v3270_v40, %v3052_v61  ;;  %v3014_v27 = vadd.f32 1.4214138, %v3006_v25 }
 0x4d4   : > { %v3037_v38 = vmul.f32 %v6294_v52, %v3029_v39 }
 0x4d5   : > { %v3147_v41 = vmul.f32 %v3139_v13, %v3131_v14  ;;  %v3100_v45 = vsub.f32 1.0, %v3092_v44  ;;  %v3022_v7 = vmul.f32 %v3268_v11, %v3014_v27 }
 0x4d6   : > { %v3045_v31 = vadd.f32 0.2548296, %v3037_v38 }
 0x4d7   : > { %3155 = vst [vmem:[%s6303_s8 + $0x20] sm:$0xff] %v3147_v41  ;;  %v3116_v35 = vsub.f32 0.0, %v3100_v45  ;;  %v3030_v9 = vadd.f32 -0.28449672, %v3022_v7 }
 0x4d8   : > { %v3272_v2 = vpop.eup %3271  ;;  %v3053_v30 = vmul.f32 %v6294_v52, %v3045_v31  ;;  %v3133_v52 = vmul.f32 0.5, %v6223_v51 }
 0x4d9   : > { %v3124_v5 = vsel %vm3108_vm2, %v3100_v45, %v3116_v35  ;;  %v3038_v20 = vmul.f32 %v3268_v11, %v3030_v9 }
 0x4da   : > { %v3140_v4 = vadd.f32 1.0, %v3124_v5  ;;  %v3093_v53 = vmul.f32 %v3272_v2, %v3053_v30 }
 0x4db   : > { %v3046_v6 = vadd.f32 0.2548296, %v3038_v20  ;;  %v3274_v56 = vpop.eup %3273 }
 0x4dc   : > { %v3148_v12 = vmul.f32 %v3140_v4, %v3132_v18  ;;  %v3101_v22 = vsub.f32 1.0, %v3093_v53 }
 0x4dd   : > { %v3054_v8 = vmul.f32 %v3268_v11, %v3046_v6 }
 0x4de   : > { %3156 = vst [vmem:[%s6303_s8 + $0x28] sm:$0xff] %v3148_v12  ;;  %v3117_v54 = vsub.f32 0.0, %v3101_v22 }
 0x4df   : > { %v3094_v3 = vmul.f32 %v3274_v56, %v3054_v8 }
 0x4e0   : > { %v3125_v17 = vsel %vm3109_vm3, %v3101_v22, %v3117_v54 }
 0x4e1   : > { %v3141_v28 = vadd.f32 1.0, %v3125_v17  ;;  %v3102_v60 = vsub.f32 1.0, %v3094_v3 }
 0x4e3   : > { %v3149_v33 = vmul.f32 %v3141_v28, %v3133_v52  ;;  %v3118_v57 = vsub.f32 0.0, %v3102_v60 }
 0x4e5   : > { %3157 = vst [vmem:[%s6303_s8 + $0x30] sm:$0xff] %v3149_v33  ;;  %v3126_v15 = vsel %vm3110_vm4, %v3102_v60, %v3118_v57 }
 0x4e6   : > { %v3142_v21 = vadd.f32 1.0, %v3126_v15 }
 0x4e8   : > { %v3150_v32 = vmul.f32 %v3142_v21, %v3134_v23 }
 0x4ea   : > { %3158 = vst [vmem:[%s6303_s8 + $0x38] sm:$0xff] %v3150_v32 }
 0x4eb PF: > { %s13_s12 = sadd.s32 1, %s3336_s12  }
 0x4ec   : > { %p10_p4 = scmp.ge.s32.totalorder %s13_s12, 4  }
 0x4ee   :  { %12 = sbr.rel (!%p10_p4) target bundleno = 1 (0x1), region = 62 }

</bundles_post_ra>
